<compile_context>
chip_gen: v5e
topology: v5e:2x2
jax: 0.10.0
libtpu: 0.0.40
codegen_flags: <defaults>
</compile_context>

<pallas_src>
import functools

import jax
import jax.numpy as jnp
from jax import lax
from jax.experimental import pallas as pl
from jax.experimental.pallas import tpu as pltpu

SECURE_TENSOR_MIN = 1e-5


def _round_up(x: int, m: int) -> int:
    return ((x + m - 1) // m) * m


def _has_bf16_vector_units() -> bool:
    """v6e/v7x have bf16 VPU/EUP; v5e and older do not (bf16 elementwise only adds converts)."""
    try:
        kind = jax.devices()[0].device_kind.lower()
    except Exception:
        return True
    for old in ("v2", "v3", "v4", "v5"):
        if old in kind:
            return False
    return True


def _vmem_capacity_bytes() -> int:
    try:
        return int(pltpu.get_tpu_info().vmem_capacity_bytes)
    except Exception:
        return 64 * 1024 * 1024   # conservative (v7x per-TC)


def _nnmf_dense_kernel(x_ref, w_ref, wt_ref, h_ref, *, n_iterations: int,
                       out_real: int, k_chunk: int, compute_dtype, elem_dtype,
                       approx_recip: bool):
    """One batch tile of the NNMF fixed-point iteration.

    x_ref : (TB, IN_pad)       elem_dtype     batch tile of the (non-negative) input
    w_ref : (OUT_pad, IN_pad)  compute_dtype  clamp_min + L1-normalized over IN, zero-padded
    wt_ref: (IN_pad, OUT_pad)  compute_dtype  pre-transposed copy of W (natural MXU layout)
    h_ref : (TB, OUT_pad)      f32            output latent code
    """
    tb, in_pad = x_ref.shape
    out_pad = wt_ref.shape[1]
    num_chunks = in_pad // k_chunk

    # _reset_h(): uniform, L1-normalized over the *real* out_features.
    if out_real == out_pad:
        mask = None
        h0 = jnp.full((tb, out_pad), 1.0 / out_real, dtype=jnp.float32)
    else:
        col = lax.broadcasted_iota(jnp.int32, (tb, out_pad), 1)
        mask = (col < out_real).astype(jnp.float32)
        h0 = mask * (1.0 / out_real)

    def body(_, h):
        h_c = h.astype(compute_dtype)
        hw = None
        # Fused over IN chunks: recon/upd for chunk c never exceed (TB, k_chunk),
        # and the MXU of chunk c+1 overlaps the clamp/recip/mul of chunk c.
        for c in range(num_chunks):
            c0 = c * k_chunk
            w_c = w_ref[:, c0:c0 + k_chunk]        # (OUT_pad, kc)
            wt_c = wt_ref[c0:c0 + k_chunk, :]      # (kc, OUT_pad)
            x_c = x_ref[:, c0:c0 + k_chunk].astype(elem_dtype)
            # _reconstruct(h) chunk: h @ W[:, chunk]   (MXU, f32 accumulation)
            recon = jnp.dot(h_c, w_c, preferred_element_type=jnp.float32)
            # _secure_tensor()
            recon = jnp.maximum(recon, SECURE_TENSOR_MIN)
            # nnmf_update = input / reconstruction
            if approx_recip:
                upd = x_c * pl.reciprocal(recon, approx=True).astype(elem_dtype)
            else:
                upd = (x_c.astype(jnp.float32) / recon).astype(elem_dtype)
            # _forward(update) chunk: upd @ W^T[chunk, :]   (natural NN layout, no transpose)
            part = jnp.dot(upd.astype(compute_dtype), wt_c,
                           preferred_element_type=jnp.float32)
            hw = part if hw is None else hw + part
        # multiplicative update + _process_h(): secure, mask out padded OUT cols,
        # L1-normalize (new_h >= 1e-5 on real cols -> abs() / 1e-12 floor redundant).
        new_h = jnp.maximum(h * hw, SECURE_TENSOR_MIN)
        if mask is not None:
            new_h = new_h * mask
        denom = jnp.sum(new_h, axis=-1, keepdims=True)
        return new_h * pl.reciprocal(denom, approx=approx_recip)

    h = lax.fori_loop(0, n_iterations, body, h0, unroll=(n_iterations <= 8))
    h_ref[...] = h.astype(h_ref.dtype)


def nnmf_dense_forward(x, w, n_iterations: int, *, batch_tile=None, precision="fast"):
    """NNMF fixed-point forward. Returns h of shape (batch, out_features), f32.

    precision:
      "fast" (default): bf16 MXU operands + EUP approx reciprocals; bf16 x/elementwise
                        on chips with bf16 vector units (v6e/v7x).
      "high":           f32 everywhere + exact divide (validation path).
    """
    assert precision in ("fast", "high")
    assert n_iterations >= 0
    b, in_features = x.shape
    out_features, in_features_w = w.shape
    assert in_features == in_features_w

    # ---- normalize_weights(), hoisted out of the kernel (one-shot, memory-bound) ----
    w32 = jnp.maximum(w.astype(jnp.float32), SECURE_TENSOR_MIN)
    w32 = w32 / jnp.sum(w32, axis=-1, keepdims=True)

    if precision == "high":
        compute_dtype = jnp.float32
        elem_dtype = jnp.float32
        approx = False
    else:
        compute_dtype = jnp.bfloat16
        approx = True
        elem_dtype = jnp.bfloat16 if _has_bf16_vector_units() else jnp.float32

    # ---- lane-dense padding of IN / OUT (zeros AFTER normalization: numerics unchanged;
    #      padded OUT columns are masked in-kernel before the L1-normalize) ----
    in_pad = _round_up(in_features, 128)
    out_pad = _round_up(out_features, 128)
    if (in_pad, out_pad) != (in_features, out_features):
        w32 = jnp.pad(w32, ((0, out_pad - out_features), (0, in_pad - in_features)))
    w_k = w32.astype(compute_dtype)                   # (OUT_pad, IN_pad), VMEM-resident
    wt_k = jnp.transpose(w32).astype(compute_dtype)   # (IN_pad, OUT_pad), one-shot transpose

    x_k = x.astype(elem_dtype)                        # bf16 at the boundary on fast path
    if in_pad != in_features:
        x_k = jnp.pad(x_k, ((0, 0), (0, in_pad - in_features)))

    # ---- batch tiling: 16-aligned (bf16 sublane pack); aim for >=2 grid steps ----
    if batch_tile is not None:
        tb = _round_up(min(int(batch_tile), max(b, 1)), 16)
    elif b >= 512:
        tb = 256
    elif b >= 256:
        tb = 128
    else:
        tb = max(16, _round_up(-(-b // 2), 16))       # two tiles -> both v7x TCs get work
    padded_b = _round_up(b, tb)
    if padded_b != b:
        x_k = jnp.pad(x_k, ((0, padded_b - b), (0, 0)))   # zero rows stay finite in-kernel
    grid = (padded_b // tb,)

    # ---- IN-chunk size for the fused recon/update loop (must divide in_pad) ----
    if in_pad <= 512:
        k_chunk = in_pad
    elif in_pad % 512 == 0:
        k_chunk = 512
    elif in_pad % 256 == 0:
        k_chunk = 256
    else:
        k_chunk = 128

    # ---- generation-aware VMEM budget with headroom (never the full per-TC VMEM) ----
    comp_isz = jnp.dtype(compute_dtype).itemsize
    x_isz = jnp.dtype(elem_dtype).itemsize
    weight_bytes = 2 * 2 * out_pad * in_pad * comp_isz          # W + W^T (worst-case 2 bufs)
    io_bytes = 2 * tb * in_pad * x_isz + 2 * tb * out_pad * 4   # double-buffered x / h
    work_bytes = tb * (4 * k_chunk + 6 * out_pad) * 4           # chunked loop temporaries
    needed = int(1.5 * (weight_bytes + io_bytes + work_bytes))
    cap = _vmem_capacity_bytes()
    usable = max(int(0.85 * cap), cap - 16 * 1024 * 1024)       # ~54 MiB on v7x, ~112 MiB on v5e/v6e
    vmem_limit = int(min(max(needed, 32 * 1024 * 1024), usable))

    cost = pl.CostEstimate(
        flops=int(4 * n_iterations * padded_b * in_pad * out_pad),
        transcendentals=int(n_iterations * padded_b * (in_pad + 1)) if approx else 0,
        bytes_accessed=int(x_k.size * x_isz + (w_k.size + wt_k.size) * comp_isz
                           + padded_b * out_pad * 4),
    )

    kernel = functools.partial(
        _nnmf_dense_kernel,
        n_iterations=n_iterations,
        out_real=out_features,
        k_chunk=k_chunk,
        compute_dtype=compute_dtype,
        elem_dtype=elem_dtype,
        approx_recip=approx,
    )

    def _run(single_buffer_weights: bool):
        if single_buffer_weights:
            # Constant index_map + single buffer: W / W^T stay VMEM-resident once, at
            # half the default double-buffered footprint.
            w_spec = pl.BlockSpec((out_pad, in_pad), lambda i: (0, 0),
                                  pipeline_mode=pl.Buffered(buffer_count=1))
            wt_spec = pl.BlockSpec((in_pad, out_pad), lambda i: (0, 0),
                                   pipeline_mode=pl.Buffered(buffer_count=1))
        else:
            w_spec = pl.BlockSpec((out_pad, in_pad), lambda i: (0, 0))
            wt_spec = pl.BlockSpec((in_pad, out_pad), lambda i: (0, 0))
        fn = pl.pallas_call(
            kernel,
            out_shape=jax.ShapeDtypeStruct((padded_b, out_pad), jnp.float32),
            grid_spec=pltpu.PrefetchScalarGridSpec(
                num_scalar_prefetch=0,
                grid=grid,
                in_specs=[
                    pl.BlockSpec((tb, in_pad), lambda i: (i, 0)),
                    w_spec,
                    wt_spec,
                ],
                out_specs=pl.BlockSpec((tb, out_pad), lambda i: (i, 0)),
            ),
            compiler_params=pltpu.CompilerParams(
                dimension_semantics=("parallel",),   # shard batch tiles across v7x's 2 TCs
                vmem_limit_bytes=vmem_limit,
            ),
            cost_estimate=cost,
        )
        return jax.block_until_ready(fn(x_k, w_k, wt_k))

    try:
        h = _run(single_buffer_weights=True)
    except Exception:
        # Fallback if this JAX build rejects single-buffered (Buffered(1)) inputs.
        h = _run(single_buffer_weights=False)

    return h[:b, :out_features]


def nnmf_dense_reference(x, w, n_iterations: int):
    """Pure-JAX f32 reference mirroring the PyTorch forward pass."""
    w = jnp.maximum(w.astype(jnp.float32), SECURE_TENSOR_MIN)
    w = w / jnp.sum(w, axis=-1, keepdims=True)
    b = x.shape[0]
    out_features = w.shape[0]
    h = jnp.full((b, out_features), 1.0 / out_features, dtype=jnp.float32)
    x = x.astype(jnp.float32)
    for _ in range(n_iterations):
        recon = jnp.maximum(h @ w, SECURE_TENSOR_MIN)
        upd = x / recon
        h = h * (upd @ w.T)
        h = jnp.maximum(h, SECURE_TENSOR_MIN)
        h = h / jnp.maximum(jnp.sum(jnp.abs(h), axis=-1, keepdims=True), 1e-12)
    return h


if __name__ == "__main__":
    # Small dense-layer shapes. batch deliberately not a multiple of the tile to
    # exercise batch padding + a multi-step grid; IN/OUT are multiples of 128.
    batch = 44
    in_features = 256
    out_features = 128
    n_iterations = 5

    key = jax.random.PRNGKey(0)
    kx, kw = jax.random.split(key)
    # NNMF assumes non-negative data; weights mirror torch.rand(out, in).
    x = jax.random.uniform(kx, (batch, in_features), jnp.float32, 0.0, 1.0)
    w = jax.random.uniform(kw, (out_features, in_features), jnp.float32, 0.0, 1.0)

    h_ref = nnmf_dense_reference(x, w, n_iterations)

    # High-precision path: f32 MXU operands + exact divide -> tight check.
    h_f32 = nnmf_dense_forward(x, w, n_iterations, batch_tile=16, precision="high")
    jax.block_until_ready(h_f32)
    assert h_f32.shape == (batch, out_features)
    assert bool(jnp.all(jnp.isfinite(h_f32)))
    assert jnp.allclose(h_f32, h_ref, atol=3e-5, rtol=2e-3), "f32 kernel mismatch vs reference"

    # Fast path (default tiling): bf16 MXU + approx reciprocals -> looser tolerance.
    h_fast = nnmf_dense_forward(x, w, n_iterations, precision="fast")
    jax.block_until_ready(h_fast)
    assert h_fast.shape == (batch, out_features)
    assert bool(jnp.all(jnp.isfinite(h_fast)))
    assert jnp.allclose(h_fast, h_ref, atol=5e-3, rtol=1e-1), "bf16 kernel mismatch vs reference"
    # Structural invariant: rows stay (approximately) L1-normalized.
    assert jnp.allclose(jnp.sum(h_fast, axis=-1), 1.0, atol=5e-3)

    print("KERNEL_OK")
</pallas_src>

<mosaic_0001>
module attributes {stable_mosaic.version = 11 : i64} {
  func.func @_nnmf_dense_kernel(%arg0: i32, %arg1: memref<16x256xf32, #tpu.memory_space<vmem>>, %arg2: memref<128x256xf32, #tpu.memory_space<vmem>>, %arg3: memref<256x128xf32, #tpu.memory_space<vmem>>, %arg4: memref<16x128xf32, #tpu.memory_space<vmem>>) attributes {dimension_semantics = [#tpu.dimension_semantics<parallel>], iteration_bounds = array<i64: 3>, scalar_prefetch = 0 : i64, scratch_operands = 0 : i64, tpu.core_type = #tpu.core_type<tc>, window_params = [{transform_indices = @transform_0, window_bounds = array<i64: 16, 256>}, {pipeline_mode = #tpu.pipeline_mode<synchronous>, transform_indices = @transform_1, window_bounds = array<i64: 128, 256>}, {pipeline_mode = #tpu.pipeline_mode<synchronous>, transform_indices = @transform_2, window_bounds = array<i64: 256, 128>}, {transform_indices = @transform_3, window_bounds = array<i64: 16, 128>}]} {
    %cst = arith.constant 7.812500e-03 : f32
    %0 = vector.broadcast %cst : f32 to vector<16x128xf32>
    %c0_i32 = arith.constant 0 : i32
    %c0 = arith.constant 0 : index
    %c0_0 = arith.constant 0 : index
    %1 = vector.load %arg2[%c0, %c0_0] : memref<128x256xf32, #tpu.memory_space<vmem>>, vector<128x256xf32>
    %c0_1 = arith.constant 0 : index
    %c0_2 = arith.constant 0 : index
    %2 = vector.load %arg3[%c0_1, %c0_2] : memref<256x128xf32, #tpu.memory_space<vmem>>, vector<256x128xf32>
    %c0_3 = arith.constant 0 : index
    %c0_4 = arith.constant 0 : index
    %3 = vector.load %arg1[%c0_3, %c0_4] : memref<16x256xf32, #tpu.memory_space<vmem>>, vector<16x256xf32>
    %cst_5 = arith.constant dense<0.000000e+00> : vector<16x256xf32>
    %4 = tpu.matmul %0, %1, %cst_5 {dimension_numbers = #tpu.dot_dimension_numbers<[1], [0], [0], [1], [0, 0, 1, 1], [], []>} : vector<16x128xf32>, vector<128x256xf32>, vector<16x256xf32> -> vector<16x256xf32>
    %cst_6 = arith.constant 9.99999974E-6 : f32
    %5 = vector.broadcast %cst_6 : f32 to vector<16x256xf32>
    %6 = arith.maximumf %4, %5 : vector<16x256xf32>
    %7 = arith.divf %3, %6 : vector<16x256xf32>
    %cst_7 = arith.constant dense<0.000000e+00> : vector<16x128xf32>
    %8 = tpu.matmul %7, %2, %cst_7 {dimension_numbers = #tpu.dot_dimension_numbers<[1], [0], [0], [1], [0, 0, 1, 1], [], []>} : vector<16x256xf32>, vector<256x128xf32>, vector<16x128xf32> -> vector<16x128xf32>
    %9 = arith.mulf %0, %8 : vector<16x128xf32>
    %cst_8 = arith.constant 9.99999974E-6 : f32
    %10 = vector.broadcast %cst_8 : f32 to vector<16x128xf32>
    %11 = arith.maximumf %9, %10 : vector<16x128xf32>
    %cst_9 = arith.constant dense<0.000000e+00> : vector<16xf32>
    %12 = vector.multi_reduction <add>, %11, %cst_9 [1] : vector<16x128xf32> to vector<16xf32>
    %13 = vector.shape_cast %12 : vector<16xf32> to vector<16x1xf32>
    %14 = tpu.reciprocal %13 : vector<16x1xf32> -> vector<16x1xf32>
    %15 = vector.broadcast %14 : vector<16x1xf32> to vector<16x128xf32>
    %16 = arith.mulf %11, %15 : vector<16x128xf32>
    %c1_i32 = arith.constant 1 : i32
    %c0_10 = arith.constant 0 : index
    %c0_11 = arith.constant 0 : index
    %17 = vector.load %arg2[%c0_10, %c0_11] : memref<128x256xf32, #tpu.memory_space<vmem>>, vector<128x256xf32>
    %c0_12 = arith.constant 0 : index
    %c0_13 = arith.constant 0 : index
    %18 = vector.load %arg3[%c0_12, %c0_13] : memref<256x128xf32, #tpu.memory_space<vmem>>, vector<256x128xf32>
    %c0_14 = arith.constant 0 : index
    %c0_15 = arith.constant 0 : index
    %19 = vector.load %arg1[%c0_14, %c0_15] : memref<16x256xf32, #tpu.memory_space<vmem>>, vector<16x256xf32>
    %cst_16 = arith.constant dense<0.000000e+00> : vector<16x256xf32>
    %20 = tpu.matmul %16, %17, %cst_16 {dimension_numbers = #tpu.dot_dimension_numbers<[1], [0], [0], [1], [0, 0, 1, 1], [], []>} : vector<16x128xf32>, vector<128x256xf32>, vector<16x256xf32> -> vector<16x256xf32>
    %cst_17 = arith.constant 9.99999974E-6 : f32
    %21 = vector.broadcast %cst_17 : f32 to vector<16x256xf32>
    %22 = arith.maximumf %20, %21 : vector<16x256xf32>
    %23 = arith.divf %19, %22 : vector<16x256xf32>
    %cst_18 = arith.constant dense<0.000000e+00> : vector<16x128xf32>
    %24 = tpu.matmul %23, %18, %cst_18 {dimension_numbers = #tpu.dot_dimension_numbers<[1], [0], [0], [1], [0, 0, 1, 1], [], []>} : vector<16x256xf32>, vector<256x128xf32>, vector<16x128xf32> -> vector<16x128xf32>
    %25 = arith.mulf %16, %24 : vector<16x128xf32>
    %cst_19 = arith.constant 9.99999974E-6 : f32
    %26 = vector.broadcast %cst_19 : f32 to vector<16x128xf32>
    %27 = arith.maximumf %25, %26 : vector<16x128xf32>
    %cst_20 = arith.constant dense<0.000000e+00> : vector<16xf32>
    %28 = vector.multi_reduction <add>, %27, %cst_20 [1] : vector<16x128xf32> to vector<16xf32>
    %29 = vector.shape_cast %28 : vector<16xf32> to vector<16x1xf32>
    %30 = tpu.reciprocal %29 : vector<16x1xf32> -> vector<16x1xf32>
    %31 = vector.broadcast %30 : vector<16x1xf32> to vector<16x128xf32>
    %32 = arith.mulf %27, %31 : vector<16x128xf32>
    %c2_i32 = arith.constant 2 : i32
    %c0_21 = arith.constant 0 : index
    %c0_22 = arith.constant 0 : index
    %33 = vector.load %arg2[%c0_21, %c0_22] : memref<128x256xf32, #tpu.memory_space<vmem>>, vector<128x256xf32>
    %c0_23 = arith.constant 0 : index
    %c0_24 = arith.constant 0 : index
    %34 = vector.load %arg3[%c0_23, %c0_24] : memref<256x128xf32, #tpu.memory_space<vmem>>, vector<256x128xf32>
    %c0_25 = arith.constant 0 : index
    %c0_26 = arith.constant 0 : index
    %35 = vector.load %arg1[%c0_25, %c0_26] : memref<16x256xf32, #tpu.memory_space<vmem>>, vector<16x256xf32>
    %cst_27 = arith.constant dense<0.000000e+00> : vector<16x256xf32>
    %36 = tpu.matmul %32, %33, %cst_27 {dimension_numbers = #tpu.dot_dimension_numbers<[1], [0], [0], [1], [0, 0, 1, 1], [], []>} : vector<16x128xf32>, vector<128x256xf32>, vector<16x256xf32> -> vector<16x256xf32>
    %cst_28 = arith.constant 9.99999974E-6 : f32
    %37 = vector.broadcast %cst_28 : f32 to vector<16x256xf32>
    %38 = arith.maximumf %36, %37 : vector<16x256xf32>
    %39 = arith.divf %35, %38 : vector<16x256xf32>
    %cst_29 = arith.constant dense<0.000000e+00> : vector<16x128xf32>
    %40 = tpu.matmul %39, %34, %cst_29 {dimension_numbers = #tpu.dot_dimension_numbers<[1], [0], [0], [1], [0, 0, 1, 1], [], []>} : vector<16x256xf32>, vector<256x128xf32>, vector<16x128xf32> -> vector<16x128xf32>
    %41 = arith.mulf %32, %40 : vector<16x128xf32>
    %cst_30 = arith.constant 9.99999974E-6 : f32
    %42 = vector.broadcast %cst_30 : f32 to vector<16x128xf32>
    %43 = arith.maximumf %41, %42 : vector<16x128xf32>
    %cst_31 = arith.constant dense<0.000000e+00> : vector<16xf32>
    %44 = vector.multi_reduction <add>, %43, %cst_31 [1] : vector<16x128xf32> to vector<16xf32>
    %45 = vector.shape_cast %44 : vector<16xf32> to vector<16x1xf32>
    %46 = tpu.reciprocal %45 : vector<16x1xf32> -> vector<16x1xf32>
    %47 = vector.broadcast %46 : vector<16x1xf32> to vector<16x128xf32>
    %48 = arith.mulf %43, %47 : vector<16x128xf32>
    %c3_i32 = arith.constant 3 : i32
    %c0_32 = arith.constant 0 : index
    %c0_33 = arith.constant 0 : index
    %49 = vector.load %arg2[%c0_32, %c0_33] : memref<128x256xf32, #tpu.memory_space<vmem>>, vector<128x256xf32>
    %c0_34 = arith.constant 0 : index
    %c0_35 = arith.constant 0 : index
    %50 = vector.load %arg3[%c0_34, %c0_35] : memref<256x128xf32, #tpu.memory_space<vmem>>, vector<256x128xf32>
    %c0_36 = arith.constant 0 : index
    %c0_37 = arith.constant 0 : index
    %51 = vector.load %arg1[%c0_36, %c0_37] : memref<16x256xf32, #tpu.memory_space<vmem>>, vector<16x256xf32>
    %cst_38 = arith.constant dense<0.000000e+00> : vector<16x256xf32>
    %52 = tpu.matmul %48, %49, %cst_38 {dimension_numbers = #tpu.dot_dimension_numbers<[1], [0], [0], [1], [0, 0, 1, 1], [], []>} : vector<16x128xf32>, vector<128x256xf32>, vector<16x256xf32> -> vector<16x256xf32>
    %cst_39 = arith.constant 9.99999974E-6 : f32
    %53 = vector.broadcast %cst_39 : f32 to vector<16x256xf32>
    %54 = arith.maximumf %52, %53 : vector<16x256xf32>
    %55 = arith.divf %51, %54 : vector<16x256xf32>
    %cst_40 = arith.constant dense<0.000000e+00> : vector<16x128xf32>
    %56 = tpu.matmul %55, %50, %cst_40 {dimension_numbers = #tpu.dot_dimension_numbers<[1], [0], [0], [1], [0, 0, 1, 1], [], []>} : vector<16x256xf32>, vector<256x128xf32>, vector<16x128xf32> -> vector<16x128xf32>
    %57 = arith.mulf %48, %56 : vector<16x128xf32>
    %cst_41 = arith.constant 9.99999974E-6 : f32
    %58 = vector.broadcast %cst_41 : f32 to vector<16x128xf32>
    %59 = arith.maximumf %57, %58 : vector<16x128xf32>
    %cst_42 = arith.constant dense<0.000000e+00> : vector<16xf32>
    %60 = vector.multi_reduction <add>, %59, %cst_42 [1] : vector<16x128xf32> to vector<16xf32>
    %61 = vector.shape_cast %60 : vector<16xf32> to vector<16x1xf32>
    %62 = tpu.reciprocal %61 : vector<16x1xf32> -> vector<16x1xf32>
    %63 = vector.broadcast %62 : vector<16x1xf32> to vector<16x128xf32>
    %64 = arith.mulf %59, %63 : vector<16x128xf32>
    %c4_i32 = arith.constant 4 : i32
    %c0_43 = arith.constant 0 : index
    %c0_44 = arith.constant 0 : index
    %65 = vector.load %arg2[%c0_43, %c0_44] : memref<128x256xf32, #tpu.memory_space<vmem>>, vector<128x256xf32>
    %c0_45 = arith.constant 0 : index
    %c0_46 = arith.constant 0 : index
    %66 = vector.load %arg3[%c0_45, %c0_46] : memref<256x128xf32, #tpu.memory_space<vmem>>, vector<256x128xf32>
    %c0_47 = arith.constant 0 : index
    %c0_48 = arith.constant 0 : index
    %67 = vector.load %arg1[%c0_47, %c0_48] : memref<16x256xf32, #tpu.memory_space<vmem>>, vector<16x256xf32>
    %cst_49 = arith.constant dense<0.000000e+00> : vector<16x256xf32>
    %68 = tpu.matmul %64, %65, %cst_49 {dimension_numbers = #tpu.dot_dimension_numbers<[1], [0], [0], [1], [0, 0, 1, 1], [], []>} : vector<16x128xf32>, vector<128x256xf32>, vector<16x256xf32> -> vector<16x256xf32>
    %cst_50 = arith.constant 9.99999974E-6 : f32
    %69 = vector.broadcast %cst_50 : f32 to vector<16x256xf32>
    %70 = arith.maximumf %68, %69 : vector<16x256xf32>
    %71 = arith.divf %67, %70 : vector<16x256xf32>
    %cst_51 = arith.constant dense<0.000000e+00> : vector<16x128xf32>
    %72 = tpu.matmul %71, %66, %cst_51 {dimension_numbers = #tpu.dot_dimension_numbers<[1], [0], [0], [1], [0, 0, 1, 1], [], []>} : vector<16x256xf32>, vector<256x128xf32>, vector<16x128xf32> -> vector<16x128xf32>
    %73 = arith.mulf %64, %72 : vector<16x128xf32>
    %cst_52 = arith.constant 9.99999974E-6 : f32
    %74 = vector.broadcast %cst_52 : f32 to vector<16x128xf32>
    %75 = arith.maximumf %73, %74 : vector<16x128xf32>
    %cst_53 = arith.constant dense<0.000000e+00> : vector<16xf32>
    %76 = vector.multi_reduction <add>, %75, %cst_53 [1] : vector<16x128xf32> to vector<16xf32>
    %77 = vector.shape_cast %76 : vector<16xf32> to vector<16x1xf32>
    %78 = tpu.reciprocal %77 : vector<16x1xf32> -> vector<16x1xf32>
    %79 = vector.broadcast %78 : vector<16x1xf32> to vector<16x128xf32>
    %80 = arith.mulf %75, %79 : vector<16x128xf32>
    %c0_54 = arith.constant 0 : index
    %c0_55 = arith.constant 0 : index
    %81 = vector.load %arg4[%c0_54, %c0_55] : memref<16x128xf32, #tpu.memory_space<vmem>>, vector<16x128xf32>
    tpu.vector_store %arg4[%c0_54, %c0_55], %80 {strides = array<i32>} : memref<16x128xf32, #tpu.memory_space<vmem>>, vector<16x128xf32>,
    return
  }
  func.func @transform_0(%arg0: i32) -> (i32, i32) {
    %c0_i32 = arith.constant 0 : i32
    %c0_i32_0 = arith.constant 0 : i32
    return %arg0, %c0_i32 : i32, i32
  }
  func.func @transform_1(%arg0: i32) -> (i32, i32) {
    %c0_i32 = arith.constant 0 : i32
    %c0_i32_0 = arith.constant 0 : i32
    %c0_i32_1 = arith.constant 0 : i32
    return %c0_i32, %c0_i32_0 : i32, i32
  }
  func.func @transform_2(%arg0: i32) -> (i32, i32) {
    %c0_i32 = arith.constant 0 : i32
    %c0_i32_0 = arith.constant 0 : i32
    %c0_i32_1 = arith.constant 0 : i32
    return %c0_i32, %c0_i32_0 : i32, i32
  }
  func.func @transform_3(%arg0: i32) -> (i32, i32) {
    %c0_i32 = arith.constant 0 : i32
    %c0_i32_0 = arith.constant 0 : i32
    return %arg0, %c0_i32 : i32, i32
  }
}

module attributes {stable_mosaic.version = 11 : i64} {
  func.func @_nnmf_dense_kernel(%arg0: i32, %arg1: memref<16x256xf32, #tpu.memory_space<vmem>>, %arg2: memref<128x256xf32, #tpu.memory_space<vmem>>, %arg3: memref<256x128xf32, #tpu.memory_space<vmem>>, %arg4: memref<16x128xf32, #tpu.memory_space<vmem>>) attributes {dimension_semantics = [#tpu.dimension_semantics<parallel>], iteration_bounds = array<i64: 3>, scalar_prefetch = 0 : i64, scratch_operands = 0 : i64, tpu.core_type = #tpu.core_type<tc>, window_params = [{transform_indices = @transform_0, window_bounds = array<i64: 16, 256>}, {pipeline_mode = #tpu.pipeline_mode<synchronous>, transform_indices = @transform_1, window_bounds = array<i64: 128, 256>}, {pipeline_mode = #tpu.pipeline_mode<synchronous>, transform_indices = @transform_2, window_bounds = array<i64: 256, 128>}, {transform_indices = @transform_3, window_bounds = array<i64: 16, 128>}]} {
    %cst = arith.constant 7.812500e-03 : f32
    %0 = vector.broadcast %cst : f32 to vector<16x128xf32>
    %c0_i32 = arith.constant 0 : i32
    %c0 = arith.constant 0 : index
    %c0_0 = arith.constant 0 : index
    %1 = vector.load %arg2[%c0, %c0_0] : memref<128x256xf32, #tpu.memory_space<vmem>>, vector<128x256xf32>
    %c0_1 = arith.constant 0 : index
    %c0_2 = arith.constant 0 : index
    %2 = vector.load %arg3[%c0_1, %c0_2] : memref<256x128xf32, #tpu.memory_space<vmem>>, vector<256x128xf32>
    %c0_3 = arith.constant 0 : index
    %c0_4 = arith.constant 0 : index
    %3 = vector.load %arg1[%c0_3, %c0_4] : memref<16x256xf32, #tpu.memory_space<vmem>>, vector<16x256xf32>
    %cst_5 = arith.constant dense<0.000000e+00> : vector<16x256xf32>
    %4 = tpu.matmul %0, %1, %cst_5 {dimension_numbers = #tpu.dot_dimension_numbers<[1], [0], [0], [1], [0, 0, 1, 1], [], []>} : vector<16x128xf32>, vector<128x256xf32>, vector<16x256xf32> -> vector<16x256xf32>
    %cst_6 = arith.constant 9.99999974E-6 : f32
    %5 = vector.broadcast %cst_6 : f32 to vector<16x256xf32>
    %6 = arith.maximumf %4, %5 : vector<16x256xf32>
    %7 = arith.divf %3, %6 : vector<16x256xf32>
    %cst_7 = arith.constant dense<0.000000e+00> : vector<16x128xf32>
    %8 = tpu.matmul %7, %2, %cst_7 {dimension_numbers = #tpu.dot_dimension_numbers<[1], [0], [0], [1], [0, 0, 1, 1], [], []>} : vector<16x256xf32>, vector<256x128xf32>, vector<16x128xf32> -> vector<16x128xf32>
    %9 = arith.mulf %0, %8 : vector<16x128xf32>
    %cst_8 = arith.constant 9.99999974E-6 : f32
    %10 = vector.broadcast %cst_8 : f32 to vector<16x128xf32>
    %11 = arith.maximumf %9, %10 : vector<16x128xf32>
    %cst_9 = arith.constant dense<0.000000e+00> : vector<16xf32>
    %12 = vector.multi_reduction <add>, %11, %cst_9 [1] : vector<16x128xf32> to vector<16xf32>
    %13 = vector.shape_cast %12 : vector<16xf32> to vector<16x1xf32>
    %14 = tpu.reciprocal %13 : vector<16x1xf32> -> vector<16x1xf32>
    %15 = vector.broadcast %14 : vector<16x1xf32> to vector<16x128xf32>
    %16 = arith.mulf %11, %15 : vector<16x128xf32>
    %c1_i32 = arith.constant 1 : i32
    %c0_10 = arith.constant 0 : index
    %c0_11 = arith.constant 0 : index
    %17 = vector.load %arg2[%c0_10, %c0_11] : memref<128x256xf32, #tpu.memory_space<vmem>>, vector<128x256xf32>
    %c0_12 = arith.constant 0 : index
    %c0_13 = arith.constant 0 : index
    %18 = vector.load %arg3[%c0_12, %c0_13] : memref<256x128xf32, #tpu.memory_space<vmem>>, vector<256x128xf32>
    %c0_14 = arith.constant 0 : index
    %c0_15 = arith.constant 0 : index
    %19 = vector.load %arg1[%c0_14, %c0_15] : memref<16x256xf32, #tpu.memory_space<vmem>>, vector<16x256xf32>
    %cst_16 = arith.constant dense<0.000000e+00> : vector<16x256xf32>
    %20 = tpu.matmul %16, %17, %cst_16 {dimension_numbers = #tpu.dot_dimension_numbers<[1], [0], [0], [1], [0, 0, 1, 1], [], []>} : vector<16x128xf32>, vector<128x256xf32>, vector<16x256xf32> -> vector<16x256xf32>
    %cst_17 = arith.constant 9.99999974E-6 : f32
    %21 = vector.broadcast %cst_17 : f32 to vector<16x256xf32>
    %22 = arith.maximumf %20, %21 : vector<16x256xf32>
    %23 = arith.divf %19, %22 : vector<16x256xf32>
    %cst_18 = arith.constant dense<0.000000e+00> : vector<16x128xf32>
    %24 = tpu.matmul %23, %18, %cst_18 {dimension_numbers = #tpu.dot_dimension_numbers<[1], [0], [0], [1], [0, 0, 1, 1], [], []>} : vector<16x256xf32>, vector<256x128xf32>, vector<16x128xf32> -> vector<16x128xf32>
    %25 = arith.mulf %16, %24 : vector<16x128xf32>
    %cst_19 = arith.constant 9.99999974E-6 : f32
    %26 = vector.broadcast %cst_19 : f32 to vector<16x128xf32>
    %27 = arith.maximumf %25, %26 : vector<16x128xf32>
    %cst_20 = arith.constant dense<0.000000e+00> : vector<16xf32>
    %28 = vector.multi_reduction <add>, %27, %cst_20 [1] : vector<16x128xf32> to vector<16xf32>
    %29 = vector.shape_cast %28 : vector<16xf32> to vector<16x1xf32>
    %30 = tpu.reciprocal %29 : vector<16x1xf32> -> vector<16x1xf32>
    %31 = vector.broadcast %30 : vector<16x1xf32> to vector<16x128xf32>
    %32 = arith.mulf %27, %31 : vector<16x128xf32>
    %c2_i32 = arith.constant 2 : i32
    %c0_21 = arith.constant 0 : index
    %c0_22 = arith.constant 0 : index
    %33 = vector.load %arg2[%c0_21, %c0_22] : memref<128x256xf32, #tpu.memory_space<vmem>>, vector<128x256xf32>
    %c0_23 = arith.constant 0 : index
    %c0_24 = arith.constant 0 : index
    %34 = vector.load %arg3[%c0_23, %c0_24] : memref<256x128xf32, #tpu.memory_space<vmem>>, vector<256x128xf32>
    %c0_25 = arith.constant 0 : index
    %c0_26 = arith.constant 0 : index
    %35 = vector.load %arg1[%c0_25, %c0_26] : memref<16x256xf32, #tpu.memory_space<vmem>>, vector<16x256xf32>
    %cst_27 = arith.constant dense<0.000000e+00> : vector<16x256xf32>
    %36 = tpu.matmul %32, %33, %cst_27 {dimension_numbers = #tpu.dot_dimension_numbers<[1], [0], [0], [1], [0, 0, 1, 1], [], []>} : vector<16x128xf32>, vector<128x256xf32>, vector<16x256xf32> -> vector<16x256xf32>
    %cst_28 = arith.constant 9.99999974E-6 : f32
    %37 = vector.broadcast %cst_28 : f32 to vector<16x256xf32>
    %38 = arith.maximumf %36, %37 : vector<16x256xf32>
    %39 = arith.divf %35, %38 : vector<16x256xf32>
    %cst_29 = arith.constant dense<0.000000e+00> : vector<16x128xf32>
    %40 = tpu.matmul %39, %34, %cst_29 {dimension_numbers = #tpu.dot_dimension_numbers<[1], [0], [0], [1], [0, 0, 1, 1], [], []>} : vector<16x256xf32>, vector<256x128xf32>, vector<16x128xf32> -> vector<16x128xf32>
    %41 = arith.mulf %32, %40 : vector<16x128xf32>
    %cst_30 = arith.constant 9.99999974E-6 : f32
    %42 = vector.broadcast %cst_30 : f32 to vector<16x128xf32>
    %43 = arith.maximumf %41, %42 : vector<16x128xf32>
    %cst_31 = arith.constant dense<0.000000e+00> : vector<16xf32>
    %44 = vector.multi_reduction <add>, %43, %cst_31 [1] : vector<16x128xf32> to vector<16xf32>
    %45 = vector.shape_cast %44 : vector<16xf32> to vector<16x1xf32>
    %46 = tpu.reciprocal %45 : vector<16x1xf32> -> vector<16x1xf32>
    %47 = vector.broadcast %46 : vector<16x1xf32> to vector<16x128xf32>
    %48 = arith.mulf %43, %47 : vector<16x128xf32>
    %c3_i32 = arith.constant 3 : i32
    %c0_32 = arith.constant 0 : index
    %c0_33 = arith.constant 0 : index
    %49 = vector.load %arg2[%c0_32, %c0_33] : memref<128x256xf32, #tpu.memory_space<vmem>>, vector<128x256xf32>
    %c0_34 = arith.constant 0 : index
    %c0_35 = arith.constant 0 : index
    %50 = vector.load %arg3[%c0_34, %c0_35] : memref<256x128xf32, #tpu.memory_space<vmem>>, vector<256x128xf32>
    %c0_36 = arith.constant 0 : index
    %c0_37 = arith.constant 0 : index
    %51 = vector.load %arg1[%c0_36, %c0_37] : memref<16x256xf32, #tpu.memory_space<vmem>>, vector<16x256xf32>
    %cst_38 = arith.constant dense<0.000000e+00> : vector<16x256xf32>
    %52 = tpu.matmul %48, %49, %cst_38 {dimension_numbers = #tpu.dot_dimension_numbers<[1], [0], [0], [1], [0, 0, 1, 1], [], []>} : vector<16x128xf32>, vector<128x256xf32>, vector<16x256xf32> -> vector<16x256xf32>
    %cst_39 = arith.constant 9.99999974E-6 : f32
    %53 = vector.broadcast %cst_39 : f32 to vector<16x256xf32>
    %54 = arith.maximumf %52, %53 : vector<16x256xf32>
    %55 = arith.divf %51, %54 : vector<16x256xf32>
    %cst_40 = arith.constant dense<0.000000e+00> : vector<16x128xf32>
    %56 = tpu.matmul %55, %50, %cst_40 {dimension_numbers = #tpu.dot_dimension_numbers<[1], [0], [0], [1], [0, 0, 1, 1], [], []>} : vector<16x256xf32>, vector<256x128xf32>, vector<16x128xf32> -> vector<16x128xf32>
    %57 = arith.mulf %48, %56 : vector<16x128xf32>
    %cst_41 = arith.constant 9.99999974E-6 : f32
    %58 = vector.broadcast %cst_41 : f32 to vector<16x128xf32>
    %59 = arith.maximumf %57, %58 : vector<16x128xf32>
    %cst_42 = arith.constant dense<0.000000e+00> : vector<16xf32>
    %60 = vector.multi_reduction <add>, %59, %cst_42 [1] : vector<16x128xf32> to vector<16xf32>
    %61 = vector.shape_cast %60 : vector<16xf32> to vector<16x1xf32>
    %62 = tpu.reciprocal %61 : vector<16x1xf32> -> vector<16x1xf32>
    %63 = vector.broadcast %62 : vector<16x1xf32> to vector<16x128xf32>
    %64 = arith.mulf %59, %63 : vector<16x128xf32>
    %c4_i32 = arith.constant 4 : i32
    %c0_43 = arith.constant 0 : index
    %c0_44 = arith.constant 0 : index
    %65 = vector.load %arg2[%c0_43, %c0_44] : memref<128x256xf32, #tpu.memory_space<vmem>>, vector<128x256xf32>
    %c0_45 = arith.constant 0 : index
    %c0_46 = arith.constant 0 : index
    %66 = vector.load %arg3[%c0_45, %c0_46] : memref<256x128xf32, #tpu.memory_space<vmem>>, vector<256x128xf32>
    %c0_47 = arith.constant 0 : index
    %c0_48 = arith.constant 0 : index
    %67 = vector.load %arg1[%c0_47, %c0_48] : memref<16x256xf32, #tpu.memory_space<vmem>>, vector<16x256xf32>
    %cst_49 = arith.constant dense<0.000000e+00> : vector<16x256xf32>
    %68 = tpu.matmul %64, %65, %cst_49 {dimension_numbers = #tpu.dot_dimension_numbers<[1], [0], [0], [1], [0, 0, 1, 1], [], []>} : vector<16x128xf32>, vector<128x256xf32>, vector<16x256xf32> -> vector<16x256xf32>
    %cst_50 = arith.constant 9.99999974E-6 : f32
    %69 = vector.broadcast %cst_50 : f32 to vector<16x256xf32>
    %70 = arith.maximumf %68, %69 : vector<16x256xf32>
    %71 = arith.divf %67, %70 : vector<16x256xf32>
    %cst_51 = arith.constant dense<0.000000e+00> : vector<16x128xf32>
    %72 = tpu.matmul %71, %66, %cst_51 {dimension_numbers = #tpu.dot_dimension_numbers<[1], [0], [0], [1], [0, 0, 1, 1], [], []>} : vector<16x256xf32>, vector<256x128xf32>, vector<16x128xf32> -> vector<16x128xf32>
    %73 = arith.mulf %64, %72 : vector<16x128xf32>
    %cst_52 = arith.constant 9.99999974E-6 : f32
    %74 = vector.broadcast %cst_52 : f32 to vector<16x128xf32>
    %75 = arith.maximumf %73, %74 : vector<16x128xf32>
    %cst_53 = arith.constant dense<0.000000e+00> : vector<16xf32>
    %76 = vector.multi_reduction <add>, %75, %cst_53 [1] : vector<16x128xf32> to vector<16xf32>
    %77 = vector.shape_cast %76 : vector<16xf32> to vector<16x1xf32>
    %78 = tpu.reciprocal %77 : vector<16x1xf32> -> vector<16x1xf32>
    %79 = vector.broadcast %78 : vector<16x1xf32> to vector<16x128xf32>
    %80 = arith.mulf %75, %79 : vector<16x128xf32>
    %c0_54 = arith.constant 0 : index
    %c0_55 = arith.constant 0 : index
    %81 = vector.load %arg4[%c0_54, %c0_55] : memref<16x128xf32, #tpu.memory_space<vmem>>, vector<16x128xf32>
    tpu.vector_store %arg4[%c0_54, %c0_55], %80 {strides = array<i32>} : memref<16x128xf32, #tpu.memory_space<vmem>>, vector<16x128xf32>,
    return
  }
  func.func @transform_0(%arg0: i32) -> (i32, i32) {
    %c0_i32 = arith.constant 0 : i32
    %c0_i32_0 = arith.constant 0 : i32
    return %arg0, %c0_i32 : i32, i32
  }
  func.func @transform_1(%arg0: i32) -> (i32, i32) {
    %c0_i32 = arith.constant 0 : i32
    %c0_i32_0 = arith.constant 0 : i32
    %c0_i32_1 = arith.constant 0 : i32
    return %c0_i32, %c0_i32_0 : i32, i32
  }
  func.func @transform_2(%arg0: i32) -> (i32, i32) {
    %c0_i32 = arith.constant 0 : i32
    %c0_i32_0 = arith.constant 0 : i32
    %c0_i32_1 = arith.constant 0 : i32
    return %c0_i32, %c0_i32_0 : i32, i32
  }
  func.func @transform_3(%arg0: i32) -> (i32, i32) {
    %c0_i32 = arith.constant 0 : i32
    %c0_i32_0 = arith.constant 0 : i32
    return %arg0, %c0_i32 : i32, i32
  }
}

</mosaic_0001>

<bundles_post_ra>
// kernel: tpu_custom_call.1
= control target key start
LH: loop header
LB: loop body
LE: loop exit
PB: predicated region body
PF: predicated region fallthrough
CT: control target
= control target key end

     0   :  { %8 = vsyncpa [#allocation3], 0  ;;  %s2451_s0 = inlined_call_operand.hbm [shape: f32[48,256], index: 0, kind: input, shape index: {}]   ;;  %s2452_s1 = inlined_call_operand.hbm [shape: f32[128,256], index: 1, kind: input, shape index: {}]   ;;  %s2453_s2 = inlined_call_operand.hbm [shape: f32[256,128], index: 2, kind: input, shape index: {}]   ;;  %s2454_s3 = inlined_call_operand.hbm [shape: f32[48,128], index: 3, kind: output, shape index: {}]  }
   0x1   :  { %10 = vsyncpa [#allocation3 + $0x1], 0 }
   0x2   :  { %11 = vsyncpa [#allocation6], 0 }
   0x3   :  { %12 = vsyncpa [#allocation4], 0 }
   0x4   :  { %14 = vsyncpa [#allocation4 + $0x1], 0  ;;  %s1790_s12 = smov 0   ;;  %s1792_s13 = smov 0  }
   0x5   :  { %s1794_s14 = smov 0   ;;  %s1796_s15 = smov 0  }
   0x6 LB: > { %s1811_s16 = sadd.s32 4294967295, %s1759_s15   ;;  %s1375_s17 = sadd.s32 4294967294, %s1759_s15   ;;  %s1759_s15 = sphi %s1796_s15, %s2535_s15   ;;  %s1755_s14 = sphi %s1794_s14, %s2534_s14   ;;  %s1751_s13 = sphi %s1792_s13, %s2533_s13   ;;  %s1747_s12 = sphi %s1790_s12, %s2532_s12  }
   0x7   : > { %p40_p0 = scmp.ne.s32.totalorder %s1751_s13, %s1747_s12  ;;  %p41_p1 = scmp.eq.s32.totalorder %s1811_s16, 0 }
   0x8   : > { %p106_p2 = scmp.eq.s32.totalorder %s1811_s16, 2  ;;  %p112_p3 = scmp.eq.s32.totalorder %s1375_s17, 2 }
   0x9   : > { %p1820_p4 = por %p41_p1, %p40_p0  ;;  %p1376_p5 = scmp.ge.s32.totalorder %s1759_s15, 1 }
   0xa   : > { %p1825_p6 = por %p112_p3, %p40_p0  ;;  %p119_p7 = scmp.lt.s32.totalorder %s1759_s15, 4 }
   0xb   : > { %s130_s22 = sshll.u32 %s2452_s1, 4  ;;  %s1761_s24 = smov [#allocation5]   ;;  %s131_s22 = int_to_ptr.hbm [resolvable:$true] %s130_s22 }
   0xc   : > { %p1833_p8 = pnand %p1376_p5, %p119_p7  ;;  %s132_s25 = sshll.u32 %s1761_s24, 4  ;;  %s133_s25 = int_to_ptr.vmem [resolvable:$true] %s132_s25 }
   0xd   : > { %s144_s28 = sshll.u32 %s2453_s2, 4  ;;  %s1762_s29 = smov 256   ;;  %s145_s28 = int_to_ptr.hbm [resolvable:$true] %s144_s28 }
   0xe   : > { %p1409_p9 = pneg %p1833_p8  ;;  %s1763_s30 = smov 16  }
   0xf   : > { %s1764_s4 = smov [#allocation7]   ;;  %s1765_s6 = smov 128  }
  0x10   : > { %p1410_p10 = pnand %p1409_p9, %p41_p1  ;;  %s146_s5 = sshll.u32 %s1764_s4, 4  ;;  %s147_s5 = int_to_ptr.vmem [resolvable:$true] %s146_s5 }
  0x11   : > { %s1766_s7 = smov 8   ;;  %s1848_s8 = sadd.s32 1, %s1759_s15  }
  0x12   : > { %1412 = dma.hbm_to_vmem [thread:$0]  (!%p1410_p10), %s131_s22, 4096, %s133_s25, [#allocation6], %s1762_s29, %s1762_s29, %s1763_s30  }
  0x13   : > { %1415 = dma.hbm_to_vmem [thread:$0]  (!%p1410_p10), %s145_s28, 4096, %s147_s5, [#allocation6], %s1765_s6, %s1765_s6, %s1766_s7  }
  0x14   : > { %s24_s9 = ssub.s32 %s1759_s15, %s1848_s8  ;;  %s27_s10 = sadd.s32 1, %s1755_s14 }
  0x15   : > { %p25_p11 = scmp.eq.s32.totalorder %s24_s9, 0  ;;  %p34_p12 = scmp.ne.s32.totalorder %s1755_s14, %s1751_s13 }
  0x16   : > { %p35_p13 = scmp.eq.s32.totalorder %s1759_s15, 0  ;;  %p1426_p5 = scmp.lt.s32.totalorder %s1759_s15, 3 }
  0x17   : > { %s1857_s11 = scalar_select %p25_p11, %s1755_s14, %s27_s10  }
  0x18   : > { %p36_p0 = por %p35_p13, %p34_p12  ;;  %p1861_p3 = por %p106_p2, %p34_p12 }
  0x19   : > { %s160_s20 = sand.u32 1, %s1755_s14   ;;  %s1395_s22 = sshll.u32 %s1759_s15, 5 }
  0x1a   : > { %s1380_s21 = sshll.u32 %s160_s20, 5  ;;  %s170_s26 = scalar_lea.hbm %s2451_s0, %s1395_s22 }
  0x1b   : > { %s164_s27 = scalar_lea.vmem [#allocation2], %s1380_s21  ;;  %s171_s4 = sshll.u32 %s170_s26, 4  ;;  %s172_s4 = int_to_ptr.hbm [resolvable:$true] %s171_s4 }
  0x1c   : > { %s173_s28 = sshll.u32 %s164_s27, 4  ;;  %p1871_p7 = pnand %p1426_p5, %p36_p0  ;;  %s174_s28 = int_to_ptr.vmem [resolvable:$true] %s173_s28 }
  0x1d   : > { %s161_s6 = scalar_lea.sflag [#allocation3], %s160_s20  ;;  %s1659_s7 = sshra.s32 %s172_s4, 4  ;;  %s1660_s7 = int_to_ptr.hbm [resolvable:$true] %s1659_s7 }
  0x1e   : > { %s1661_s9 = scalar_lea.hbm %s1660_s7, 32  ;;  %p1663_p9 = pneg %p1871_p7 }
  0x1f   : > { %p1662_p2 = scmp.ne.s32.totalorder %s1660_s7, %s1661_s9  ;;  %s1666_s22 = scalar_lea.hbm %s2451_s0, 96 }
  0x20   : > { %p1667_p12 = scmp.lt.s32.totalorder %s1660_s7, %s2451_s0  ;;  %p1668_p13 = scmp.lt.s32.totalorder %s1666_s22, %s1661_s9 }
  0x21   : > { %p1664_p10 = pnand %p1663_p9, %p1662_p2 }
  0x22   : > { %p1669_p0 = por %p1668_p13, %p1667_p12 }
  0x23   : > { %p1665_p11 = pneg %p1664_p10 }
  0x25   : > { %p1670_p5 = pnand %p1669_p0, %p1665_p11 }
  0x27   : > { %1673 = shalt.err (!%p1670_p5)
}
  0x28   : > { %1419 = dma.hbm_to_vmem [thread:$0]  (!%p1871_p7), %s172_s4, 512, %s174_s28, %s161_s6, %s1762_s29, %s1762_s29, %s1763_s30  }
  0x29   : > { %185 = sbr.rel (%p1833_p8) target bundleno = 2201 (0x899), region = 32 }
  0x2e   : > { %s1891_s20 = sand.u32 1, %s1751_s13  }
  0x2f   : > { %s1385_s26 = sshll.u32 %s1891_s20, 5  ;;  %s188_s27 = scalar_lea.sflag [#allocation3], %s1891_s20 }
  0x30   : > { %s1895_s7 = scalar_lea.vmem [#allocation2], %s1385_s26 }
  0x31   : > { %1734 = dma.done.wait (%p1820_p4), %s188_s27, 512  }
  0x32   : > { %1736 = vsyncadd (%p1820_p4), %s188_s27, 4294966784 }
  0x33   : > { %1738 = dma.done.wait (%p41_p1), [#allocation6], 8192  }
  0x34   : > { %1740 = vsyncadd (%p41_p1), [#allocation6], 4294959104  ;;  %v1905_v0 = vld [vmem:[#allocation5 + $0xf0] sm:$0xff]  ;;  %v1907_v1 = vld [vmem:[#allocation5 + $0xf8] sm:$0xff]  ;;  %v1767_v42 = vmov 0.0078125   ;;  %s1388_s18 = sshll.u32 %s1891_s20, 4 }
  0x35   : > { %v1909_v2 = vld [vmem:[#allocation5 + $0xe0] sm:$0xff]  ;;  %295 = vmatpush.msra.mxu0 %v1905_v0  ;;  %318 = vmatpush.msra.mxu1 %v1907_v1  ;;  %v1913_v3 = vld [vmem:[#allocation5 + $0xe8] sm:$0xff]  ;;  %v1915_v4 = vld [vmem:[#allocation5 + $0xd0] sm:$0xff]  ;;  %s1396_s23 = sshll.u32 %s1811_s16, 4  ;;  %s224_s4 = scalar_lea.vmem [#allocation8], %s1388_s18 }
  0x36   : > { %v1917_v5 = vld [vmem:[#allocation5 + $0xd8] sm:$0xff]  ;;  %v1921_v6 = vld [vmem:[#allocation5 + $0xc0] sm:$0xff]  ;;  %v1923_v7 = vld [vmem:[#allocation5 + $0xc8] sm:$0xff]  ;;  %s1279_s28 = scalar_lea.hbm %s2454_s3, %s1396_s23  ;;  %s1280_s5 = sshll.u32 %s224_s4, 4  ;;  %s1281_s5 = int_to_ptr.vmem [resolvable:$true] %s1280_s5 }
  0x37   : > { %296 = vmatpush.msra.mxu0 %v1909_v2  ;;  %319 = vmatpush.msra.mxu1 %v1913_v3  ;;  %v1927_v8 = vld [vmem:[#allocation5 + $0xb0] sm:$0xff]  ;;  %v1929_v9 = vld [vmem:[#allocation5 + $0xb8] sm:$0xff]  ;;  %v1933_v10 = vld [vmem:[#allocation5 + $0xa0] sm:$0xff]  ;;  %s1282_s6 = sshll.u32 %s1279_s28, 4  ;;  %s1268_s16 = scalar_lea.sflag [#allocation4], %s1891_s20  ;;  %s1283_s6 = int_to_ptr.hbm [resolvable:$true] %s1282_s6 }
  0x38   : > { %2484 = vst [vmem:[#allocation12_spill] sm:$0xff] %v1929_v9  ;;  %v1935_v11 = vld [vmem:[#allocation5 + $0xa8] sm:$0xff]  ;;  %v1939_v12 = vld [vmem:[#allocation5 + $0x90] sm:$0xff]  ;;  %v1941_v13 = vld [vmem:[#allocation5 + $0x98] sm:$0xff]  ;;  %s1703_s9 = sshra.s32 %s1283_s6, 4  ;;  %s1709_s24 = scalar_lea.hbm %s2454_s3, 48  ;;  %s1704_s9 = int_to_ptr.hbm [resolvable:$true] %s1703_s9 }
  0x39   : > { %297 = vmatpush.msra.mxu0 %v1915_v4  ;;  %320 = vmatpush.msra.mxu1 %v1917_v5  ;;  %2485 = vst [vmem:[#allocation13_spill] sm:$0xff] %v1933_v10  ;;  %v1943_v14 = vld [vmem:[#allocation7 + $0x78] sm:$0xff]  ;;  %v1949_v16 = vld [vmem:[#allocation7 + $0x70] sm:$0xff]  ;;  %v1953_v18 = vld [vmem:[#allocation5 + $0x80] sm:$0xff]  ;;  %s1705_s10 = scalar_lea.hbm %s1704_s9, 16  ;;  %p1710_p7 = scmp.lt.s32.totalorder %s1704_s9, %s2454_s3 }
  0x3a   : > { %2486 = vst [vmem:[#allocation14_spill] sm:$0xff] %v1935_v11  ;;  %v1947_v15 = vld [vmem:[#allocation7 + $0xf8] sm:$0xff]  ;;  %v1951_v17 = vld [vmem:[#allocation7 + $0xf0] sm:$0xff]  ;;  %v1955_v19 = vld [vmem:[#allocation5 + $0x88] sm:$0xff]  ;;  %405 = vmatpush.msra.mxu2 %v1943_v14  ;;  %p1706_p1 = scmp.ne.s32.totalorder %s1704_s9, %s1705_s10  ;;  %p1711_p2 = scmp.lt.s32.totalorder %s1709_s24, %s1705_s10 }
  0x3b   : > { %298 = vmatpush.msra.mxu0 %v1921_v6  ;;  %321 = vmatpush.msra.mxu1 %v1923_v7  ;;  %2487 = vst [vmem:[#allocation15_spill] sm:$0xff] %v1939_v12  ;;  %v1961_v20 = vld [vmem:[#allocation7 + $0x68] sm:$0xff]  ;;  %v1965_v22 = vld [vmem:[#allocation5 + $0x70] sm:$0xff]  ;;  %v1967_v23 = vld [vmem:[#allocation5 + $0x78] sm:$0xff] }
  0x3c   : > { %2488 = vst [vmem:[#allocation16_spill] sm:$0xff] %v1941_v13  ;;  %428 = vmatpush.msra.mxu3 %v1947_v15  ;;  %v1963_v21 = vld [vmem:[#allocation7 + $0xe8] sm:$0xff]  ;;  %406 = vmatpush.msra.mxu2 %v1949_v16  ;;  %v1973_v24 = vld [vmem:[#allocation7 + $0x60] sm:$0xff]  ;;  %v1985_v28 = vld [vmem:[#allocation7 + $0x58] sm:$0xff]  ;;  %p1707_p4 = pnand %p1706_p1, %p1861_p3  ;;  %p1712_p9 = por %p1711_p2, %p1710_p7 }
  0x3d   : > { %299 = vmatpush.msra.mxu0 %v1927_v8  ;;  %322 = vmatpush.msra.mxu1 %v1929_v9  ;;  %2489 = vst [vmem:[#allocation17_spill] sm:$0xff] %v1953_v18  ;;  %v1975_v25 = vld [vmem:[#allocation7 + $0xe0] sm:$0xff]  ;;  %v1979_v27 = vld [vmem:[#allocation5 + $0x68] sm:$0xff]  ;;  %v1987_v29 = vld [vmem:[#allocation7 + $0xd8] sm:$0xff] }
  0x3e   : > { %2490 = vst [vmem:[#allocation18_spill] sm:$0xff] %v1955_v19  ;;  %429 = vmatpush.msra.mxu3 %v1951_v17  ;;  %v1977_v26 = vld [vmem:[#allocation5 + $0x60] sm:$0xff]  ;;  %407 = vmatpush.msra.mxu2 %v1961_v20  ;;  %v1989_v30 = vld [vmem:[#allocation5 + $0x50] sm:$0xff]  ;;  %v1991_v31 = vld [vmem:[#allocation5 + $0x58] sm:$0xff]  ;;  %p1708_p8 = pneg %p1707_p4 }
  0x3f   : > { %300 = vmatpush.msra.mxu0 %v1933_v10  ;;  %323 = vmatpush.msra.mxu1 %v1935_v11  ;;  %2491 = vst [vmem:[#allocation19_spill] sm:$0xff] %v1965_v22  ;;  %v1997_v32 = vld [vmem:[#allocation5 + $0x40] sm:$0xff]  ;;  %v1999_v33 = vld [vmem:[#allocation5 + $0x48] sm:$0xff]  ;;  %v2005_v34 = vld [vmem:[#allocation5 + $0x30] sm:$0xff] }
  0x40   : > { %2492 = vst [vmem:[#allocation20_spill] sm:$0xff] %v1967_v23  ;;  %430 = vmatpush.msra.mxu3 %v1963_v21  ;;  %408 = vmatpush.msra.mxu2 %v1973_v24  ;;  %v2007_v35 = vld [vmem:[#allocation5 + $0x38] sm:$0xff]  ;;  %v2011_v36 = vld [vmem:[#allocation5 + $0x20] sm:$0xff]  ;;  %v2013_v37 = vld [vmem:[#allocation5 + $0x28] sm:$0xff]  ;;  %p1713_p10 = pnand %p1712_p9, %p1708_p8 }
  0x41   : > { %301 = vmatpush.msra.mxu0 %v1939_v12  ;;  %324 = vmatpush.msra.mxu1 %v1941_v13  ;;  %2493 = vst [vmem:[#allocation21_spill] sm:$0xff] %v1977_v26  ;;  %v2017_v38 = vld [vmem:[#allocation5 + $0x10] sm:$0xff]  ;;  %v2019_v39 = vld [vmem:[#allocation5 + $0x18] sm:$0xff]  ;;  %v2023_v40 = vld [vmem:[#allocation5] sm:$0xff] }
  0x42   : > { %2494 = vst [vmem:[#allocation22_spill] sm:$0xff] %v1979_v27  ;;  %431 = vmatpush.msra.mxu3 %v1975_v25  ;;  %409 = vmatpush.msra.mxu2 %v1985_v28  ;;  %v2025_v41 = vld [vmem:[#allocation5 + $0x8] sm:$0xff]  ;;  %v2095_v43 = vld [vmem:[#allocation7 + $0x50] sm:$0xff]  ;;  %v2107_v47 = vld [vmem:[#allocation7 + $0x40] sm:$0xff] }
  0x43   : > { %302 = vmatpush.msra.mxu0 %v1953_v18  ;;  %325 = vmatpush.msra.mxu1 %v1955_v19  ;;  %2495 = vst [vmem:[#allocation23_spill] sm:$0xff] %v1989_v30  ;;  %v2097_v44 = vld [vmem:[#allocation7 + $0xd0] sm:$0xff]  ;;  %v2101_v45 = vld [vmem:[#allocation7 + $0x48] sm:$0xff]  ;;  %v2109_v48 = vld [vmem:[#allocation7 + $0xc0] sm:$0xff] }
  0x44   : > { %2496 = vst [vmem:[#allocation24_spill] sm:$0xff] %v1991_v31  ;;  %432 = vmatpush.msra.mxu3 %v1987_v29  ;;  %410 = vmatpush.msra.mxu2 %v2095_v43  ;;  %v2103_v46 = vld [vmem:[#allocation7 + $0xc8] sm:$0xff]  ;;  %v2113_v49 = vld [vmem:[#allocation7 + $0x38] sm:$0xff]  ;;  %v2119_v51 = vld [vmem:[#allocation7 + $0x30] sm:$0xff] }
  0x45   : > { %303 = vmatpush.msra.mxu0 %v1965_v22  ;;  %326 = vmatpush.msra.mxu1 %v1967_v23  ;;  %2497 = vst [vmem:[#allocation25_spill] sm:$0xff] %v1997_v32  ;;  %v2115_v50 = vld [vmem:[#allocation7 + $0xb8] sm:$0xff]  ;;  %v2121_v52 = vld [vmem:[#allocation7 + $0xb0] sm:$0xff]  ;;  %v2125_v53 = vld [vmem:[#allocation7 + $0x28] sm:$0xff] }
  0x46   : > { %2498 = vst [vmem:[#allocation26_spill] sm:$0xff] %v1999_v33  ;;  %433 = vmatpush.msra.mxu3 %v2097_v44  ;;  %411 = vmatpush.msra.mxu2 %v2101_v45  ;;  %v2127_v54 = vld [vmem:[#allocation7 + $0xa8] sm:$0xff]  ;;  %v2131_v55 = vld [vmem:[#allocation7 + $0x20] sm:$0xff]  ;;  %v2137_v57 = vld [vmem:[#allocation7 + $0x18] sm:$0xff] }
  0x47   : > { %304 = vmatpush.msra.mxu0 %v1977_v26  ;;  %327 = vmatpush.msra.mxu1 %v1979_v27  ;;  %2499 = vst [vmem:[#allocation27_spill] sm:$0xff] %v2005_v34  ;;  %v2133_v56 = vld [vmem:[#allocation7 + $0xa0] sm:$0xff]  ;;  %v2139_v58 = vld [vmem:[#allocation7 + $0x98] sm:$0xff]  ;;  %v2143_v59 = vld [vmem:[#allocation7 + $0x10] sm:$0xff] }
  0x48   : > { %2500 = vst [vmem:[#allocation28_spill] sm:$0xff] %v2007_v35  ;;  %434 = vmatpush.msra.mxu3 %v2103_v46  ;;  %412 = vmatpush.msra.mxu2 %v2107_v47  ;;  %v2145_v60 = vld [vmem:[#allocation7 + $0x90] sm:$0xff]  ;;  %v2149_v61 = vld [vmem:[#allocation7 + $0x8] sm:$0xff]  ;;  %v2153_v63 = vld [vmem:[#allocation7] sm:$0xff] }
  0x49   : > { %305 = vmatpush.msra.mxu0 %v1989_v30  ;;  %328 = vmatpush.msra.mxu1 %v1991_v31  ;;  %2501 = vst [vmem:[#allocation29_spill] sm:$0xff] %v2011_v36  ;;  %v2151_v62 = vld [vmem:[#allocation7 + $0x88] sm:$0xff] }
  0x4a   : > { %2502 = vst [vmem:[#allocation30_spill] sm:$0xff] %v2013_v37  ;;  %435 = vmatpush.msra.mxu3 %v2109_v48  ;;  %413 = vmatpush.msra.mxu2 %v2113_v49 }
  0x4b   : > { %306 = vmatpush.msra.mxu0 %v1997_v32  ;;  %329 = vmatpush.msra.mxu1 %v1999_v33  ;;  %2503 = vst [vmem:[#allocation31_spill] sm:$0xff] %v2017_v38 }
  0x4c   : > { %2504 = vst [vmem:[#allocation32_spill] sm:$0xff] %v2019_v39  ;;  %436 = vmatpush.msra.mxu3 %v2115_v50  ;;  %414 = vmatpush.msra.mxu2 %v2119_v51 }
  0x4d   : > { %307 = vmatpush.msra.mxu0 %v2005_v34  ;;  %330 = vmatpush.msra.mxu1 %v2007_v35  ;;  %2505 = vst [vmem:[#allocation33_spill] sm:$0xff] %v2023_v40 }
  0x4e   : > { %2506 = vst [vmem:[#allocation34_spill] sm:$0xff] %v2025_v41  ;;  %437 = vmatpush.msra.mxu3 %v2121_v52  ;;  %415 = vmatpush.msra.mxu2 %v2125_v53 }
  0x4f   : > { %308 = vmatpush.msra.mxu0 %v2011_v36  ;;  %331 = vmatpush.msra.mxu1 %v2013_v37 }
  0x50   : > { %438 = vmatpush.msra.mxu3 %v2127_v54  ;;  %416 = vmatpush.msra.mxu2 %v2131_v55 }
  0x51   : > { %309 = vmatpush.msra.mxu0 %v2017_v38  ;;  %332 = vmatpush.msra.mxu1 %v2019_v39 }
  0x52   : > { %439 = vmatpush.msra.mxu3 %v2133_v56  ;;  %417 = vmatpush.msra.mxu2 %v2137_v57 }
  0x53   : > { %310 = vmatpush.msra.mxu0 %v2023_v40  ;;  %333 = vmatpush.msra.mxu1 %v2025_v41 }
  0x54   : > { %311 = vmatmul.f32.vlgmr.msra.gmra.mxu0 %v1767_v42  ;;  %334 = vmatmul.f32.vlgmr.msra.gmra.mxu1 %v1767_v42 }
  0x55   : > { %489 = vmatpush.msrb.mxu0 %v1905_v0  ;;  %512 = vmatpush.msrb.mxu1 %v1907_v1 }
  0x56   : > { %440 = vmatpush.msra.mxu3 %v2139_v58  ;;  %418 = vmatpush.msra.mxu2 %v2143_v59 }
  0x57   : > { %490 = vmatpush.msrb.mxu0 %v1909_v2  ;;  %513 = vmatpush.msrb.mxu1 %v1913_v3 }
  0x58   : > { %441 = vmatpush.msra.mxu3 %v2145_v60  ;;  %419 = vmatpush.msra.mxu2 %v2149_v61 }
  0x59   : > { %491 = vmatpush.msrb.mxu0 %v1915_v4  ;;  %514 = vmatpush.msrb.mxu1 %v1917_v5 }
  0x5a   : > { %442 = vmatpush.msra.mxu3 %v2151_v62  ;;  %420 = vmatpush.msra.mxu2 %v2153_v63 }
  0x5b   : > { %492 = vmatpush.msrb.mxu0 %v1921_v6  ;;  %515 = vmatpush.msrb.mxu1 %v1923_v7 }
  0x5c   : > { %314 = vmatmul.f32.gmra.mxu0 %v1767_v42  ;;  %337 = vmatmul.f32.gmra.mxu1 %v1767_v42  ;;  %v2157_v42 = vld [vmem:[#allocation7 + $0x80] sm:$0xff] }
  0x5d   : > { %493 = vmatpush.msrb.mxu0 %v1927_v8  ;;  %516 = vmatpush.msrb.mxu1 %v1929_v9  ;;  %2507 = vst [vmem:[#allocation35_spill] sm:$0xff] %v2157_v42 }
  0x5e   : > { %443 = vmatpush.msra.mxu3 %v2157_v42  ;;  %599 = vmatpush.msrb.mxu2 %v1943_v14 }
  0x5f   : > { %494 = vmatpush.msrb.mxu0 %v1933_v10  ;;  %517 = vmatpush.msrb.mxu1 %v1935_v11 }
  0x60   : > { %622 = vmatpush.msrb.mxu3 %v1947_v15  ;;  %600 = vmatpush.msrb.mxu2 %v1949_v16 }
  0x61   : > { %495 = vmatpush.msrb.mxu0 %v1939_v12  ;;  %518 = vmatpush.msrb.mxu1 %v1941_v13 }
  0x62   : > { %623 = vmatpush.msrb.mxu3 %v1951_v17  ;;  %601 = vmatpush.msrb.mxu2 %v1961_v20 }
  0x63   : > { %496 = vmatpush.msrb.mxu0 %v1953_v18  ;;  %519 = vmatpush.msrb.mxu1 %v1955_v19 }
  0x64   : > { %624 = vmatpush.msrb.mxu3 %v1963_v21  ;;  %602 = vmatpush.msrb.mxu2 %v1973_v24 }
  0x65   : > { %497 = vmatpush.msrb.mxu0 %v1965_v22  ;;  %520 = vmatpush.msrb.mxu1 %v1967_v23 }
  0x66   : > { %625 = vmatpush.msrb.mxu3 %v1975_v25  ;;  %603 = vmatpush.msrb.mxu2 %v1985_v28 }
  0x67   : > { %498 = vmatpush.msrb.mxu0 %v1977_v26  ;;  %521 = vmatpush.msrb.mxu1 %v1979_v27 }
  0x68   : > { %626 = vmatpush.msrb.mxu3 %v1987_v29  ;;  %604 = vmatpush.msrb.mxu2 %v2095_v43 }
  0x69   : > { %499 = vmatpush.msrb.mxu0 %v1989_v30  ;;  %522 = vmatpush.msrb.mxu1 %v1991_v31 }
  0x6a   : > { %627 = vmatpush.msrb.mxu3 %v2097_v44  ;;  %605 = vmatpush.msrb.mxu2 %v2101_v45 }
  0x6b   : > { %500 = vmatpush.msrb.mxu0 %v1997_v32  ;;  %523 = vmatpush.msrb.mxu1 %v1999_v33 }
  0x6c   : > { %628 = vmatpush.msrb.mxu3 %v2103_v46  ;;  %606 = vmatpush.msrb.mxu2 %v2107_v47 }
  0x6d   : > { %501 = vmatpush.msrb.mxu0 %v2005_v34  ;;  %524 = vmatpush.msrb.mxu1 %v2007_v35 }
  0x6e   : > { %629 = vmatpush.msrb.mxu3 %v2109_v48  ;;  %607 = vmatpush.msrb.mxu2 %v2113_v49 }
  0x6f   : > { %502 = vmatpush.msrb.mxu0 %v2011_v36  ;;  %525 = vmatpush.msrb.mxu1 %v2013_v37 }
  0x70   : > { %630 = vmatpush.msrb.mxu3 %v2115_v50  ;;  %608 = vmatpush.msrb.mxu2 %v2119_v51 }
  0x71   : > { %503 = vmatpush.msrb.mxu0 %v2017_v38  ;;  %526 = vmatpush.msrb.mxu1 %v2019_v39 }
  0x72   : > { %631 = vmatpush.msrb.mxu3 %v2121_v52  ;;  %609 = vmatpush.msrb.mxu2 %v2125_v53 }
  0x73   : > { %504 = vmatpush.msrb.mxu0 %v2023_v40  ;;  %527 = vmatpush.msrb.mxu1 %v2025_v41 }
  0x74   : > { %632 = vmatpush.msrb.mxu3 %v2127_v54  ;;  %610 = vmatpush.msrb.mxu2 %v2131_v55 }
  0x75   : > { %683 = vmatpush.msra.mxu0 %v1905_v0  ;;  %706 = vmatpush.msra.mxu1 %v1907_v1 }
  0x76   : > { %633 = vmatpush.msrb.mxu3 %v2133_v56  ;;  %611 = vmatpush.msrb.mxu2 %v2137_v57 }
  0x77   : > { %684 = vmatpush.msra.mxu0 %v1909_v2  ;;  %707 = vmatpush.msra.mxu1 %v1913_v3 }
  0x78   : > { %634 = vmatpush.msrb.mxu3 %v2139_v58  ;;  %612 = vmatpush.msrb.mxu2 %v2143_v59 }
  0x79   : > { %685 = vmatpush.msra.mxu0 %v1915_v4  ;;  %708 = vmatpush.msra.mxu1 %v1917_v5 }
  0x7a   : > { %635 = vmatpush.msrb.mxu3 %v2145_v60  ;;  %613 = vmatpush.msrb.mxu2 %v2149_v61 }
  0x7b   : > { %686 = vmatpush.msra.mxu0 %v1921_v6  ;;  %709 = vmatpush.msra.mxu1 %v1923_v7 }
  0x7c   : > { %636 = vmatpush.msrb.mxu3 %v2151_v62  ;;  %614 = vmatpush.msrb.mxu2 %v2153_v63 }
  0x7d   : > { %687 = vmatpush.msra.mxu0 %v1927_v8  ;;  %710 = vmatpush.msra.mxu1 %v1929_v9 }
  0x7e   : > { %637 = vmatpush.msrb.mxu3 %v2157_v42 }
  0x7f   : > { %688 = vmatpush.msra.mxu0 %v1933_v10  ;;  %711 = vmatpush.msra.mxu1 %v1935_v11  ;;  %v2200_v11 = vld [vmem:[%s1895_s7 + $0x8] sm:$0xff] }
  0x81   : > { %689 = vmatpush.msra.mxu0 %v1939_v12  ;;  %712 = vmatpush.msra.mxu1 %v1941_v13 }
  0x83   : > { %690 = vmatpush.msra.mxu0 %v1953_v18  ;;  %713 = vmatpush.msra.mxu1 %v1955_v19 }
  0x85   : > { %691 = vmatpush.msra.mxu0 %v1965_v22  ;;  %714 = vmatpush.msra.mxu1 %v1967_v23 }
  0x87   : > { %692 = vmatpush.msra.mxu0 %v1977_v26  ;;  %715 = vmatpush.msra.mxu1 %v1979_v27 }
  0x89   : > { %693 = vmatpush.msra.mxu0 %v1989_v30  ;;  %716 = vmatpush.msra.mxu1 %v1991_v31 }
  0x8b   : > { %694 = vmatpush.msra.mxu0 %v1997_v32  ;;  %717 = vmatpush.msra.mxu1 %v1999_v33 }
  0x8d   : > { %695 = vmatpush.msra.mxu0 %v2005_v34  ;;  %718 = vmatpush.msra.mxu1 %v2007_v35 }
  0x8f   : > { %696 = vmatpush.msra.mxu0 %v2011_v36  ;;  %719 = vmatpush.msra.mxu1 %v2013_v37 }
  0x91   : > { %697 = vmatpush.msra.mxu0 %v2017_v38  ;;  %720 = vmatpush.msra.mxu1 %v2019_v39 }
  0x93   : > { %698 = vmatpush.msra.mxu0 %v2023_v40  ;;  %721 = vmatpush.msra.mxu1 %v2025_v41 }
  0xd1   : > { %v312_v41 = vpop.f32.mrf.mxu0  ;;  %v335_v40 = vpop.f32.mrf.mxu1 }
  0xd2   : > { %v341_v39 = vmax.f32 %v312_v41, 1e-05  ;;  %v342_v38 = vmax.f32 %v335_v40, 1e-05 }
  0xd4   : > { %1471 = vrcp.f32 %v341_v39  ;;  %v354_v27 = vand.u32 2147483647, %v341_v39  ;;  %v371_v26 = vand.u32 2147483648, %v342_v38  ;;  %v369_v22 = vand.u32 2147483647, %v342_v38 }
  0xd5   : > { %1473 = vrcp.f32 %v342_v38  ;;  %vm350_vm2 = vweird.f32 %v341_v39  ;;  %vm365_vm4 = vweird.f32 %v342_v38 }
  0xd6   : > { %vm355_vm5 = vcmp.eq.f32.partialorder %v354_v27, 8.507059e+37  ;;  %vm370_vm7 = vcmp.eq.f32.partialorder %v369_v22, 8.507059e+37 }
  0xd9   : > { %v315_v41 = vpop.f32.mrf.mxu0  ;;  %v338_v40 = vpop.f32.mrf.mxu1 }
  0xda   : > { %v1472_v37 = vpop.eup %1471  ;;  %v2179_v36 = vmax.f32 %v315_v41, 1e-05  ;;  %v2181_v35 = vmax.f32 %v338_v40, 1e-05  ;;  %v356_v41 = vand.u32 2147483648, %v341_v39 }
  0xdb   : > { %v1474_v34 = vpop.eup %1473  ;;  %v346_v33 = vmul.f32 %v1472_v37, %v341_v39  ;;  %vm351_vm0 = vweird.f32 %v1472_v37 }
  0xdc   : > { %v361_v32 = vmul.f32 %v1474_v34, %v342_v38  ;;  %1475 = vrcp.f32 %v2179_v36  ;;  %vm366_vm1 = vweird.f32 %v1474_v34  ;;  %vm352_vm3 = vmor %vm350_vm2, %vm351_vm0  ;;  %v357_v18 = vor.u32 1.1754944e-38, %v356_v41 }
  0xdd   : > { %1477 = vrcp.f32 %v2181_v35  ;;  %v347_v31 = vsub.f32 1.0, %v346_v33  ;;  %vm367_vm6 = vmor %vm365_vm4, %vm366_vm1  ;;  %v399_v22 = vand.u32 2147483647, %v2181_v35  ;;  %vm380_vm10 = vweird.f32 %v2179_v36 }
  0xde   : > { %v362_v40 = vsub.f32 1.0, %v361_v32  ;;  %v2194_v32 = vld [vmem:[%s1895_s7] sm:$0xff]  ;;  %vm395_vm12 = vweird.f32 %v2181_v35 }
  0xdf   : > { %v348_v30 = vmul.f32 %v1472_v37, %v347_v31  ;;  %vm400_vm15 = vcmp.eq.f32.partialorder %v399_v22, 8.507059e+37 }
  0xe0   : > { %v363_v23 = vmul.f32 %v1474_v34, %v362_v40 }
  0xe1   : > { %v349_v33 = vadd.f32 %v1472_v37, %v348_v30  ;;  %v372_v30 = vor.u32 1.1754944e-38, %v371_v26 }
  0xe2   : > { %v1476_v19 = vpop.eup %1475  ;;  %v364_v13 = vadd.f32 %v1474_v34, %v363_v23 }
  0xe3   : > { %v1478_v31 = vpop.eup %1477  ;;  %v376_v40 = vmul.f32 %v1476_v19, %v2179_v36  ;;  %v353_v12 = vsel %vm352_vm3, %v1472_v37, %v349_v33  ;;  %v386_v37 = vand.u32 2147483648, %v2179_v36  ;;  %vm381_vm8 = vweird.f32 %v1476_v19 }
  0xe4   : > { %v391_v39 = vmul.f32 %v1478_v31, %v2181_v35  ;;  %v358_v10 = vsel %vm355_vm5, %v357_v18, %v353_v12  ;;  %v368_v41 = vsel %vm367_vm6, %v1474_v34, %v364_v13  ;;  %v384_v13 = vand.u32 2147483647, %v2179_v36  ;;  %v2218_v34 = vld [vmem:[%s1895_s7 + $0x10] sm:$0xff]  ;;  %vm382_vm11 = vmor %vm380_vm10, %vm381_vm8 }
  0xe5   : > { %v359_v23 = vmul.f32 %v358_v10, %v2194_v32  ;;  %v373_v38 = vsel %vm370_vm7, %v372_v30, %v368_v41  ;;  %v377_v9 = vsub.f32 1.0, %v376_v40  ;;  %v401_v18 = vand.u32 2147483648, %v2181_v35 }
  0xe6   : > { %v374_v27 = vmul.f32 %v373_v38, %v2200_v11  ;;  %v392_v33 = vsub.f32 1.0, %v391_v39  ;;  %vm396_vm9 = vweird.f32 %v1478_v31  ;;  %vm385_vm13 = vcmp.eq.f32.partialorder %v384_v13, 8.507059e+37  ;;  %v2223_v39 = vld [vmem:[%s1895_s7 + $0x18] sm:$0xff] }
  0xe7   : > { %421 = vmatmul.f32.vlgmr.msra.gmra.mxu2 %v359_v23  ;;  %v378_v12 = vmul.f32 %v1476_v19, %v377_v9  ;;  %v387_v9 = vor.u32 1.1754944e-38, %v386_v37  ;;  %vm397_vm14 = vmor %vm395_vm12, %vm396_vm9  ;;  %v402_v41 = vor.u32 1.1754944e-38, %v401_v18 }
  0xe8   : > { %444 = vmatmul.f32.vlgmr.msra.gmra.mxu3 %v374_v27  ;;  %v393_v10 = vmul.f32 %v1478_v31, %v392_v33  ;;  %793 = vmatpush.msra.mxu2 %v1943_v14 }
  0xe9   : > { %v379_v26 = vadd.f32 %v1476_v19, %v378_v12  ;;  %816 = vmatpush.msra.mxu3 %v1947_v15 }
  0xea   : > { %v394_v40 = vadd.f32 %v1478_v31, %v393_v10  ;;  %794 = vmatpush.msra.mxu2 %v1949_v16 }
  0xeb   : > { %v383_v30 = vsel %vm382_vm11, %v1476_v19, %v379_v26  ;;  %817 = vmatpush.msra.mxu3 %v1951_v17 }
  0xec   : > { %v388_v36 = vsel %vm385_vm13, %v387_v9, %v383_v30  ;;  %v398_v23 = vsel %vm397_vm14, %v1478_v31, %v394_v40  ;;  %795 = vmatpush.msra.mxu2 %v1961_v20 }
  0xed   : > { %v389_v38 = vmul.f32 %v388_v36, %v2218_v34  ;;  %v403_v27 = vsel %vm400_vm15, %v402_v41, %v398_v23  ;;  %818 = vmatpush.msra.mxu3 %v1963_v21 }
  0xee   : > { %v404_v19 = vmul.f32 %v403_v27, %v2223_v39  ;;  %796 = vmatpush.msra.mxu2 %v1973_v24 }
  0xef   : > { %424 = vmatmul.f32.gmra.mxu2 %v389_v38  ;;  %819 = vmatpush.msra.mxu3 %v1975_v25 }
  0xf0   : > { %447 = vmatmul.f32.gmra.mxu3 %v404_v19  ;;  %797 = vmatpush.msra.mxu2 %v1985_v28 }
  0xf1   : > { %820 = vmatpush.msra.mxu3 %v1987_v29 }
  0xf2   : > { %798 = vmatpush.msra.mxu2 %v2095_v43 }
  0xf3   : > { %821 = vmatpush.msra.mxu3 %v2097_v44 }
  0xf4   : > { %799 = vmatpush.msra.mxu2 %v2101_v45 }
  0xf5   : > { %822 = vmatpush.msra.mxu3 %v2103_v46 }
  0xf6   : > { %800 = vmatpush.msra.mxu2 %v2107_v47 }
  0xf7   : > { %823 = vmatpush.msra.mxu3 %v2109_v48 }
  0xf8   : > { %801 = vmatpush.msra.mxu2 %v2113_v49 }
  0xf9   : > { %824 = vmatpush.msra.mxu3 %v2115_v50 }
  0xfa   : > { %802 = vmatpush.msra.mxu2 %v2119_v51 }
  0xfb   : > { %825 = vmatpush.msra.mxu3 %v2121_v52 }
  0xfc   : > { %803 = vmatpush.msra.mxu2 %v2125_v53 }
  0xfd   : > { %826 = vmatpush.msra.mxu3 %v2127_v54 }
  0xfe   : > { %804 = vmatpush.msra.mxu2 %v2131_v55 }
  0xff   : > { %827 = vmatpush.msra.mxu3 %v2133_v56 }
 0x100   : > { %805 = vmatpush.msra.mxu2 %v2137_v57 }
 0x101   : > { %828 = vmatpush.msra.mxu3 %v2139_v58 }
 0x102   : > { %806 = vmatpush.msra.mxu2 %v2143_v59 }
 0x103   : > { %829 = vmatpush.msra.mxu3 %v2145_v60 }
 0x104   : > { %807 = vmatpush.msra.mxu2 %v2149_v61 }
 0x105   : > { %830 = vmatpush.msra.mxu3 %v2151_v62 }
 0x106   : > { %808 = vmatpush.msra.mxu2 %v2153_v63 }
 0x107   : > { %831 = vmatpush.msra.mxu3 %v2157_v42 }
 0x16a   : > { %v422_v35 = vpop.f32.mrf.mxu2 }
 0x16b   : > { %v445_v31 = vpop.f32.mrf.mxu3 }
 0x16c   : > { %v446_v37 = vadd.f32 %v445_v31, %v422_v35 }
 0x16e   : > { %v451_v33 = vmul.f32 0.0078125, %v446_v37 }
 0x170   : > { %v453_v12 = vmax.f32 %v451_v33, 1e-05 }
 0x172   : > { %455 = vadd.xlane.f32.xlu0 %v453_v12  ;;  %v425_v13 = vpop.f32.mrf.mxu2 }
 0x173   : > { %v448_v18 = vpop.f32.mrf.mxu3 }
 0x174   : > { %v449_v10 = vadd.f32 %v448_v18, %v425_v13 }
 0x176   : > { %v452_v22 = vmul.f32 0.0078125, %v449_v10 }
 0x178   : > { %v454_v26 = vmax.f32 %v452_v22, 1e-05 }
 0x17a   : > { %457 = vadd.xlane.f32.xlu0 %v454_v26 }
 0x1e5   : > { %v456_v9 = vpop.xlane.xlu0 %455 }
 0x1e6   : > { %1479 = vrcp.f32 %v456_v9  ;;  %v470_v23 = vand.u32 2147483648, %v456_v9  ;;  %v468_v27 = vand.u32 2147483647, %v456_v9  ;;  %vm464_vm1 = vweird.f32 %v456_v9 }
 0x1e8   : > { %v471_v31 = vor.u32 1.1754944e-38, %v470_v23  ;;  %vm469_vm3 = vcmp.eq.f32.partialorder %v468_v27, 8.507059e+37  ;;  %v2521_v27 = vld [vmem:[#allocation25_spill] sm:$0xff] }
 0x1ec   : > { %v1480_v40 = vpop.eup %1479 }
 0x1ed   : > { %v460_v30 = vmul.f32 %v1480_v40, %v456_v9  ;;  %v458_v41 = vpop.xlane.xlu0 %457  ;;  %vm465_vm0 = vweird.f32 %v1480_v40 }
 0x1ee   : > { %1481 = vrcp.f32 %v458_v41  ;;  %vm466_vm2 = vmor %vm464_vm1, %vm465_vm0  ;;  %v484_v22 = vand.u32 2147483648, %v458_v41  ;;  %vm478_vm5 = vweird.f32 %v458_v41 }
 0x1ef   : > { %v461_v36 = vsub.f32 1.0, %v460_v30  ;;  %v482_v30 = vand.u32 2147483647, %v458_v41 }
 0x1f1   : > { %v462_v38 = vmul.f32 %v1480_v40, %v461_v36  ;;  %vm483_vm7 = vcmp.eq.f32.partialorder %v482_v30, 8.507059e+37  ;;  %v2530_v30 = vld [vmem:[#allocation34_spill] sm:$0xff] }
 0x1f3   : > { %v463_v19 = vadd.f32 %v1480_v40, %v462_v38  ;;  %v2520_v38 = vld [vmem:[#allocation24_spill] sm:$0xff] }
 0x1f4   : > { %v1482_v35 = vpop.eup %1481 }
 0x1f5   : > { %v474_v37 = vmul.f32 %v1482_v35, %v458_v41  ;;  %v467_v33 = vsel %vm466_vm2, %v1480_v40, %v463_v19  ;;  %vm479_vm4 = vweird.f32 %v1482_v35  ;;  %v485_v40 = vor.u32 1.1754944e-38, %v484_v22  ;;  %v2519_v41 = vld [vmem:[#allocation23_spill] sm:$0xff]  ;;  %v2522_v19 = vld [vmem:[#allocation26_spill] sm:$0xff]  ;;  %v2529_v22 = vld [vmem:[#allocation33_spill] sm:$0xff] }
 0x1f6   : > { %v472_v13 = vsel %vm469_vm3, %v471_v31, %v467_v33  ;;  %vm480_vm6 = vmor %vm478_vm5, %vm479_vm4  ;;  %v2524_v31 = vld [vmem:[#allocation28_spill] sm:$0xff]  ;;  %v2526_v33 = vld [vmem:[#allocation30_spill] sm:$0xff] }
 0x1f7   : > { %v475_v18 = vsub.f32 1.0, %v474_v37  ;;  %v2257_v10 = vmul.f32 %v472_v13, %v453_v12  ;;  %v2525_v37 = vld [vmem:[#allocation29_spill] sm:$0xff]  ;;  %v2527_v13 = vld [vmem:[#allocation31_spill] sm:$0xff] }
 0x1f9   : > { %v476_v42 = vmul.f32 %v1482_v35, %v475_v18  ;;  %505 = vmatmul.f32.vlgmr.msrb.gmra.mxu0 %v2257_v10  ;;  %528 = vmatmul.f32.vlgmr.msrb.gmra.mxu1 %v2257_v10  ;;  %v2528_v18 = vld [vmem:[#allocation32_spill] sm:$0xff] }
 0x1fa   : > { %877 = vmatpush.msrb.mxu0 %v1905_v0  ;;  %900 = vmatpush.msrb.mxu1 %v1907_v1  ;;  %v2508_v0 = vld [vmem:[#allocation12_spill] sm:$0xff]  ;;  %v2509_v1 = vld [vmem:[#allocation13_spill] sm:$0xff] }
 0x1fb   : > { %v477_v9 = vadd.f32 %v1482_v35, %v476_v42  ;;  %v2516_v42 = vld [vmem:[#allocation20_spill] sm:$0xff] }
 0x1fc   : > { %878 = vmatpush.msrb.mxu0 %v1909_v2  ;;  %901 = vmatpush.msrb.mxu1 %v1913_v3  ;;  %v2510_v2 = vld [vmem:[#allocation14_spill] sm:$0xff]  ;;  %v2511_v3 = vld [vmem:[#allocation15_spill] sm:$0xff] }
 0x1fd   : > { %v481_v12 = vsel %vm480_vm6, %v1482_v35, %v477_v9  ;;  %v2523_v35 = vld [vmem:[#allocation27_spill] sm:$0xff] }
 0x1fe   : > { %v486_v36 = vsel %vm483_vm7, %v485_v40, %v481_v12  ;;  %879 = vmatpush.msrb.mxu0 %v1915_v4  ;;  %902 = vmatpush.msrb.mxu1 %v1917_v5  ;;  %v2512_v4 = vld [vmem:[#allocation16_spill] sm:$0xff]  ;;  %v2513_v5 = vld [vmem:[#allocation17_spill] sm:$0xff] }
 0x1ff   : > { %v2267_v23 = vmul.f32 %v486_v36, %v454_v26  ;;  %v2517_v26 = vld [vmem:[#allocation21_spill] sm:$0xff] }
 0x200   : > { %880 = vmatpush.msrb.mxu0 %v1921_v6  ;;  %903 = vmatpush.msrb.mxu1 %v1923_v7  ;;  %v2514_v6 = vld [vmem:[#allocation18_spill] sm:$0xff]  ;;  %v2515_v7 = vld [vmem:[#allocation19_spill] sm:$0xff] }
 0x201   : > { %508 = vmatmul.f32.gmra.mxu0 %v2267_v23  ;;  %531 = vmatmul.f32.gmra.mxu1 %v2267_v23 }
 0x202   : > { %881 = vmatpush.msrb.mxu0 %v1927_v8  ;;  %904 = vmatpush.msrb.mxu1 %v2508_v0  ;;  %v2518_v8 = vld [vmem:[#allocation22_spill] sm:$0xff] }
 0x204   : > { %882 = vmatpush.msrb.mxu0 %v2509_v1  ;;  %905 = vmatpush.msrb.mxu1 %v2510_v2 }
 0x206   : > { %883 = vmatpush.msrb.mxu0 %v2511_v3  ;;  %906 = vmatpush.msrb.mxu1 %v2512_v4 }
 0x208   : > { %884 = vmatpush.msrb.mxu0 %v2513_v5  ;;  %907 = vmatpush.msrb.mxu1 %v2514_v6 }
 0x20a   : > { %885 = vmatpush.msrb.mxu0 %v2515_v7  ;;  %908 = vmatpush.msrb.mxu1 %v2516_v42 }
 0x20c   : > { %886 = vmatpush.msrb.mxu0 %v2517_v26  ;;  %909 = vmatpush.msrb.mxu1 %v2518_v8 }
 0x20e   : > { %887 = vmatpush.msrb.mxu0 %v2519_v41  ;;  %910 = vmatpush.msrb.mxu1 %v2520_v38 }
 0x210   : > { %888 = vmatpush.msrb.mxu0 %v2521_v27  ;;  %911 = vmatpush.msrb.mxu1 %v2522_v19 }
 0x212   : > { %889 = vmatpush.msrb.mxu0 %v2523_v35  ;;  %912 = vmatpush.msrb.mxu1 %v2524_v31 }
 0x214   : > { %890 = vmatpush.msrb.mxu0 %v2525_v37  ;;  %913 = vmatpush.msrb.mxu1 %v2526_v33 }
 0x216   : > { %891 = vmatpush.msrb.mxu0 %v2527_v13  ;;  %914 = vmatpush.msrb.mxu1 %v2528_v18 }
 0x218   : > { %892 = vmatpush.msrb.mxu0 %v2529_v22  ;;  %915 = vmatpush.msrb.mxu1 %v2530_v30 }
 0x276   : > { %v506_v9 = vpop.f32.mrf.mxu0  ;;  %v529_v40 = vpop.f32.mrf.mxu1 }
 0x277   : > { %v535_v12 = vmax.f32 %v506_v9, 1e-05  ;;  %v536_v36 = vmax.f32 %v529_v40, 1e-05 }
 0x279   : > { %1483 = vrcp.f32 %v535_v12  ;;  %v550_v8 = vand.u32 2147483648, %v535_v12  ;;  %v548_v38 = vand.u32 2147483647, %v535_v12  ;;  %v565_v27 = vand.u32 2147483648, %v536_v36 }
 0x27a   : > { %1485 = vrcp.f32 %v536_v36  ;;  %v563_v35 = vand.u32 2147483647, %v536_v36  ;;  %vm544_vm10 = vweird.f32 %v535_v12  ;;  %vm559_vm12 = vweird.f32 %v536_v36 }
 0x27b   : > { %v551_v33 = vor.u32 1.1754944e-38, %v550_v8  ;;  %vm549_vm13 = vcmp.eq.f32.partialorder %v548_v38, 8.507059e+37  ;;  %v566_v9 = vor.u32 1.1754944e-38, %v565_v27 }
 0x27c   : > { %vm564_vm15 = vcmp.eq.f32.partialorder %v563_v35, 8.507059e+37 }
 0x27e   : > { %v509_v0 = vpop.f32.mrf.mxu0  ;;  %v532_v1 = vpop.f32.mrf.mxu1 }
 0x27f   : > { %v1484_v2 = vpop.eup %1483  ;;  %v537_v3 = vmax.f32 %v509_v0, 1e-05  ;;  %v2297_v4 = vmax.f32 %v532_v1, 1e-05 }
 0x280   : > { %v1486_v5 = vpop.eup %1485  ;;  %v540_v6 = vmul.f32 %v1484_v2, %v535_v12  ;;  %vm545_vm8 = vweird.f32 %v1484_v2 }
 0x281   : > { %v555_v7 = vmul.f32 %v1486_v5, %v536_v36  ;;  %1487 = vrcp.f32 %v537_v3  ;;  %vm560_vm9 = vweird.f32 %v1486_v5  ;;  %vm546_vm11 = vmor %vm544_vm10, %vm545_vm8  ;;  %vm574_vm2 = vweird.f32 %v537_v3 }
 0x282   : > { %v541_v42 = vsub.f32 1.0, %v540_v6  ;;  %1489 = vrcp.f32 %v2297_v4  ;;  %vm561_vm14 = vmor %vm559_vm12, %vm560_vm9  ;;  %vm589_vm4 = vweird.f32 %v2297_v4 }
 0x283   : > { %v556_v26 = vsub.f32 1.0, %v555_v7 }
 0x284   : > { %v542_v41 = vmul.f32 %v1484_v2, %v541_v42 }
 0x285   : > { %v557_v19 = vmul.f32 %v1486_v5, %v556_v26  ;;  %v580_v26 = vand.u32 2147483648, %v537_v3 }
 0x286   : > { %v543_v31 = vadd.f32 %v1484_v2, %v542_v41  ;;  %v595_v41 = vand.u32 2147483648, %v2297_v4 }
 0x287   : > { %v1488_v37 = vpop.eup %1487  ;;  %v558_v13 = vadd.f32 %v1486_v5, %v557_v19  ;;  %v581_v19 = vor.u32 1.1754944e-38, %v580_v26  ;;  %v1539_v26 = vld [vmem:[#allocation5 + $0xb0] sm:$0xff] }
 0x288   : > { %v1490_v18 = vpop.eup %1489  ;;  %v570_v22 = vmul.f32 %v1488_v37, %v537_v3  ;;  %v547_v30 = vsel %vm546_vm11, %v1484_v2, %v543_v31  ;;  %vm575_vm0 = vweird.f32 %v1488_v37  ;;  %v578_v2 = vand.u32 2147483647, %v537_v3 }
 0x289   : > { %v585_v40 = vmul.f32 %v1490_v18, %v2297_v4  ;;  %v552_v0 = vsel %vm549_vm13, %v551_v33, %v547_v30  ;;  %v562_v1 = vsel %vm561_vm14, %v1486_v5, %v558_v13  ;;  %vm590_vm1 = vweird.f32 %v1490_v18  ;;  %vm576_vm3 = vmor %vm574_vm2, %vm575_vm0  ;;  %v1533_v30 = vld [vmem:[#allocation5 + $0xe0] sm:$0xff] }
 0x28a   : > { %v553_v6 = vmul.f32 %v552_v0, %v2194_v32  ;;  %v567_v7 = vsel %vm564_vm15, %v566_v9, %v562_v1  ;;  %v571_v12 = vsub.f32 1.0, %v570_v22  ;;  %v593_v5 = vand.u32 2147483647, %v2297_v4  ;;  %vm591_vm6 = vmor %vm589_vm4, %vm590_vm1  ;;  %v1532_v4 = vld [vmem:[#allocation5 + $0xf8] sm:$0xff]  ;;  %v1534_v9 = vld [vmem:[#allocation5 + $0xe8] sm:$0xff] }
 0x28b   : > { %v568_v42 = vmul.f32 %v567_v7, %v2200_v11  ;;  %v586_v8 = vsub.f32 1.0, %v585_v40  ;;  %vm579_vm5 = vcmp.eq.f32.partialorder %v578_v2, 8.507059e+37  ;;  %v596_v33 = vor.u32 1.1754944e-38, %v595_v41  ;;  %v1535_v1 = vld [vmem:[#allocation5 + $0xd0] sm:$0xff]  ;;  %v1542_v2 = vld [vmem:[#allocation5 + $0xa8] sm:$0xff] }
 0x28c   : > { %615 = vmatmul.f32.vlgmr.msrb.gmra.mxu2 %v553_v6  ;;  %v572_v36 = vmul.f32 %v1488_v37, %v571_v12  ;;  %vm594_vm7 = vcmp.eq.f32.partialorder %v593_v5, 8.507059e+37  ;;  %v1536_v6 = vld [vmem:[#allocation5 + $0xd8] sm:$0xff]  ;;  %v1537_v12 = vld [vmem:[#allocation5 + $0xc0] sm:$0xff]  ;;  %v1543_v41 = vld [vmem:[#allocation5 + $0x90] sm:$0xff] }
 0x28d   : > { %638 = vmatmul.f32.vlgmr.msrb.gmra.mxu3 %v568_v42  ;;  %v587_v38 = vmul.f32 %v1490_v18, %v586_v8  ;;  %987 = vmatpush.msrb.mxu2 %v1943_v14  ;;  %v1538_v42 = vld [vmem:[#allocation5 + $0xc8] sm:$0xff]  ;;  %v1540_v8 = vld [vmem:[#allocation5 + $0xb8] sm:$0xff]  ;;  %v1545_v5 = vld [vmem:[#allocation5 + $0x80] sm:$0xff] }
 0x28e   : > { %v573_v27 = vadd.f32 %v1488_v37, %v572_v36  ;;  %1010 = vmatpush.msrb.mxu3 %v1947_v15  ;;  %v1541_v36 = vld [vmem:[#allocation5 + $0xa0] sm:$0xff] }
 0x28f   : > { %v588_v35 = vadd.f32 %v1490_v18, %v587_v38  ;;  %988 = vmatpush.msrb.mxu2 %v1949_v16  ;;  %v2531_v16 = vld [vmem:[#allocation35_spill] sm:$0xff] }
 0x290   : > { %v577_v31 = vsel %vm576_vm3, %v1488_v37, %v573_v27  ;;  %1011 = vmatpush.msrb.mxu3 %v1951_v17  ;;  %v1544_v38 = vld [vmem:[#allocation5 + $0x98] sm:$0xff]  ;;  %v1546_v27 = vld [vmem:[#allocation5 + $0x88] sm:$0xff] }
 0x291   : > { %v582_v13 = vsel %vm579_vm5, %v581_v19, %v577_v31  ;;  %v592_v22 = vsel %vm591_vm6, %v1490_v18, %v588_v35  ;;  %989 = vmatpush.msrb.mxu2 %v1961_v20  ;;  %v1547_v19 = vld [vmem:[#allocation5 + $0x70] sm:$0xff]  ;;  %v1548_v35 = vld [vmem:[#allocation5 + $0x78] sm:$0xff]  ;;  %v1549_v31 = vld [vmem:[#allocation5 + $0x60] sm:$0xff] }
 0x292   : > { %v583_v14 = vmul.f32 %v582_v13, %v2218_v34  ;;  %v597_v15 = vsel %vm594_vm7, %v596_v33, %v592_v22  ;;  %1012 = vmatpush.msrb.mxu3 %v1963_v21  ;;  %v1550_v33 = vld [vmem:[#allocation5 + $0x68] sm:$0xff]  ;;  %v1551_v13 = vld [vmem:[#allocation5 + $0x50] sm:$0xff]  ;;  %v1552_v22 = vld [vmem:[#allocation5 + $0x58] sm:$0xff] }
 0x293   : > { %v598_v3 = vmul.f32 %v597_v15, %v2223_v39  ;;  %990 = vmatpush.msrb.mxu2 %v1973_v24  ;;  %v1554_v15 = vld [vmem:[#allocation5 + $0x48] sm:$0xff] }
 0x294   : > { %618 = vmatmul.f32.gmra.mxu2 %v583_v14  ;;  %1013 = vmatpush.msrb.mxu3 %v1975_v25  ;;  %v1553_v14 = vld [vmem:[#allocation5 + $0x40] sm:$0xff] }
 0x295   : > { %641 = vmatmul.f32.gmra.mxu3 %v598_v3  ;;  %991 = vmatpush.msrb.mxu2 %v1985_v28  ;;  %v1555_v3 = vld [vmem:[#allocation5 + $0x30] sm:$0xff] }
 0x296   : > { %1014 = vmatpush.msrb.mxu3 %v1987_v29 }
 0x297   : > { %992 = vmatpush.msrb.mxu2 %v2095_v43 }
 0x298   : > { %1015 = vmatpush.msrb.mxu3 %v2097_v44 }
 0x299   : > { %993 = vmatpush.msrb.mxu2 %v2101_v45 }
 0x29a   : > { %1016 = vmatpush.msrb.mxu3 %v2103_v46 }
 0x29b   : > { %994 = vmatpush.msrb.mxu2 %v2107_v47 }
 0x29c   : > { %1017 = vmatpush.msrb.mxu3 %v2109_v48 }
 0x29d   : > { %995 = vmatpush.msrb.mxu2 %v2113_v49 }
 0x29e   : > { %1018 = vmatpush.msrb.mxu3 %v2115_v50 }
 0x29f   : > { %996 = vmatpush.msrb.mxu2 %v2119_v51 }
 0x2a0   : > { %1019 = vmatpush.msrb.mxu3 %v2121_v52 }
 0x2a1   : > { %997 = vmatpush.msrb.mxu2 %v2125_v53 }
 0x2a2   : > { %1020 = vmatpush.msrb.mxu3 %v2127_v54 }
 0x2a3   : > { %998 = vmatpush.msrb.mxu2 %v2131_v55 }
 0x2a4   : > { %1021 = vmatpush.msrb.mxu3 %v2133_v56 }
 0x2a5   : > { %999 = vmatpush.msrb.mxu2 %v2137_v57 }
 0x2a6   : > { %1022 = vmatpush.msrb.mxu3 %v2139_v58 }
 0x2a7   : > { %1000 = vmatpush.msrb.mxu2 %v2143_v59 }
 0x2a8   : > { %1023 = vmatpush.msrb.mxu3 %v2145_v60 }
 0x2a9   : > { %1001 = vmatpush.msrb.mxu2 %v2149_v61 }
 0x2aa   : > { %1024 = vmatpush.msrb.mxu3 %v2151_v62 }
 0x2ab   : > { %1002 = vmatpush.msrb.mxu2 %v2153_v63 }
 0x2ac   : > { %1025 = vmatpush.msrb.mxu3 %v2531_v16  ;;  %v1556_v16 = vld [vmem:[#allocation5 + $0x38] sm:$0xff] }
 0x30f   : > { %v616_v17 = vpop.f32.mrf.mxu2 }
 0x310   : > { %v639_v20 = vpop.f32.mrf.mxu3 }
 0x311   : > { %v640_v21 = vadd.f32 %v639_v20, %v616_v17  ;;  %v1557_v17 = vld [vmem:[#allocation5 + $0x20] sm:$0xff]  ;;  %v1558_v20 = vld [vmem:[#allocation5 + $0x28] sm:$0xff] }
 0x313   : > { %v645_v24 = vmul.f32 %v640_v21, %v2257_v10  ;;  %v1559_v21 = vld [vmem:[#allocation5 + $0x10] sm:$0xff] }
 0x315   : > { %v647_v25 = vmax.f32 %v645_v24, 1e-05  ;;  %v1560_v24 = vld [vmem:[#allocation5 + $0x18] sm:$0xff] }
 0x317   : > { %649 = vadd.xlane.f32.xlu1 %v647_v25  ;;  %v619_v28 = vpop.f32.mrf.mxu2 }
 0x318   : > { %v642_v29 = vpop.f32.mrf.mxu3 }
 0x319   : > { %v643_v43 = vadd.f32 %v642_v29, %v619_v28  ;;  %v1562_v28 = vld [vmem:[#allocation5 + $0x8] sm:$0xff] }
 0x31b   : > { %v646_v44 = vmul.f32 %v643_v43, %v2267_v23  ;;  %v1531_v23 = vld [vmem:[#allocation5 + $0xf0] sm:$0xff] }
 0x31d   : > { %v648_v45 = vmax.f32 %v646_v44, 1e-05 }
 0x31f   : > { %651 = vadd.xlane.f32.xlu1 %v648_v45 }
 0x38a   : > { %v650_v46 = vpop.xlane.xlu1 %649 }
 0x38b   : > { %1491 = vrcp.f32 %v650_v46  ;;  %v664_v51 = vand.u32 2147483648, %v650_v46  ;;  %v662_v53 = vand.u32 2147483647, %v650_v46  ;;  %vm658_vm9 = vweird.f32 %v650_v46 }
 0x38d   : > { %v665_v56 = vor.u32 1.1754944e-38, %v664_v51  ;;  %vm663_vm11 = vcmp.eq.f32.partialorder %v662_v53, 8.507059e+37 }
 0x391   : > { %v1492_v47 = vpop.eup %1491 }
 0x392   : > { %v654_v48 = vmul.f32 %v1492_v47, %v650_v46  ;;  %v652_v49 = vpop.xlane.xlu1 %651  ;;  %vm659_vm8 = vweird.f32 %v1492_v47 }
 0x393   : > { %1493 = vrcp.f32 %v652_v49  ;;  %vm660_vm10 = vmor %vm658_vm9, %vm659_vm8  ;;  %v678_v62 = vand.u32 2147483648, %v652_v49  ;;  %v676_v10 = vand.u32 2147483647, %v652_v49  ;;  %vm672_vm13 = vweird.f32 %v652_v49 }
 0x394   : > { %v655_v50 = vsub.f32 1.0, %v654_v48 }
 0x395   : > { %v679_v18 = vor.u32 1.1754944e-38, %v678_v62  ;;  %vm677_vm15 = vcmp.eq.f32.partialorder %v676_v10, 8.507059e+37 }
 0x396   : > { %v656_v52 = vmul.f32 %v1492_v47, %v655_v50 }
 0x398   : > { %v657_v54 = vadd.f32 %v1492_v47, %v656_v52 }
 0x399   : > { %v1494_v55 = vpop.eup %1493 }
 0x39a   : > { %v668_v57 = vmul.f32 %v1494_v55, %v652_v49  ;;  %v661_v58 = vsel %vm660_vm10, %v1492_v47, %v657_v54  ;;  %vm673_vm12 = vweird.f32 %v1494_v55 }
 0x39b   : > { %v666_v59 = vsel %vm663_vm11, %v665_v56, %v661_v58  ;;  %vm674_vm14 = vmor %vm672_vm13, %vm673_vm12 }
 0x39c   : > { %v669_v60 = vsub.f32 1.0, %v668_v57  ;;  %v2342_v61 = vmul.f32 %v666_v59, %v647_v25  ;;  %v1561_v25 = vld [vmem:[#allocation5] sm:$0xff] }
 0x39e   : > { %v670_v63 = vmul.f32 %v1494_v55, %v669_v60  ;;  %699 = vmatmul.f32.vlgmr.msra.gmra.mxu0 %v2342_v61  ;;  %722 = vmatmul.f32.vlgmr.msra.gmra.mxu1 %v2342_v61 }
 0x39f   : > { %1071 = vmatpush.msra.mxu0 %v1531_v23  ;;  %1094 = vmatpush.msra.mxu1 %v1532_v4 }
 0x3a0   : > { %v671_v37 = vadd.f32 %v1494_v55, %v670_v63 }
 0x3a1   : > { %1072 = vmatpush.msra.mxu0 %v1533_v30  ;;  %1095 = vmatpush.msra.mxu1 %v1534_v9 }
 0x3a2   : > { %v675_v40 = vsel %vm674_vm14, %v1494_v55, %v671_v37 }
 0x3a3   : > { %v680_v0 = vsel %vm677_vm15, %v679_v18, %v675_v40  ;;  %1073 = vmatpush.msra.mxu0 %v1535_v1  ;;  %1096 = vmatpush.msra.mxu1 %v1536_v6 }
 0x3a4   : > { %v2346_v7 = vmul.f32 %v680_v0, %v648_v45 }
 0x3a5   : > { %1074 = vmatpush.msra.mxu0 %v1537_v12  ;;  %1097 = vmatpush.msra.mxu1 %v1538_v42 }
 0x3a6   : > { %702 = vmatmul.f32.gmra.mxu0 %v2346_v7  ;;  %725 = vmatmul.f32.gmra.mxu1 %v2346_v7 }
 0x3a7   : > { %1075 = vmatpush.msra.mxu0 %v1539_v26  ;;  %1098 = vmatpush.msra.mxu1 %v1540_v8 }
 0x3a9   : > { %1076 = vmatpush.msra.mxu0 %v1541_v36  ;;  %1099 = vmatpush.msra.mxu1 %v1542_v2 }
 0x3ab   : > { %1077 = vmatpush.msra.mxu0 %v1543_v41  ;;  %1100 = vmatpush.msra.mxu1 %v1544_v38 }
 0x3ad   : > { %1078 = vmatpush.msra.mxu0 %v1545_v5  ;;  %1101 = vmatpush.msra.mxu1 %v1546_v27 }
 0x3af   : > { %1079 = vmatpush.msra.mxu0 %v1547_v19  ;;  %1102 = vmatpush.msra.mxu1 %v1548_v35 }
 0x3b1   : > { %1080 = vmatpush.msra.mxu0 %v1549_v31  ;;  %1103 = vmatpush.msra.mxu1 %v1550_v33  ;;  %v1565_v33 = vld [vmem:[#allocation7 + $0x70] sm:$0xff] }
 0x3b3   : > { %1081 = vmatpush.msra.mxu0 %v1551_v13  ;;  %1104 = vmatpush.msra.mxu1 %v1552_v22 }
 0x3b5   : > { %1082 = vmatpush.msra.mxu0 %v1553_v14  ;;  %1105 = vmatpush.msra.mxu1 %v1554_v15  ;;  %v1566_v14 = vld [vmem:[#allocation7 + $0xf0] sm:$0xff] }
 0x3b7   : > { %1083 = vmatpush.msra.mxu0 %v1555_v3  ;;  %1106 = vmatpush.msra.mxu1 %v1556_v16  ;;  %v1567_v16 = vld [vmem:[#allocation7 + $0x68] sm:$0xff] }
 0x3b9   : > { %1084 = vmatpush.msra.mxu0 %v1557_v17  ;;  %1107 = vmatpush.msra.mxu1 %v1558_v20 }
 0x3bb   : > { %1085 = vmatpush.msra.mxu0 %v1559_v21  ;;  %1108 = vmatpush.msra.mxu1 %v1560_v24  ;;  %v1568_v21 = vld [vmem:[#allocation7 + $0xe8] sm:$0xff] }
 0x3bd   : > { %1086 = vmatpush.msra.mxu0 %v1561_v25  ;;  %1109 = vmatpush.msra.mxu1 %v1562_v28  ;;  %v1569_v25 = vld [vmem:[#allocation7 + $0x60] sm:$0xff] }
 0x3be   : > { %v1570_v28 = vld [vmem:[#allocation7 + $0xe0] sm:$0xff] }
 0x41b   : > { %v700_v29 = vpop.f32.mrf.mxu0  ;;  %v723_v43 = vpop.f32.mrf.mxu1 }
 0x41c   : > { %v729_v44 = vmax.f32 %v700_v29, 1e-05  ;;  %v730_v45 = vmax.f32 %v723_v43, 1e-05  ;;  %v1571_v29 = vld [vmem:[#allocation7 + $0x58] sm:$0xff] }
 0x41d   : > { %v1572_v43 = vld [vmem:[#allocation7 + $0xd8] sm:$0xff] }
 0x41e   : > { %1495 = vrcp.f32 %v729_v44  ;;  %v744_v55 = vand.u32 2147483648, %v729_v44  ;;  %v759_v58 = vand.u32 2147483648, %v730_v45  ;;  %v742_v59 = vand.u32 2147483647, %v729_v44 }
 0x41f   : > { %1497 = vrcp.f32 %v730_v45  ;;  %v757_v62 = vand.u32 2147483647, %v730_v45  ;;  %vm738_vm2 = vweird.f32 %v729_v44  ;;  %vm753_vm3 = vweird.f32 %v730_v45 }
 0x420   : > { %v745_v23 = vor.u32 1.1754944e-38, %v744_v55  ;;  %vm743_vm5 = vcmp.eq.f32.partialorder %v742_v59, 8.507059e+37  ;;  %v760_v9 = vor.u32 1.1754944e-38, %v759_v58  ;;  %v1586_v55 = vld [vmem:[#allocation7 + $0xa0] sm:$0xff]  ;;  %v1589_v58 = vld [vmem:[#allocation7 + $0x10] sm:$0xff] }
 0x421   : > { %vm758_vm7 = vcmp.eq.f32.partialorder %v757_v62, 8.507059e+37  ;;  %v1590_v59 = vld [vmem:[#allocation7 + $0x90] sm:$0xff]  ;;  %v1592_v62 = vld [vmem:[#allocation7 + $0x88] sm:$0xff] }
 0x423   : > { %v703_v46 = vpop.f32.mrf.mxu0  ;;  %v726_v47 = vpop.f32.mrf.mxu1 }
 0x424   : > { %v1496_v48 = vpop.eup %1495  ;;  %v2350_v49 = vmax.f32 %v703_v46, 1e-05  ;;  %v2352_v50 = vmax.f32 %v726_v47, 1e-05  ;;  %v1576_v46 = vld [vmem:[#allocation7 + $0xc8] sm:$0xff]  ;;  %v1577_v47 = vld [vmem:[#allocation7 + $0x40] sm:$0xff] }
 0x425   : > { %v1498_v51 = vpop.eup %1497  ;;  %v734_v52 = vmul.f32 %v1496_v48, %v729_v44  ;;  %vm739_vm0 = vweird.f32 %v1496_v48  ;;  %v1573_v44 = vld [vmem:[#allocation7 + $0x50] sm:$0xff] }
 0x426   : > { %v749_v53 = vmul.f32 %v1498_v51, %v730_v45  ;;  %1499 = vrcp.f32 %v2350_v49  ;;  %vm754_vm1 = vweird.f32 %v1498_v51  ;;  %vm740_vm4 = vmor %vm738_vm2, %vm739_vm0  ;;  %v774_v8 = vand.u32 2147483648, %v2350_v49  ;;  %v1574_v45 = vld [vmem:[#allocation7 + $0xd0] sm:$0xff] }
 0x427   : > { %v735_v54 = vsub.f32 1.0, %v734_v52  ;;  %1501 = vrcp.f32 %v2352_v50  ;;  %vm755_vm6 = vmor %vm753_vm3, %vm754_vm1  ;;  %v772_v41 = vand.u32 2147483647, %v2350_v49  ;;  %v789_v38 = vand.u32 2147483648, %v2352_v50  ;;  %v1583_v52 = vld [vmem:[#allocation7 + $0x28] sm:$0xff] }
 0x428   : > { %v750_v56 = vsub.f32 1.0, %v749_v53  ;;  %v787_v27 = vand.u32 2147483647, %v2352_v50  ;;  %vm768_vm10 = vweird.f32 %v2350_v49  ;;  %v775_v35 = vor.u32 1.1754944e-38, %v774_v8  ;;  %v1584_v53 = vld [vmem:[#allocation7 + $0xa8] sm:$0xff] }
 0x429   : > { %v736_v57 = vmul.f32 %v1496_v48, %v735_v54  ;;  %vm783_vm12 = vweird.f32 %v2352_v50  ;;  %vm773_vm13 = vcmp.eq.f32.partialorder %v772_v41, 8.507059e+37  ;;  %v790_v22 = vor.u32 1.1754944e-38, %v789_v38  ;;  %v1585_v54 = vld [vmem:[#allocation7 + $0x20] sm:$0xff] }
 0x42a   : > { %v751_v60 = vmul.f32 %v1498_v51, %v750_v56  ;;  %vm788_vm15 = vcmp.eq.f32.partialorder %v787_v27, 8.507059e+37  ;;  %v1587_v56 = vld [vmem:[#allocation7 + $0x18] sm:$0xff] }
 0x42b   : > { %v737_v63 = vadd.f32 %v1496_v48, %v736_v57  ;;  %v1588_v57 = vld [vmem:[#allocation7 + $0x98] sm:$0xff] }
 0x42c   : > { %v1500_v10 = vpop.eup %1499  ;;  %v752_v4 = vadd.f32 %v1498_v51, %v751_v60  ;;  %v1591_v60 = vld [vmem:[#allocation7 + $0x8] sm:$0xff] }
 0x42d   : > { %v1502_v37 = vpop.eup %1501  ;;  %v764_v18 = vmul.f32 %v1500_v10, %v2350_v49  ;;  %v741_v30 = vsel %vm740_vm4, %v1496_v48, %v737_v63  ;;  %vm769_vm8 = vweird.f32 %v1500_v10  ;;  %v1579_v48 = vld [vmem:[#allocation7 + $0x38] sm:$0xff]  ;;  %v1593_v63 = vld [vmem:[#allocation7] sm:$0xff] }
 0x42e   : > { %v779_v40 = vmul.f32 %v1502_v37, %v2352_v50  ;;  %v746_v0 = vsel %vm743_vm5, %v745_v23, %v741_v30  ;;  %v756_v1 = vsel %vm755_vm6, %v1498_v51, %v752_v4  ;;  %vm784_vm9 = vweird.f32 %v1502_v37  ;;  %vm770_vm11 = vmor %vm768_vm10, %vm769_vm8  ;;  %v1580_v49 = vld [vmem:[#allocation7 + $0xb8] sm:$0xff]  ;;  %v1581_v50 = vld [vmem:[#allocation7 + $0x30] sm:$0xff] }
 0x42f   : > { %v747_v6 = vmul.f32 %v746_v0, %v2194_v32  ;;  %v761_v12 = vsel %vm758_vm7, %v760_v9, %v756_v1  ;;  %v765_v42 = vsub.f32 1.0, %v764_v18  ;;  %v1563_v32 = vld [vmem:[#allocation7 + $0x78] sm:$0xff]  ;;  %vm785_vm14 = vmor %vm783_vm12, %vm784_vm9  ;;  %v1582_v51 = vld [vmem:[#allocation7 + $0xb0] sm:$0xff] }
 0x430   : > { %v762_v26 = vmul.f32 %v761_v12, %v2200_v11  ;;  %v780_v36 = vsub.f32 1.0, %v779_v40  ;;  %v1564_v11 = vld [vmem:[#allocation7 + $0xf8] sm:$0xff] }
 0x431   : > { %809 = vmatmul.f32.vlgmr.msra.gmra.mxu2 %v747_v6  ;;  %v766_v2 = vmul.f32 %v1500_v10, %v765_v42 }
 0x432   : > { %832 = vmatmul.f32.vlgmr.msra.gmra.mxu3 %v762_v26  ;;  %v781_v5 = vmul.f32 %v1502_v37, %v780_v36  ;;  %1181 = vmatpush.msra.mxu2 %v1563_v32 }
 0x433   : > { %v767_v19 = vadd.f32 %v1500_v10, %v766_v2  ;;  %1204 = vmatpush.msra.mxu3 %v1564_v11 }
 0x434   : > { %v782_v31 = vadd.f32 %v1502_v37, %v781_v5  ;;  %1182 = vmatpush.msra.mxu2 %v1565_v33 }
 0x435   : > { %v771_v13 = vsel %vm770_vm11, %v1500_v10, %v767_v19  ;;  %1205 = vmatpush.msra.mxu3 %v1566_v14  ;;  %v1594_v10 = vld [vmem:[#allocation7 + $0x80] sm:$0xff] }
 0x436   : > { %v776_v15 = vsel %vm773_vm13, %v775_v35, %v771_v13  ;;  %v786_v3 = vsel %vm785_vm14, %v1502_v37, %v782_v31  ;;  %1183 = vmatpush.msra.mxu2 %v1567_v16 }
 0x437   : > { %v777_v17 = vmul.f32 %v776_v15, %v2218_v34  ;;  %v791_v20 = vsel %vm788_vm15, %v790_v22, %v786_v3  ;;  %1206 = vmatpush.msra.mxu3 %v1568_v21  ;;  %v1575_v34 = vld [vmem:[#allocation7 + $0x48] sm:$0xff] }
 0x438   : > { %v792_v24 = vmul.f32 %v791_v20, %v2223_v39  ;;  %1184 = vmatpush.msra.mxu2 %v1569_v25  ;;  %v1578_v39 = vld [vmem:[#allocation7 + $0xc0] sm:$0xff] }
 0x439   : > { %812 = vmatmul.f32.gmra.mxu2 %v777_v17  ;;  %1207 = vmatpush.msra.mxu3 %v1570_v28 }
 0x43a   : > { %835 = vmatmul.f32.gmra.mxu3 %v792_v24  ;;  %1185 = vmatpush.msra.mxu2 %v1571_v29 }
 0x43b   : > { %1208 = vmatpush.msra.mxu3 %v1572_v43 }
 0x43c   : > { %1186 = vmatpush.msra.mxu2 %v1573_v44 }
 0x43d   : > { %1209 = vmatpush.msra.mxu3 %v1574_v45 }
 0x43e   : > { %1187 = vmatpush.msra.mxu2 %v1575_v34 }
 0x43f   : > { %1210 = vmatpush.msra.mxu3 %v1576_v46 }
 0x440   : > { %1188 = vmatpush.msra.mxu2 %v1577_v47 }
 0x441   : > { %1211 = vmatpush.msra.mxu3 %v1578_v39 }
 0x442   : > { %1189 = vmatpush.msra.mxu2 %v1579_v48 }
 0x443   : > { %1212 = vmatpush.msra.mxu3 %v1580_v49 }
 0x444   : > { %1190 = vmatpush.msra.mxu2 %v1581_v50 }
 0x445   : > { %1213 = vmatpush.msra.mxu3 %v1582_v51 }
 0x446   : > { %1191 = vmatpush.msra.mxu2 %v1583_v52 }
 0x447   : > { %1214 = vmatpush.msra.mxu3 %v1584_v53 }
 0x448   : > { %1192 = vmatpush.msra.mxu2 %v1585_v54 }
 0x449   : > { %1215 = vmatpush.msra.mxu3 %v1586_v55 }
 0x44a   : > { %1193 = vmatpush.msra.mxu2 %v1587_v56 }
 0x44b   : > { %1216 = vmatpush.msra.mxu3 %v1588_v57 }
 0x44c   : > { %1194 = vmatpush.msra.mxu2 %v1589_v58 }
 0x44d   : > { %1217 = vmatpush.msra.mxu3 %v1590_v59 }
 0x44e   : > { %1195 = vmatpush.msra.mxu2 %v1591_v60 }
 0x44f   : > { %1218 = vmatpush.msra.mxu3 %v1592_v62 }
 0x450   : > { %1196 = vmatpush.msra.mxu2 %v1593_v63 }
 0x451   : > { %1219 = vmatpush.msra.mxu3 %v1594_v10 }
 0x4b4   : > { %v810_v23 = vpop.f32.mrf.mxu2 }
 0x4b5   : > { %v833_v4 = vpop.f32.mrf.mxu3 }
 0x4b6   : > { %v834_v37 = vadd.f32 %v833_v4, %v810_v23  ;;  %v2384_v4 = vld [vmem:[%s1895_s7] sm:$0xff] }
 0x4b8   : > { %v839_v18 = vmul.f32 %v834_v37, %v2342_v61 }
 0x4ba   : > { %v841_v30 = vmax.f32 %v839_v18, 1e-05 }
 0x4bc   : > { %843 = vadd.xlane.f32.xlu2 %v841_v30  ;;  %v813_v9 = vpop.f32.mrf.mxu2 }
 0x4bd   : > { %v836_v40 = vpop.f32.mrf.mxu3 }
 0x4be   : > { %v837_v0 = vadd.f32 %v836_v40, %v813_v9  ;;  %v2388_v9 = vld [vmem:[%s1895_s7 + $0x8] sm:$0xff] }
 0x4c0   : > { %v840_v1 = vmul.f32 %v837_v0, %v2346_v7 }
 0x4c2   : > { %v842_v6 = vmax.f32 %v840_v1, 1e-05 }
 0x4c4   : > { %845 = vadd.xlane.f32.xlu2 %v842_v6 }
 0x52f   : > { %v844_v12 = vpop.xlane.xlu2 %843 }
 0x530   : > { %1503 = vrcp.f32 %v844_v12  ;;  %v858_v2 = vand.u32 2147483648, %v844_v12  ;;  %v856_v61 = vand.u32 2147483647, %v844_v12  ;;  %vm852_vm1 = vweird.f32 %v844_v12 }
 0x532   : > { %v859_v27 = vor.u32 1.1754944e-38, %v858_v2  ;;  %vm857_vm3 = vcmp.eq.f32.partialorder %v856_v61, 8.507059e+37 }
 0x536   : > { %v1504_v42 = vpop.eup %1503 }
 0x537   : > { %v848_v26 = vmul.f32 %v1504_v42, %v844_v12  ;;  %v846_v8 = vpop.xlane.xlu2 %845  ;;  %vm853_vm0 = vweird.f32 %v1504_v42 }
 0x538   : > { %1505 = vrcp.f32 %v846_v8  ;;  %vm854_vm2 = vmor %vm852_vm1, %vm853_vm0  ;;  %v872_v31 = vand.u32 2147483648, %v846_v8  ;;  %v870_v13 = vand.u32 2147483647, %v846_v8  ;;  %vm866_vm5 = vweird.f32 %v846_v8 }
 0x539   : > { %v849_v36 = vsub.f32 1.0, %v848_v26 }
 0x53a   : > { %v873_v14 = vor.u32 1.1754944e-38, %v872_v31  ;;  %vm871_vm7 = vcmp.eq.f32.partialorder %v870_v13, 8.507059e+37 }
 0x53b   : > { %v850_v41 = vmul.f32 %v1504_v42, %v849_v36 }
 0x53d   : > { %v851_v38 = vadd.f32 %v1504_v42, %v850_v41 }
 0x53e   : > { %v1506_v5 = vpop.eup %1505 }
 0x53f   : > { %v862_v7 = vmul.f32 %v1506_v5, %v846_v8  ;;  %v855_v32 = vsel %vm854_vm2, %v1504_v42, %v851_v38  ;;  %vm867_vm4 = vweird.f32 %v1506_v5 }
 0x540   : > { %v860_v19 = vsel %vm857_vm3, %v859_v27, %v855_v32  ;;  %vm868_vm6 = vmor %vm866_vm5, %vm867_vm4 }
 0x541   : > { %v863_v11 = vsub.f32 1.0, %v862_v7  ;;  %v2371_v35 = vmul.f32 %v860_v19, %v841_v30  ;;  %v2395_v7 = vld [vmem:[%s1895_s7 + $0x10] sm:$0xff] }
 0x543   : > { %v864_v33 = vmul.f32 %v1506_v5, %v863_v11  ;;  %893 = vmatmul.f32.vlgmr.msrb.gmra.mxu0 %v2371_v35  ;;  %916 = vmatmul.f32.vlgmr.msrb.gmra.mxu1 %v2371_v35  ;;  %v2399_v11 = vld [vmem:[%s1895_s7 + $0x18] sm:$0xff] }
 0x545   : > { %v865_v22 = vadd.f32 %v1506_v5, %v864_v33 }
 0x547   : > { %v869_v15 = vsel %vm868_vm6, %v1506_v5, %v865_v22 }
 0x548   : > { %v874_v3 = vsel %vm871_vm7, %v873_v14, %v869_v15 }
 0x549   : > { %v2375_v16 = vmul.f32 %v874_v3, %v842_v6 }
 0x54b   : > { %896 = vmatmul.f32.gmra.mxu0 %v2375_v16  ;;  %919 = vmatmul.f32.gmra.mxu1 %v2375_v16 }
 0x5c0   : > { %v894_v17 = vpop.f32.mrf.mxu0  ;;  %v917_v20 = vpop.f32.mrf.mxu1 }
 0x5c1   : > { %v923_v21 = vmax.f32 %v894_v17, 1e-05  ;;  %v924_v24 = vmax.f32 %v917_v20, 1e-05 }
 0x5c3   : > { %1507 = vrcp.f32 %v923_v21  ;;  %v938_v39 = vand.u32 2147483648, %v923_v21  ;;  %v953_v50 = vand.u32 2147483648, %v924_v24  ;;  %v936_v51 = vand.u32 2147483647, %v923_v21 }
 0x5c4   : > { %1509 = vrcp.f32 %v924_v24  ;;  %v951_v53 = vand.u32 2147483647, %v924_v24  ;;  %vm932_vm10 = vweird.f32 %v923_v21  ;;  %vm947_vm11 = vweird.f32 %v924_v24 }
 0x5c5   : > { %v939_v56 = vor.u32 1.1754944e-38, %v938_v39  ;;  %vm937_vm13 = vcmp.eq.f32.partialorder %v936_v51, 8.507059e+37  ;;  %v954_v62 = vor.u32 1.1754944e-38, %v953_v50 }
 0x5c6   : > { %vm952_vm15 = vcmp.eq.f32.partialorder %v951_v53, 8.507059e+37 }
 0x5c8   : > { %v897_v25 = vpop.f32.mrf.mxu0  ;;  %v920_v28 = vpop.f32.mrf.mxu1 }
 0x5c9   : > { %v1508_v29 = vpop.eup %1507  ;;  %v925_v43 = vmax.f32 %v897_v25, 1e-05  ;;  %v2379_v44 = vmax.f32 %v920_v28, 1e-05 }
 0x5ca   : > { %v1510_v45 = vpop.eup %1509  ;;  %v928_v34 = vmul.f32 %v1508_v29, %v923_v21  ;;  %vm933_vm8 = vweird.f32 %v1508_v29 }
 0x5cb   : > { %v943_v46 = vmul.f32 %v1510_v45, %v924_v24  ;;  %1511 = vrcp.f32 %v925_v43  ;;  %vm948_vm9 = vweird.f32 %v1510_v45  ;;  %vm934_vm12 = vmor %vm932_vm10, %vm933_vm8  ;;  %v968_v0 = vand.u32 2147483648, %v925_v43 }
 0x5cc   : > { %v929_v47 = vsub.f32 1.0, %v928_v34  ;;  %1513 = vrcp.f32 %v2379_v44  ;;  %vm949_vm14 = vmor %vm947_vm11, %vm948_vm9  ;;  %v966_v12 = vand.u32 2147483647, %v925_v43  ;;  %v983_v42 = vand.u32 2147483648, %v2379_v44 }
 0x5cd   : > { %v944_v48 = vsub.f32 1.0, %v943_v46  ;;  %v981_v8 = vand.u32 2147483647, %v2379_v44  ;;  %vm962_vm2 = vweird.f32 %v925_v43  ;;  %v969_v2 = vor.u32 1.1754944e-38, %v968_v0 }
 0x5ce   : > { %v930_v49 = vmul.f32 %v1508_v29, %v929_v47  ;;  %vm977_vm4 = vweird.f32 %v2379_v44  ;;  %vm967_vm5 = vcmp.eq.f32.partialorder %v966_v12, 8.507059e+37  ;;  %v984_v38 = vor.u32 1.1754944e-38, %v983_v42 }
 0x5cf   : > { %v945_v52 = vmul.f32 %v1510_v45, %v944_v48  ;;  %vm982_vm7 = vcmp.eq.f32.partialorder %v981_v8, 8.507059e+37 }
 0x5d0   : > { %v931_v54 = vadd.f32 %v1508_v29, %v930_v49 }
 0x5d1   : > { %v1512_v55 = vpop.eup %1511  ;;  %v946_v57 = vadd.f32 %v1510_v45, %v945_v52 }
 0x5d2   : > { %v1514_v58 = vpop.eup %1513  ;;  %v958_v59 = vmul.f32 %v1512_v55, %v925_v43  ;;  %v935_v60 = vsel %vm934_vm12, %v1508_v29, %v931_v54  ;;  %vm963_vm0 = vweird.f32 %v1512_v55 }
 0x5d3   : > { %v973_v63 = vmul.f32 %v1514_v58, %v2379_v44  ;;  %v940_v10 = vsel %vm937_vm13, %v939_v56, %v935_v60  ;;  %v950_v23 = vsel %vm949_vm14, %v1510_v45, %v946_v57  ;;  %vm978_vm1 = vweird.f32 %v1514_v58  ;;  %vm964_vm3 = vmor %vm962_vm2, %vm963_vm0 }
 0x5d4   : > { %v941_v37 = vmul.f32 %v2384_v4, %v940_v10  ;;  %v955_v18 = vsel %vm952_vm15, %v954_v62, %v950_v23  ;;  %v959_v30 = vsub.f32 1.0, %v958_v59  ;;  %vm979_vm6 = vmor %vm977_vm4, %vm978_vm1 }
 0x5d5   : > { %v956_v40 = vmul.f32 %v2388_v9, %v955_v18  ;;  %v974_v1 = vsub.f32 1.0, %v973_v63 }
 0x5d6   : > { %1003 = vmatmul.f32.vlgmr.msrb.gmra.mxu2 %v941_v37  ;;  %v960_v6 = vmul.f32 %v1512_v55, %v959_v30 }
 0x5d7   : > { %1026 = vmatmul.f32.vlgmr.msrb.gmra.mxu3 %v956_v40  ;;  %v975_v26 = vmul.f32 %v1514_v58, %v974_v1 }
 0x5d8   : > { %v961_v36 = vadd.f32 %v1512_v55, %v960_v6 }
 0x5d9   : > { %v976_v41 = vadd.f32 %v1514_v58, %v975_v26 }
 0x5da   : > { %v965_v61 = vsel %vm964_vm3, %v1512_v55, %v961_v36 }
 0x5db   : > { %v970_v5 = vsel %vm967_vm5, %v969_v2, %v965_v61  ;;  %v980_v27 = vsel %vm979_vm6, %v1514_v58, %v976_v41 }
 0x5dc   : > { %v971_v32 = vmul.f32 %v2395_v7, %v970_v5  ;;  %v985_v19 = vsel %vm982_vm7, %v984_v38, %v980_v27 }
 0x5dd   : > { %v986_v31 = vmul.f32 %v2399_v11, %v985_v19 }
 0x5de   : > { %1006 = vmatmul.f32.gmra.mxu2 %v971_v32 }
 0x5df   : > { %1029 = vmatmul.f32.gmra.mxu3 %v986_v31 }
 0x659   : > { %v1004_v33 = vpop.f32.mrf.mxu2 }
 0x65a   : > { %v1027_v13 = vpop.f32.mrf.mxu3 }
 0x65b   : > { %v1028_v22 = vadd.f32 %v1027_v13, %v1004_v33 }
 0x65d   : > { %v1033_v14 = vmul.f32 %v1028_v22, %v2371_v35 }
 0x65f   : > { %v1035_v15 = vmax.f32 %v1033_v14, 1e-05 }
 0x661   : > { %1037 = vadd.xlane.f32.xlu0 %v1035_v15  ;;  %v1007_v3 = vpop.f32.mrf.mxu2 }
 0x662   : > { %v1030_v17 = vpop.f32.mrf.mxu3 }
 0x663   : > { %v1031_v20 = vadd.f32 %v1030_v17, %v1007_v3 }
 0x665   : > { %v1034_v21 = vmul.f32 %v1031_v20, %v2375_v16 }
 0x667   : > { %v1036_v24 = vmax.f32 %v1034_v21, 1e-05 }
 0x669   : > { %1039 = vadd.xlane.f32.xlu1 %v1036_v24 }
 0x6d4   : > { %v1038_v25 = vpop.xlane.xlu0 %1037 }
 0x6d5   : > { %1515 = vrcp.f32 %v1038_v25  ;;  %v1052_v45 = vand.u32 2147483648, %v1038_v25  ;;  %v1050_v35 = vand.u32 2147483647, %v1038_v25  ;;  %vm1046_vm9 = vweird.f32 %v1038_v25 }
 0x6d7   : > { %v1053_v39 = vor.u32 1.1754944e-38, %v1052_v45  ;;  %vm1051_vm11 = vcmp.eq.f32.partialorder %v1050_v35, 8.507059e+37 }
 0x6db   : > { %v1516_v28 = vpop.eup %1515 }
 0x6dc   : > { %v1042_v29 = vmul.f32 %v1516_v28, %v1038_v25  ;;  %v1040_v43 = vpop.xlane.xlu1 %1039  ;;  %vm1047_vm8 = vweird.f32 %v1516_v28 }
 0x6dd   : > { %1517 = vrcp.f32 %v1040_v43  ;;  %vm1048_vm10 = vmor %vm1046_vm9, %vm1047_vm8  ;;  %v1066_v52 = vand.u32 2147483648, %v1040_v43  ;;  %v1064_v54 = vand.u32 2147483647, %v1040_v43  ;;  %vm1060_vm13 = vweird.f32 %v1040_v43 }
 0x6de   : > { %v1043_v44 = vsub.f32 1.0, %v1042_v29 }
 0x6df   : > { %v1067_v56 = vor.u32 1.1754944e-38, %v1066_v52  ;;  %vm1065_vm15 = vcmp.eq.f32.partialorder %v1064_v54, 8.507059e+37 }
 0x6e0   : > { %v1044_v34 = vmul.f32 %v1516_v28, %v1043_v44 }
 0x6e2   : > { %v1045_v46 = vadd.f32 %v1516_v28, %v1044_v34 }
 0x6e3   : > { %v1518_v47 = vpop.eup %1517 }
 0x6e4   : > { %v1056_v16 = vmul.f32 %v1518_v47, %v1040_v43  ;;  %v1049_v48 = vsel %vm1048_vm10, %v1516_v28, %v1045_v46  ;;  %vm1061_vm12 = vweird.f32 %v1518_v47 }
 0x6e5   : > { %v1054_v49 = vsel %vm1051_vm11, %v1053_v39, %v1049_v48  ;;  %vm1062_vm14 = vmor %vm1060_vm13, %vm1061_vm12 }
 0x6e6   : > { %v1057_v50 = vsub.f32 1.0, %v1056_v16  ;;  %v2404_v51 = vmul.f32 %v1054_v49, %v1035_v15 }
 0x6e8   : > { %v1058_v53 = vmul.f32 %v1518_v47, %v1057_v50  ;;  %1087 = vmatmul.f32.vlgmr.msra.gmra.mxu0 %v2404_v51  ;;  %1110 = vmatmul.f32.vlgmr.msra.gmra.mxu1 %v2404_v51 }
 0x6ea   : > { %v1059_v55 = vadd.f32 %v1518_v47, %v1058_v53 }
 0x6ec   : > { %v1063_v57 = vsel %vm1062_vm14, %v1518_v47, %v1059_v55 }
 0x6ed   : > { %v1068_v58 = vsel %vm1065_vm15, %v1067_v56, %v1063_v57 }
 0x6ee   : > { %v2408_v59 = vmul.f32 %v1068_v58, %v1036_v24 }
 0x6f0   : > { %1090 = vmatmul.f32.gmra.mxu0 %v2408_v59  ;;  %1113 = vmatmul.f32.gmra.mxu1 %v2408_v59 }
 0x765   : > { %v1088_v60 = vpop.f32.mrf.mxu0  ;;  %v1111_v62 = vpop.f32.mrf.mxu1 }
 0x766   : > { %v1117_v63 = vmax.f32 %v1088_v60, 1e-05  ;;  %v1118_v10 = vmax.f32 %v1111_v62, 1e-05 }
 0x768   : > { %1519 = vrcp.f32 %v1117_v63  ;;  %v1132_v42 = vand.u32 2147483648, %v1117_v63  ;;  %v1147_v36 = vand.u32 2147483648, %v1118_v10  ;;  %v1130_v2 = vand.u32 2147483647, %v1117_v63 }
 0x769   : > { %1521 = vrcp.f32 %v1118_v10  ;;  %v1145_v61 = vand.u32 2147483647, %v1118_v10  ;;  %vm1126_vm2 = vweird.f32 %v1117_v63  ;;  %vm1141_vm3 = vweird.f32 %v1118_v10 }
 0x76a   : > { %v1133_v27 = vor.u32 1.1754944e-38, %v1132_v42  ;;  %vm1131_vm5 = vcmp.eq.f32.partialorder %v1130_v2, 8.507059e+37  ;;  %v1148_v13 = vor.u32 1.1754944e-38, %v1147_v36 }
 0x76b   : > { %vm1146_vm7 = vcmp.eq.f32.partialorder %v1145_v61, 8.507059e+37 }
 0x76d   : > { %v1091_v23 = vpop.f32.mrf.mxu0  ;;  %v1114_v37 = vpop.f32.mrf.mxu1 }
 0x76e   : > { %v1520_v18 = vpop.eup %1519  ;;  %v1119_v30 = vmax.f32 %v1091_v23, 1e-05  ;;  %v1120_v40 = vmax.f32 %v1114_v37, 1e-05 }
 0x76f   : > { %v1522_v0 = vpop.eup %1521  ;;  %v1122_v1 = vmul.f32 %v1520_v18, %v1117_v63  ;;  %vm1127_vm0 = vweird.f32 %v1520_v18 }
 0x770   : > { %v1137_v6 = vmul.f32 %v1522_v0, %v1118_v10  ;;  %1523 = vrcp.f32 %v1119_v30  ;;  %vm1142_vm1 = vweird.f32 %v1522_v0  ;;  %vm1128_vm4 = vmor %vm1126_vm2, %vm1127_vm0  ;;  %v1162_v25 = vand.u32 2147483648, %v1119_v30 }
 0x771   : > { %v1123_v12 = vsub.f32 1.0, %v1122_v1  ;;  %1525 = vrcp.f32 %v1120_v40  ;;  %vm1143_vm6 = vmor %vm1141_vm3, %vm1142_vm1  ;;  %v1160_v29 = vand.u32 2147483647, %v1119_v30  ;;  %v1177_v43 = vand.u32 2147483648, %v1120_v40 }
 0x772   : > { %v1138_v26 = vsub.f32 1.0, %v1137_v6  ;;  %v1175_v45 = vand.u32 2147483647, %v1120_v40  ;;  %vm1156_vm10 = vweird.f32 %v1119_v30  ;;  %v1163_v35 = vor.u32 1.1754944e-38, %v1162_v25 }
 0x773   : > { %v1124_v8 = vmul.f32 %v1520_v18, %v1123_v12  ;;  %vm1171_vm12 = vweird.f32 %v1120_v40  ;;  %vm1161_vm13 = vcmp.eq.f32.partialorder %v1160_v29, 8.507059e+37 }
 0x774   : > { %v1139_v41 = vmul.f32 %v1522_v0, %v1138_v26  ;;  %vm1176_vm15 = vcmp.eq.f32.partialorder %v1175_v45, 8.507059e+37 }
 0x775   : > { %v1125_v38 = vadd.f32 %v1520_v18, %v1124_v8 }
 0x776   : > { %v1524_v5 = vpop.eup %1523  ;;  %v1140_v32 = vadd.f32 %v1522_v0, %v1139_v41 }
 0x777   : > { %v1526_v19 = vpop.eup %1525  ;;  %v1152_v31 = vmul.f32 %v1524_v5, %v1119_v30  ;;  %v1129_v33 = vsel %vm1128_vm4, %v1520_v18, %v1125_v38  ;;  %vm1157_vm8 = vweird.f32 %v1524_v5 }
 0x778   : > { %v1167_v22 = vmul.f32 %v1526_v19, %v1120_v40  ;;  %v1134_v14 = vsel %vm1131_vm5, %v1133_v27, %v1129_v33  ;;  %v1144_v15 = vsel %vm1143_vm6, %v1522_v0, %v1140_v32  ;;  %vm1172_vm9 = vweird.f32 %v1526_v19  ;;  %vm1158_vm11 = vmor %vm1156_vm10, %vm1157_vm8 }
 0x779   : > { %v1153_v3 = vsub.f32 1.0, %v1152_v31  ;;  %v1135_v17 = vmul.f32 %v2384_v4, %v1134_v14  ;;  %v1149_v20 = vsel %vm1146_vm7, %v1148_v13, %v1144_v15  ;;  %vm1173_vm14 = vmor %vm1171_vm12, %vm1172_vm9 }
 0x77a   : > { %v1168_v21 = vsub.f32 1.0, %v1167_v22  ;;  %v1150_v24 = vmul.f32 %v2388_v9, %v1149_v20  ;;  %v1178_v9 = vor.u32 1.1754944e-38, %v1177_v43 }
 0x77b   : > { %1197 = vmatmul.f32.vlgmr.msra.gmra.mxu2 %v1135_v17  ;;  %v1154_v28 = vmul.f32 %v1524_v5, %v1153_v3 }
 0x77c   : > { %1220 = vmatmul.f32.vlgmr.msra.gmra.mxu3 %v1150_v24  ;;  %v1169_v44 = vmul.f32 %v1526_v19, %v1168_v21 }
 0x77d   : > { %v1155_v34 = vadd.f32 %v1524_v5, %v1154_v28 }
 0x77e   : > { %v1170_v46 = vadd.f32 %v1526_v19, %v1169_v44 }
 0x77f   : > { %v1159_v4 = vsel %vm1158_vm11, %v1524_v5, %v1155_v34 }
 0x780   : > { %v1164_v47 = vsel %vm1161_vm13, %v1163_v35, %v1159_v4  ;;  %v1174_v39 = vsel %vm1173_vm14, %v1526_v19, %v1170_v46 }
 0x781   : > { %v1165_v16 = vmul.f32 %v2395_v7, %v1164_v47  ;;  %v1179_v48 = vsel %vm1176_vm15, %v1178_v9, %v1174_v39 }
 0x782   : > { %v1180_v49 = vmul.f32 %v2399_v11, %v1179_v48 }
 0x783   : > { %1200 = vmatmul.f32.gmra.mxu2 %v1165_v16 }
 0x784   : > { %1223 = vmatmul.f32.gmra.mxu3 %v1180_v49 }
 0x7fe   : > { %v1198_v50 = vpop.f32.mrf.mxu2 }
 0x7ff   : > { %v1221_v52 = vpop.f32.mrf.mxu3 }
 0x800   : > { %v1222_v53 = vadd.f32 %v1221_v52, %v1198_v50 }
 0x802   : > { %v1227_v54 = vmul.f32 %v1222_v53, %v2404_v51 }
 0x804   : > { %v1229_v55 = vmax.f32 %v1227_v54, 1e-05 }
 0x806   : > { %1231 = vadd.xlane.f32.xlu2 %v1229_v55  ;;  %v1201_v56 = vpop.f32.mrf.mxu2 }
 0x807   : > { %v1224_v57 = vpop.f32.mrf.mxu3 }
 0x808   : > { %v1225_v58 = vadd.f32 %v1224_v57, %v1201_v56 }
 0x80a   : > { %v1228_v60 = vmul.f32 %v1225_v58, %v2408_v59 }
 0x80c   : > { %v1230_v62 = vmax.f32 %v1228_v60, 1e-05 }
 0x80e   : > { %1233 = vadd.xlane.f32.xlu0 %v1230_v62 }
 0x879   : > { %v1232_v7 = vpop.xlane.xlu2 %1231 }
 0x87a   : > { %1527 = vrcp.f32 %v1232_v7  ;;  %v1246_v37 = vand.u32 2147483648, %v1232_v7  ;;  %v1244_v18 = vand.u32 2147483647, %v1232_v7  ;;  %vm1240_vm1 = vweird.f32 %v1232_v7 }
 0x87c   : > { %v1247_v59 = vor.u32 1.1754944e-38, %v1246_v37  ;;  %vm1245_vm3 = vcmp.eq.f32.partialorder %v1244_v18, 8.507059e+37 }
 0x880   : > { %v1528_v11 = vpop.eup %1527 }
 0x881   : > { %v1236_v63 = vmul.f32 %v1528_v11, %v1232_v7  ;;  %v1234_v10 = vpop.xlane.xlu0 %1233  ;;  %vm1241_vm0 = vweird.f32 %v1528_v11 }
 0x882   : > { %1529 = vrcp.f32 %v1234_v10  ;;  %vm1242_vm2 = vmor %vm1240_vm1, %vm1241_vm0  ;;  %v1260_v26 = vand.u32 2147483648, %v1234_v10  ;;  %v1258_v36 = vand.u32 2147483647, %v1234_v10  ;;  %vm1254_vm5 = vweird.f32 %v1234_v10 }
 0x883   : > { %v1237_v23 = vsub.f32 1.0, %v1236_v63 }
 0x884   : > { %v1261_v41 = vor.u32 1.1754944e-38, %v1260_v26  ;;  %vm1259_vm7 = vcmp.eq.f32.partialorder %v1258_v36, 8.507059e+37 }
 0x885   : > { %v1238_v51 = vmul.f32 %v1528_v11, %v1237_v23 }
 0x887   : > { %v1239_v30 = vadd.f32 %v1528_v11, %v1238_v51 }
 0x888   : > { %v1530_v40 = vpop.eup %1529 }
 0x889   : > { %v1243_v0 = vsel %vm1242_vm2, %v1528_v11, %v1239_v30  ;;  %v1250_v1 = vmul.f32 %v1530_v40, %v1234_v10  ;;  %vm1255_vm4 = vweird.f32 %v1530_v40 }
 0x88a   : > { %v1248_v6 = vsel %vm1245_vm3, %v1247_v59, %v1243_v0  ;;  %vm1256_vm6 = vmor %vm1254_vm5, %vm1255_vm4 }
 0x88b   : > { %v1263_v12 = vmul.f32 %v1248_v6, %v1229_v55  ;;  %v1251_v42 = vsub.f32 1.0, %v1250_v1 }
 0x88d   : > { %1265 = vst [vmem:[%s224_s4] sm:$0xff] %v1263_v12  ;;  %v1252_v8 = vmul.f32 %v1530_v40, %v1251_v42 }
 0x88f   : > { %v1253_v2 = vadd.f32 %v1530_v40, %v1252_v8 }
 0x891   : > { %v1257_v61 = vsel %vm1256_vm6, %v1530_v40, %v1253_v2 }
 0x892   : > { %v1262_v38 = vsel %vm1259_vm7, %v1261_v41, %v1257_v61 }
 0x893   : > { %v1264_v5 = vmul.f32 %v1262_v38, %v1230_v62 }
 0x895   : > { %1266 = vst [vmem:[%s224_s4 + $0x8] sm:$0xff] %v1264_v5 }
 0x896   : > { %1716 = shalt.err (!%p1713_p10)
}
 0x897   : > { %s1768_s20 = smov 128   ;;  %s1769_s27 = smov 8  }
 0x898   : > { %1407 = dma.vmem_to_hbm [thread:$0]  (%p1861_p3), %s1281_s5, 256, %s1283_s6, %s1268_s16, %s1768_s20, %s1768_s20, %s1769_s27  }
 0x899 PF: > { %p1429_p11 = scmp.ge.s32.totalorder %s1759_s15, 2  ;;  %s1297_s7 = sand.u32 1, %s1747_s12  }
 0x89a   : > { %s1298_s18 = scalar_lea.sflag [#allocation4], %s1297_s7 }
 0x89b   : > { %p1421_p12 = pnand %p1429_p11, %p1825_p6 }
 0x89d   : > { %p1422_p13 = pneg %p1421_p12 }
 0x89f   : > { %1742 = dma.done.wait (%p1422_p13), %s1298_s18, 256  }
 0x8a0   : > { %1744 = vsyncadd (%p1422_p13), %s1298_s18, 4294967040  ;;  %p17_p0 = scmp.ge.s32.totalorder %s1848_s8, 5   ;;  %s2532_s12 = smov %s1751_s13 }
 0x8a1   : > { %s2533_s13 = smov %s1755_s14  ;;  %s2534_s14 = smov %s1857_s11 }
 0x8a2   : > { %s2535_s15 = smov %s1848_s8  ;;  %19 = sbr.rel (!%p17_p0) target bundleno = 6 (0x6), region = 85 }
 0x8a7   :  { %1304 = vsyncpa [#allocation3], 1 }
 0x8a8   :  { %1306 = vsyncpa [#allocation3 + $0x1], 1 }
 0x8a9   :  { %1307 = vsyncpa [#allocation6], 1 }
 0x8aa   :  { %1308 = vsyncpa [#allocation4], 1 }
 0x8ab   :  { %1310 = vsyncpa [#allocation4 + $0x1], 1 }

// kernel: tpu_custom_call.1
= control target key start
LH: loop header
LB: loop body
LE: loop exit
PB: predicated region body
PF: predicated region fallthrough
CT: control target
= control target key end

     0   :  { %8 = vsyncpa [#allocation3], 0  ;;  %s2451_s0 = inlined_call_operand.hbm [shape: f32[48,256], index: 0, kind: input, shape index: {}]   ;;  %s2452_s1 = inlined_call_operand.hbm [shape: f32[128,256], index: 1, kind: input, shape index: {}]   ;;  %s2453_s2 = inlined_call_operand.hbm [shape: f32[256,128], index: 2, kind: input, shape index: {}]   ;;  %s2454_s3 = inlined_call_operand.hbm [shape: f32[48,128], index: 3, kind: output, shape index: {}]  }
   0x1   :  { %10 = vsyncpa [#allocation3 + $0x1], 0 }
   0x2   :  { %11 = vsyncpa [#allocation6], 0 }
   0x3   :  { %12 = vsyncpa [#allocation4], 0 }
   0x4   :  { %14 = vsyncpa [#allocation4 + $0x1], 0  ;;  %s1790_s12 = smov 0   ;;  %s1792_s13 = smov 0  }
   0x5   :  { %s1794_s14 = smov 0   ;;  %s1796_s15 = smov 0  }
   0x6 LB: > { %s1811_s16 = sadd.s32 4294967295, %s1759_s15   ;;  %s1375_s17 = sadd.s32 4294967294, %s1759_s15   ;;  %s1759_s15 = sphi %s1796_s15, %s2535_s15   ;;  %s1755_s14 = sphi %s1794_s14, %s2534_s14   ;;  %s1751_s13 = sphi %s1792_s13, %s2533_s13   ;;  %s1747_s12 = sphi %s1790_s12, %s2532_s12  }
   0x7   : > { %p40_p0 = scmp.ne.s32.totalorder %s1751_s13, %s1747_s12  ;;  %p41_p1 = scmp.eq.s32.totalorder %s1811_s16, 0 }
   0x8   : > { %p106_p2 = scmp.eq.s32.totalorder %s1811_s16, 2  ;;  %p112_p3 = scmp.eq.s32.totalorder %s1375_s17, 2 }
   0x9   : > { %p1820_p4 = por %p41_p1, %p40_p0  ;;  %p1376_p5 = scmp.ge.s32.totalorder %s1759_s15, 1 }
   0xa   : > { %p1825_p6 = por %p112_p3, %p40_p0  ;;  %p119_p7 = scmp.lt.s32.totalorder %s1759_s15, 4 }
   0xb   : > { %s130_s22 = sshll.u32 %s2452_s1, 4  ;;  %s1761_s24 = smov [#allocation5]   ;;  %s131_s22 = int_to_ptr.hbm [resolvable:$true] %s130_s22 }
   0xc   : > { %p1833_p8 = pnand %p1376_p5, %p119_p7  ;;  %s132_s25 = sshll.u32 %s1761_s24, 4  ;;  %s133_s25 = int_to_ptr.vmem [resolvable:$true] %s132_s25 }
   0xd   : > { %s144_s28 = sshll.u32 %s2453_s2, 4  ;;  %s1762_s29 = smov 256   ;;  %s145_s28 = int_to_ptr.hbm [resolvable:$true] %s144_s28 }
   0xe   : > { %p1409_p9 = pneg %p1833_p8  ;;  %s1763_s30 = smov 16  }
   0xf   : > { %s1764_s4 = smov [#allocation7]   ;;  %s1765_s6 = smov 128  }
  0x10   : > { %p1410_p10 = pnand %p1409_p9, %p41_p1  ;;  %s146_s5 = sshll.u32 %s1764_s4, 4  ;;  %s147_s5 = int_to_ptr.vmem [resolvable:$true] %s146_s5 }
  0x11   : > { %s1766_s7 = smov 8   ;;  %s1848_s8 = sadd.s32 1, %s1759_s15  }
  0x12   : > { %1412 = dma.hbm_to_vmem [thread:$0]  (!%p1410_p10), %s131_s22, 4096, %s133_s25, [#allocation6], %s1762_s29, %s1762_s29, %s1763_s30  }
  0x13   : > { %1415 = dma.hbm_to_vmem [thread:$0]  (!%p1410_p10), %s145_s28, 4096, %s147_s5, [#allocation6], %s1765_s6, %s1765_s6, %s1766_s7  }
  0x14   : > { %s24_s9 = ssub.s32 %s1759_s15, %s1848_s8  ;;  %s27_s10 = sadd.s32 1, %s1755_s14 }
  0x15   : > { %p25_p11 = scmp.eq.s32.totalorder %s24_s9, 0  ;;  %p34_p12 = scmp.ne.s32.totalorder %s1755_s14, %s1751_s13 }
  0x16   : > { %p35_p13 = scmp.eq.s32.totalorder %s1759_s15, 0  ;;  %p1426_p5 = scmp.lt.s32.totalorder %s1759_s15, 3 }
  0x17   : > { %s1857_s11 = scalar_select %p25_p11, %s1755_s14, %s27_s10  }
  0x18   : > { %p36_p0 = por %p35_p13, %p34_p12  ;;  %p1861_p3 = por %p106_p2, %p34_p12 }
  0x19   : > { %s160_s20 = sand.u32 1, %s1755_s14   ;;  %s1395_s22 = sshll.u32 %s1759_s15, 5 }
  0x1a   : > { %s1380_s21 = sshll.u32 %s160_s20, 5  ;;  %s170_s26 = scalar_lea.hbm %s2451_s0, %s1395_s22 }
  0x1b   : > { %s164_s27 = scalar_lea.vmem [#allocation2], %s1380_s21  ;;  %s171_s4 = sshll.u32 %s170_s26, 4  ;;  %s172_s4 = int_to_ptr.hbm [resolvable:$true] %s171_s4 }
  0x1c   : > { %s173_s28 = sshll.u32 %s164_s27, 4  ;;  %p1871_p7 = pnand %p1426_p5, %p36_p0  ;;  %s174_s28 = int_to_ptr.vmem [resolvable:$true] %s173_s28 }
  0x1d   : > { %s161_s6 = scalar_lea.sflag [#allocation3], %s160_s20  ;;  %s1659_s7 = sshra.s32 %s172_s4, 4  ;;  %s1660_s7 = int_to_ptr.hbm [resolvable:$true] %s1659_s7 }
  0x1e   : > { %s1661_s9 = scalar_lea.hbm %s1660_s7, 32  ;;  %p1663_p9 = pneg %p1871_p7 }
  0x1f   : > { %p1662_p2 = scmp.ne.s32.totalorder %s1660_s7, %s1661_s9  ;;  %s1666_s22 = scalar_lea.hbm %s2451_s0, 96 }
  0x20   : > { %p1667_p12 = scmp.lt.s32.totalorder %s1660_s7, %s2451_s0  ;;  %p1668_p13 = scmp.lt.s32.totalorder %s1666_s22, %s1661_s9 }
  0x21   : > { %p1664_p10 = pnand %p1663_p9, %p1662_p2 }
  0x22   : > { %p1669_p0 = por %p1668_p13, %p1667_p12 }
  0x23   : > { %p1665_p11 = pneg %p1664_p10 }
  0x25   : > { %p1670_p5 = pnand %p1669_p0, %p1665_p11 }
  0x27   : > { %1673 = shalt.err (!%p1670_p5)
}
  0x28   : > { %1419 = dma.hbm_to_vmem [thread:$0]  (!%p1871_p7), %s172_s4, 512, %s174_s28, %s161_s6, %s1762_s29, %s1762_s29, %s1763_s30  }
  0x29   : > { %185 = sbr.rel (%p1833_p8) target bundleno = 2201 (0x899), region = 32 }
  0x2e   : > { %s1891_s20 = sand.u32 1, %s1751_s13  }
  0x2f   : > { %s1385_s26 = sshll.u32 %s1891_s20, 5  ;;  %s188_s27 = scalar_lea.sflag [#allocation3], %s1891_s20 }
  0x30   : > { %s1895_s7 = scalar_lea.vmem [#allocation2], %s1385_s26 }
  0x31   : > { %1734 = dma.done.wait (%p1820_p4), %s188_s27, 512  }
  0x32   : > { %1736 = vsyncadd (%p1820_p4), %s188_s27, 4294966784 }
  0x33   : > { %1738 = dma.done.wait (%p41_p1), [#allocation6], 8192  }
  0x34   : > { %1740 = vsyncadd (%p41_p1), [#allocation6], 4294959104  ;;  %v1905_v0 = vld [vmem:[#allocation5 + $0xf0] sm:$0xff]  ;;  %v1907_v1 = vld [vmem:[#allocation5 + $0xf8] sm:$0xff]  ;;  %v1767_v42 = vmov 0.0078125   ;;  %s1388_s18 = sshll.u32 %s1891_s20, 4 }
  0x35   : > { %v1909_v2 = vld [vmem:[#allocation5 + $0xe0] sm:$0xff]  ;;  %295 = vmatpush.msra.mxu0 %v1905_v0  ;;  %318 = vmatpush.msra.mxu1 %v1907_v1  ;;  %v1913_v3 = vld [vmem:[#allocation5 + $0xe8] sm:$0xff]  ;;  %v1915_v4 = vld [vmem:[#allocation5 + $0xd0] sm:$0xff]  ;;  %s1396_s23 = sshll.u32 %s1811_s16, 4  ;;  %s224_s4 = scalar_lea.vmem [#allocation8], %s1388_s18 }
  0x36   : > { %v1917_v5 = vld [vmem:[#allocation5 + $0xd8] sm:$0xff]  ;;  %v1921_v6 = vld [vmem:[#allocation5 + $0xc0] sm:$0xff]  ;;  %v1923_v7 = vld [vmem:[#allocation5 + $0xc8] sm:$0xff]  ;;  %s1279_s28 = scalar_lea.hbm %s2454_s3, %s1396_s23  ;;  %s1280_s5 = sshll.u32 %s224_s4, 4  ;;  %s1281_s5 = int_to_ptr.vmem [resolvable:$true] %s1280_s5 }
  0x37   : > { %296 = vmatpush.msra.mxu0 %v1909_v2  ;;  %319 = vmatpush.msra.mxu1 %v1913_v3  ;;  %v1927_v8 = vld [vmem:[#allocation5 + $0xb0] sm:$0xff]  ;;  %v1929_v9 = vld [vmem:[#allocation5 + $0xb8] sm:$0xff]  ;;  %v1933_v10 = vld [vmem:[#allocation5 + $0xa0] sm:$0xff]  ;;  %s1282_s6 = sshll.u32 %s1279_s28, 4  ;;  %s1268_s16 = scalar_lea.sflag [#allocation4], %s1891_s20  ;;  %s1283_s6 = int_to_ptr.hbm [resolvable:$true] %s1282_s6 }
  0x38   : > { %2484 = vst [vmem:[#allocation12_spill] sm:$0xff] %v1929_v9  ;;  %v1935_v11 = vld [vmem:[#allocation5 + $0xa8] sm:$0xff]  ;;  %v1939_v12 = vld [vmem:[#allocation5 + $0x90] sm:$0xff]  ;;  %v1941_v13 = vld [vmem:[#allocation5 + $0x98] sm:$0xff]  ;;  %s1703_s9 = sshra.s32 %s1283_s6, 4  ;;  %s1709_s24 = scalar_lea.hbm %s2454_s3, 48  ;;  %s1704_s9 = int_to_ptr.hbm [resolvable:$true] %s1703_s9 }
  0x39   : > { %297 = vmatpush.msra.mxu0 %v1915_v4  ;;  %320 = vmatpush.msra.mxu1 %v1917_v5  ;;  %2485 = vst [vmem:[#allocation13_spill] sm:$0xff] %v1933_v10  ;;  %v1943_v14 = vld [vmem:[#allocation7 + $0x78] sm:$0xff]  ;;  %v1949_v16 = vld [vmem:[#allocation7 + $0x70] sm:$0xff]  ;;  %v1953_v18 = vld [vmem:[#allocation5 + $0x80] sm:$0xff]  ;;  %s1705_s10 = scalar_lea.hbm %s1704_s9, 16  ;;  %p1710_p7 = scmp.lt.s32.totalorder %s1704_s9, %s2454_s3 }
  0x3a   : > { %2486 = vst [vmem:[#allocation14_spill] sm:$0xff] %v1935_v11  ;;  %v1947_v15 = vld [vmem:[#allocation7 + $0xf8] sm:$0xff]  ;;  %v1951_v17 = vld [vmem:[#allocation7 + $0xf0] sm:$0xff]  ;;  %v1955_v19 = vld [vmem:[#allocation5 + $0x88] sm:$0xff]  ;;  %405 = vmatpush.msra.mxu2 %v1943_v14  ;;  %p1706_p1 = scmp.ne.s32.totalorder %s1704_s9, %s1705_s10  ;;  %p1711_p2 = scmp.lt.s32.totalorder %s1709_s24, %s1705_s10 }
  0x3b   : > { %298 = vmatpush.msra.mxu0 %v1921_v6  ;;  %321 = vmatpush.msra.mxu1 %v1923_v7  ;;  %2487 = vst [vmem:[#allocation15_spill] sm:$0xff] %v1939_v12  ;;  %v1961_v20 = vld [vmem:[#allocation7 + $0x68] sm:$0xff]  ;;  %v1965_v22 = vld [vmem:[#allocation5 + $0x70] sm:$0xff]  ;;  %v1967_v23 = vld [vmem:[#allocation5 + $0x78] sm:$0xff] }
  0x3c   : > { %2488 = vst [vmem:[#allocation16_spill] sm:$0xff] %v1941_v13  ;;  %428 = vmatpush.msra.mxu3 %v1947_v15  ;;  %v1963_v21 = vld [vmem:[#allocation7 + $0xe8] sm:$0xff]  ;;  %406 = vmatpush.msra.mxu2 %v1949_v16  ;;  %v1973_v24 = vld [vmem:[#allocation7 + $0x60] sm:$0xff]  ;;  %v1985_v28 = vld [vmem:[#allocation7 + $0x58] sm:$0xff]  ;;  %p1707_p4 = pnand %p1706_p1, %p1861_p3  ;;  %p1712_p9 = por %p1711_p2, %p1710_p7 }
  0x3d   : > { %299 = vmatpush.msra.mxu0 %v1927_v8  ;;  %322 = vmatpush.msra.mxu1 %v1929_v9  ;;  %2489 = vst [vmem:[#allocation17_spill] sm:$0xff] %v1953_v18  ;;  %v1975_v25 = vld [vmem:[#allocation7 + $0xe0] sm:$0xff]  ;;  %v1979_v27 = vld [vmem:[#allocation5 + $0x68] sm:$0xff]  ;;  %v1987_v29 = vld [vmem:[#allocation7 + $0xd8] sm:$0xff] }
  0x3e   : > { %2490 = vst [vmem:[#allocation18_spill] sm:$0xff] %v1955_v19  ;;  %429 = vmatpush.msra.mxu3 %v1951_v17  ;;  %v1977_v26 = vld [vmem:[#allocation5 + $0x60] sm:$0xff]  ;;  %407 = vmatpush.msra.mxu2 %v1961_v20  ;;  %v1989_v30 = vld [vmem:[#allocation5 + $0x50] sm:$0xff]  ;;  %v1991_v31 = vld [vmem:[#allocation5 + $0x58] sm:$0xff]  ;;  %p1708_p8 = pneg %p1707_p4 }
  0x3f   : > { %300 = vmatpush.msra.mxu0 %v1933_v10  ;;  %323 = vmatpush.msra.mxu1 %v1935_v11  ;;  %2491 = vst [vmem:[#allocation19_spill] sm:$0xff] %v1965_v22  ;;  %v1997_v32 = vld [vmem:[#allocation5 + $0x40] sm:$0xff]  ;;  %v1999_v33 = vld [vmem:[#allocation5 + $0x48] sm:$0xff]  ;;  %v2005_v34 = vld [vmem:[#allocation5 + $0x30] sm:$0xff] }
  0x40   : > { %2492 = vst [vmem:[#allocation20_spill] sm:$0xff] %v1967_v23  ;;  %430 = vmatpush.msra.mxu3 %v1963_v21  ;;  %408 = vmatpush.msra.mxu2 %v1973_v24  ;;  %v2007_v35 = vld [vmem:[#allocation5 + $0x38] sm:$0xff]  ;;  %v2011_v36 = vld [vmem:[#allocation5 + $0x20] sm:$0xff]  ;;  %v2013_v37 = vld [vmem:[#allocation5 + $0x28] sm:$0xff]  ;;  %p1713_p10 = pnand %p1712_p9, %p1708_p8 }
  0x41   : > { %301 = vmatpush.msra.mxu0 %v1939_v12  ;;  %324 = vmatpush.msra.mxu1 %v1941_v13  ;;  %2493 = vst [vmem:[#allocation21_spill] sm:$0xff] %v1977_v26  ;;  %v2017_v38 = vld [vmem:[#allocation5 + $0x10] sm:$0xff]  ;;  %v2019_v39 = vld [vmem:[#allocation5 + $0x18] sm:$0xff]  ;;  %v2023_v40 = vld [vmem:[#allocation5] sm:$0xff] }
  0x42   : > { %2494 = vst [vmem:[#allocation22_spill] sm:$0xff] %v1979_v27  ;;  %431 = vmatpush.msra.mxu3 %v1975_v25  ;;  %409 = vmatpush.msra.mxu2 %v1985_v28  ;;  %v2025_v41 = vld [vmem:[#allocation5 + $0x8] sm:$0xff]  ;;  %v2095_v43 = vld [vmem:[#allocation7 + $0x50] sm:$0xff]  ;;  %v2107_v47 = vld [vmem:[#allocation7 + $0x40] sm:$0xff] }
  0x43   : > { %302 = vmatpush.msra.mxu0 %v1953_v18  ;;  %325 = vmatpush.msra.mxu1 %v1955_v19  ;;  %2495 = vst [vmem:[#allocation23_spill] sm:$0xff] %v1989_v30  ;;  %v2097_v44 = vld [vmem:[#allocation7 + $0xd0] sm:$0xff]  ;;  %v2101_v45 = vld [vmem:[#allocation7 + $0x48] sm:$0xff]  ;;  %v2109_v48 = vld [vmem:[#allocation7 + $0xc0] sm:$0xff] }
  0x44   : > { %2496 = vst [vmem:[#allocation24_spill] sm:$0xff] %v1991_v31  ;;  %432 = vmatpush.msra.mxu3 %v1987_v29  ;;  %410 = vmatpush.msra.mxu2 %v2095_v43  ;;  %v2103_v46 = vld [vmem:[#allocation7 + $0xc8] sm:$0xff]  ;;  %v2113_v49 = vld [vmem:[#allocation7 + $0x38] sm:$0xff]  ;;  %v2119_v51 = vld [vmem:[#allocation7 + $0x30] sm:$0xff] }
  0x45   : > { %303 = vmatpush.msra.mxu0 %v1965_v22  ;;  %326 = vmatpush.msra.mxu1 %v1967_v23  ;;  %2497 = vst [vmem:[#allocation25_spill] sm:$0xff] %v1997_v32  ;;  %v2115_v50 = vld [vmem:[#allocation7 + $0xb8] sm:$0xff]  ;;  %v2121_v52 = vld [vmem:[#allocation7 + $0xb0] sm:$0xff]  ;;  %v2125_v53 = vld [vmem:[#allocation7 + $0x28] sm:$0xff] }
  0x46   : > { %2498 = vst [vmem:[#allocation26_spill] sm:$0xff] %v1999_v33  ;;  %433 = vmatpush.msra.mxu3 %v2097_v44  ;;  %411 = vmatpush.msra.mxu2 %v2101_v45  ;;  %v2127_v54 = vld [vmem:[#allocation7 + $0xa8] sm:$0xff]  ;;  %v2131_v55 = vld [vmem:[#allocation7 + $0x20] sm:$0xff]  ;;  %v2137_v57 = vld [vmem:[#allocation7 + $0x18] sm:$0xff] }
  0x47   : > { %304 = vmatpush.msra.mxu0 %v1977_v26  ;;  %327 = vmatpush.msra.mxu1 %v1979_v27  ;;  %2499 = vst [vmem:[#allocation27_spill] sm:$0xff] %v2005_v34  ;;  %v2133_v56 = vld [vmem:[#allocation7 + $0xa0] sm:$0xff]  ;;  %v2139_v58 = vld [vmem:[#allocation7 + $0x98] sm:$0xff]  ;;  %v2143_v59 = vld [vmem:[#allocation7 + $0x10] sm:$0xff] }
  0x48   : > { %2500 = vst [vmem:[#allocation28_spill] sm:$0xff] %v2007_v35  ;;  %434 = vmatpush.msra.mxu3 %v2103_v46  ;;  %412 = vmatpush.msra.mxu2 %v2107_v47  ;;  %v2145_v60 = vld [vmem:[#allocation7 + $0x90] sm:$0xff]  ;;  %v2149_v61 = vld [vmem:[#allocation7 + $0x8] sm:$0xff]  ;;  %v2153_v63 = vld [vmem:[#allocation7] sm:$0xff] }
  0x49   : > { %305 = vmatpush.msra.mxu0 %v1989_v30  ;;  %328 = vmatpush.msra.mxu1 %v1991_v31  ;;  %2501 = vst [vmem:[#allocation29_spill] sm:$0xff] %v2011_v36  ;;  %v2151_v62 = vld [vmem:[#allocation7 + $0x88] sm:$0xff] }
  0x4a   : > { %2502 = vst [vmem:[#allocation30_spill] sm:$0xff] %v2013_v37  ;;  %435 = vmatpush.msra.mxu3 %v2109_v48  ;;  %413 = vmatpush.msra.mxu2 %v2113_v49 }
  0x4b   : > { %306 = vmatpush.msra.mxu0 %v1997_v32  ;;  %329 = vmatpush.msra.mxu1 %v1999_v33  ;;  %2503 = vst [vmem:[#allocation31_spill] sm:$0xff] %v2017_v38 }
  0x4c   : > { %2504 = vst [vmem:[#allocation32_spill] sm:$0xff] %v2019_v39  ;;  %436 = vmatpush.msra.mxu3 %v2115_v50  ;;  %414 = vmatpush.msra.mxu2 %v2119_v51 }
  0x4d   : > { %307 = vmatpush.msra.mxu0 %v2005_v34  ;;  %330 = vmatpush.msra.mxu1 %v2007_v35  ;;  %2505 = vst [vmem:[#allocation33_spill] sm:$0xff] %v2023_v40 }
  0x4e   : > { %2506 = vst [vmem:[#allocation34_spill] sm:$0xff] %v2025_v41  ;;  %437 = vmatpush.msra.mxu3 %v2121_v52  ;;  %415 = vmatpush.msra.mxu2 %v2125_v53 }
  0x4f   : > { %308 = vmatpush.msra.mxu0 %v2011_v36  ;;  %331 = vmatpush.msra.mxu1 %v2013_v37 }
  0x50   : > { %438 = vmatpush.msra.mxu3 %v2127_v54  ;;  %416 = vmatpush.msra.mxu2 %v2131_v55 }
  0x51   : > { %309 = vmatpush.msra.mxu0 %v2017_v38  ;;  %332 = vmatpush.msra.mxu1 %v2019_v39 }
  0x52   : > { %439 = vmatpush.msra.mxu3 %v2133_v56  ;;  %417 = vmatpush.msra.mxu2 %v2137_v57 }
  0x53   : > { %310 = vmatpush.msra.mxu0 %v2023_v40  ;;  %333 = vmatpush.msra.mxu1 %v2025_v41 }
  0x54   : > { %311 = vmatmul.f32.vlgmr.msra.gmra.mxu0 %v1767_v42  ;;  %334 = vmatmul.f32.vlgmr.msra.gmra.mxu1 %v1767_v42 }
  0x55   : > { %489 = vmatpush.msrb.mxu0 %v1905_v0  ;;  %512 = vmatpush.msrb.mxu1 %v1907_v1 }
  0x56   : > { %440 = vmatpush.msra.mxu3 %v2139_v58  ;;  %418 = vmatpush.msra.mxu2 %v2143_v59 }
  0x57   : > { %490 = vmatpush.msrb.mxu0 %v1909_v2  ;;  %513 = vmatpush.msrb.mxu1 %v1913_v3 }
  0x58   : > { %441 = vmatpush.msra.mxu3 %v2145_v60  ;;  %419 = vmatpush.msra.mxu2 %v2149_v61 }
  0x59   : > { %491 = vmatpush.msrb.mxu0 %v1915_v4  ;;  %514 = vmatpush.msrb.mxu1 %v1917_v5 }
  0x5a   : > { %442 = vmatpush.msra.mxu3 %v2151_v62  ;;  %420 = vmatpush.msra.mxu2 %v2153_v63 }
  0x5b   : > { %492 = vmatpush.msrb.mxu0 %v1921_v6  ;;  %515 = vmatpush.msrb.mxu1 %v1923_v7 }
  0x5c   : > { %314 = vmatmul.f32.gmra.mxu0 %v1767_v42  ;;  %337 = vmatmul.f32.gmra.mxu1 %v1767_v42  ;;  %v2157_v42 = vld [vmem:[#allocation7 + $0x80] sm:$0xff] }
  0x5d   : > { %493 = vmatpush.msrb.mxu0 %v1927_v8  ;;  %516 = vmatpush.msrb.mxu1 %v1929_v9  ;;  %2507 = vst [vmem:[#allocation35_spill] sm:$0xff] %v2157_v42 }
  0x5e   : > { %443 = vmatpush.msra.mxu3 %v2157_v42  ;;  %599 = vmatpush.msrb.mxu2 %v1943_v14 }
  0x5f   : > { %494 = vmatpush.msrb.mxu0 %v1933_v10  ;;  %517 = vmatpush.msrb.mxu1 %v1935_v11 }
  0x60   : > { %622 = vmatpush.msrb.mxu3 %v1947_v15  ;;  %600 = vmatpush.msrb.mxu2 %v1949_v16 }
  0x61   : > { %495 = vmatpush.msrb.mxu0 %v1939_v12  ;;  %518 = vmatpush.msrb.mxu1 %v1941_v13 }
  0x62   : > { %623 = vmatpush.msrb.mxu3 %v1951_v17  ;;  %601 = vmatpush.msrb.mxu2 %v1961_v20 }
  0x63   : > { %496 = vmatpush.msrb.mxu0 %v1953_v18  ;;  %519 = vmatpush.msrb.mxu1 %v1955_v19 }
  0x64   : > { %624 = vmatpush.msrb.mxu3 %v1963_v21  ;;  %602 = vmatpush.msrb.mxu2 %v1973_v24 }
  0x65   : > { %497 = vmatpush.msrb.mxu0 %v1965_v22  ;;  %520 = vmatpush.msrb.mxu1 %v1967_v23 }
  0x66   : > { %625 = vmatpush.msrb.mxu3 %v1975_v25  ;;  %603 = vmatpush.msrb.mxu2 %v1985_v28 }
  0x67   : > { %498 = vmatpush.msrb.mxu0 %v1977_v26  ;;  %521 = vmatpush.msrb.mxu1 %v1979_v27 }
  0x68   : > { %626 = vmatpush.msrb.mxu3 %v1987_v29  ;;  %604 = vmatpush.msrb.mxu2 %v2095_v43 }
  0x69   : > { %499 = vmatpush.msrb.mxu0 %v1989_v30  ;;  %522 = vmatpush.msrb.mxu1 %v1991_v31 }
  0x6a   : > { %627 = vmatpush.msrb.mxu3 %v2097_v44  ;;  %605 = vmatpush.msrb.mxu2 %v2101_v45 }
  0x6b   : > { %500 = vmatpush.msrb.mxu0 %v1997_v32  ;;  %523 = vmatpush.msrb.mxu1 %v1999_v33 }
  0x6c   : > { %628 = vmatpush.msrb.mxu3 %v2103_v46  ;;  %606 = vmatpush.msrb.mxu2 %v2107_v47 }
  0x6d   : > { %501 = vmatpush.msrb.mxu0 %v2005_v34  ;;  %524 = vmatpush.msrb.mxu1 %v2007_v35 }
  0x6e   : > { %629 = vmatpush.msrb.mxu3 %v2109_v48  ;;  %607 = vmatpush.msrb.mxu2 %v2113_v49 }
  0x6f   : > { %502 = vmatpush.msrb.mxu0 %v2011_v36  ;;  %525 = vmatpush.msrb.mxu1 %v2013_v37 }
  0x70   : > { %630 = vmatpush.msrb.mxu3 %v2115_v50  ;;  %608 = vmatpush.msrb.mxu2 %v2119_v51 }
  0x71   : > { %503 = vmatpush.msrb.mxu0 %v2017_v38  ;;  %526 = vmatpush.msrb.mxu1 %v2019_v39 }
  0x72   : > { %631 = vmatpush.msrb.mxu3 %v2121_v52  ;;  %609 = vmatpush.msrb.mxu2 %v2125_v53 }
  0x73   : > { %504 = vmatpush.msrb.mxu0 %v2023_v40  ;;  %527 = vmatpush.msrb.mxu1 %v2025_v41 }
  0x74   : > { %632 = vmatpush.msrb.mxu3 %v2127_v54  ;;  %610 = vmatpush.msrb.mxu2 %v2131_v55 }
  0x75   : > { %683 = vmatpush.msra.mxu0 %v1905_v0  ;;  %706 = vmatpush.msra.mxu1 %v1907_v1 }
  0x76   : > { %633 = vmatpush.msrb.mxu3 %v2133_v56  ;;  %611 = vmatpush.msrb.mxu2 %v2137_v57 }
  0x77   : > { %684 = vmatpush.msra.mxu0 %v1909_v2  ;;  %707 = vmatpush.msra.mxu1 %v1913_v3 }
  0x78   : > { %634 = vmatpush.msrb.mxu3 %v2139_v58  ;;  %612 = vmatpush.msrb.mxu2 %v2143_v59 }
  0x79   : > { %685 = vmatpush.msra.mxu0 %v1915_v4  ;;  %708 = vmatpush.msra.mxu1 %v1917_v5 }
  0x7a   : > { %635 = vmatpush.msrb.mxu3 %v2145_v60  ;;  %613 = vmatpush.msrb.mxu2 %v2149_v61 }
  0x7b   : > { %686 = vmatpush.msra.mxu0 %v1921_v6  ;;  %709 = vmatpush.msra.mxu1 %v1923_v7 }
  0x7c   : > { %636 = vmatpush.msrb.mxu3 %v2151_v62  ;;  %614 = vmatpush.msrb.mxu2 %v2153_v63 }
  0x7d   : > { %687 = vmatpush.msra.mxu0 %v1927_v8  ;;  %710 = vmatpush.msra.mxu1 %v1929_v9 }
  0x7e   : > { %637 = vmatpush.msrb.mxu3 %v2157_v42 }
  0x7f   : > { %688 = vmatpush.msra.mxu0 %v1933_v10  ;;  %711 = vmatpush.msra.mxu1 %v1935_v11  ;;  %v2200_v11 = vld [vmem:[%s1895_s7 + $0x8] sm:$0xff] }
  0x81   : > { %689 = vmatpush.msra.mxu0 %v1939_v12  ;;  %712 = vmatpush.msra.mxu1 %v1941_v13 }
  0x83   : > { %690 = vmatpush.msra.mxu0 %v1953_v18  ;;  %713 = vmatpush.msra.mxu1 %v1955_v19 }
  0x85   : > { %691 = vmatpush.msra.mxu0 %v1965_v22  ;;  %714 = vmatpush.msra.mxu1 %v1967_v23 }
  0x87   : > { %692 = vmatpush.msra.mxu0 %v1977_v26  ;;  %715 = vmatpush.msra.mxu1 %v1979_v27 }
  0x89   : > { %693 = vmatpush.msra.mxu0 %v1989_v30  ;;  %716 = vmatpush.msra.mxu1 %v1991_v31 }
  0x8b   : > { %694 = vmatpush.msra.mxu0 %v1997_v32  ;;  %717 = vmatpush.msra.mxu1 %v1999_v33 }
  0x8d   : > { %695 = vmatpush.msra.mxu0 %v2005_v34  ;;  %718 = vmatpush.msra.mxu1 %v2007_v35 }
  0x8f   : > { %696 = vmatpush.msra.mxu0 %v2011_v36  ;;  %719 = vmatpush.msra.mxu1 %v2013_v37 }
  0x91   : > { %697 = vmatpush.msra.mxu0 %v2017_v38  ;;  %720 = vmatpush.msra.mxu1 %v2019_v39 }
  0x93   : > { %698 = vmatpush.msra.mxu0 %v2023_v40  ;;  %721 = vmatpush.msra.mxu1 %v2025_v41 }
  0xd1   : > { %v312_v41 = vpop.f32.mrf.mxu0  ;;  %v335_v40 = vpop.f32.mrf.mxu1 }
  0xd2   : > { %v341_v39 = vmax.f32 %v312_v41, 1e-05  ;;  %v342_v38 = vmax.f32 %v335_v40, 1e-05 }
  0xd4   : > { %1471 = vrcp.f32 %v341_v39  ;;  %v354_v27 = vand.u32 2147483647, %v341_v39  ;;  %v371_v26 = vand.u32 2147483648, %v342_v38  ;;  %v369_v22 = vand.u32 2147483647, %v342_v38 }
  0xd5   : > { %1473 = vrcp.f32 %v342_v38  ;;  %vm350_vm2 = vweird.f32 %v341_v39  ;;  %vm365_vm4 = vweird.f32 %v342_v38 }
  0xd6   : > { %vm355_vm5 = vcmp.eq.f32.partialorder %v354_v27, 8.507059e+37  ;;  %vm370_vm7 = vcmp.eq.f32.partialorder %v369_v22, 8.507059e+37 }
  0xd9   : > { %v315_v41 = vpop.f32.mrf.mxu0  ;;  %v338_v40 = vpop.f32.mrf.mxu1 }
  0xda   : > { %v1472_v37 = vpop.eup %1471  ;;  %v2179_v36 = vmax.f32 %v315_v41, 1e-05  ;;  %v2181_v35 = vmax.f32 %v338_v40, 1e-05  ;;  %v356_v41 = vand.u32 2147483648, %v341_v39 }
  0xdb   : > { %v1474_v34 = vpop.eup %1473  ;;  %v346_v33 = vmul.f32 %v1472_v37, %v341_v39  ;;  %vm351_vm0 = vweird.f32 %v1472_v37 }
  0xdc   : > { %v361_v32 = vmul.f32 %v1474_v34, %v342_v38  ;;  %1475 = vrcp.f32 %v2179_v36  ;;  %vm366_vm1 = vweird.f32 %v1474_v34  ;;  %vm352_vm3 = vmor %vm350_vm2, %vm351_vm0  ;;  %v357_v18 = vor.u32 1.1754944e-38, %v356_v41 }
  0xdd   : > { %1477 = vrcp.f32 %v2181_v35  ;;  %v347_v31 = vsub.f32 1.0, %v346_v33  ;;  %vm367_vm6 = vmor %vm365_vm4, %vm366_vm1  ;;  %v399_v22 = vand.u32 2147483647, %v2181_v35  ;;  %vm380_vm10 = vweird.f32 %v2179_v36 }
  0xde   : > { %v362_v40 = vsub.f32 1.0, %v361_v32  ;;  %v2194_v32 = vld [vmem:[%s1895_s7] sm:$0xff]  ;;  %vm395_vm12 = vweird.f32 %v2181_v35 }
  0xdf   : > { %v348_v30 = vmul.f32 %v1472_v37, %v347_v31  ;;  %vm400_vm15 = vcmp.eq.f32.partialorder %v399_v22, 8.507059e+37 }
  0xe0   : > { %v363_v23 = vmul.f32 %v1474_v34, %v362_v40 }
  0xe1   : > { %v349_v33 = vadd.f32 %v1472_v37, %v348_v30  ;;  %v372_v30 = vor.u32 1.1754944e-38, %v371_v26 }
  0xe2   : > { %v1476_v19 = vpop.eup %1475  ;;  %v364_v13 = vadd.f32 %v1474_v34, %v363_v23 }
  0xe3   : > { %v1478_v31 = vpop.eup %1477  ;;  %v376_v40 = vmul.f32 %v1476_v19, %v2179_v36  ;;  %v353_v12 = vsel %vm352_vm3, %v1472_v37, %v349_v33  ;;  %v386_v37 = vand.u32 2147483648, %v2179_v36  ;;  %vm381_vm8 = vweird.f32 %v1476_v19 }
  0xe4   : > { %v391_v39 = vmul.f32 %v1478_v31, %v2181_v35  ;;  %v358_v10 = vsel %vm355_vm5, %v357_v18, %v353_v12  ;;  %v368_v41 = vsel %vm367_vm6, %v1474_v34, %v364_v13  ;;  %v384_v13 = vand.u32 2147483647, %v2179_v36  ;;  %v2218_v34 = vld [vmem:[%s1895_s7 + $0x10] sm:$0xff]  ;;  %vm382_vm11 = vmor %vm380_vm10, %vm381_vm8 }
  0xe5   : > { %v359_v23 = vmul.f32 %v358_v10, %v2194_v32  ;;  %v373_v38 = vsel %vm370_vm7, %v372_v30, %v368_v41  ;;  %v377_v9 = vsub.f32 1.0, %v376_v40  ;;  %v401_v18 = vand.u32 2147483648, %v2181_v35 }
  0xe6   : > { %v374_v27 = vmul.f32 %v373_v38, %v2200_v11  ;;  %v392_v33 = vsub.f32 1.0, %v391_v39  ;;  %vm396_vm9 = vweird.f32 %v1478_v31  ;;  %vm385_vm13 = vcmp.eq.f32.partialorder %v384_v13, 8.507059e+37  ;;  %v2223_v39 = vld [vmem:[%s1895_s7 + $0x18] sm:$0xff] }
  0xe7   : > { %421 = vmatmul.f32.vlgmr.msra.gmra.mxu2 %v359_v23  ;;  %v378_v12 = vmul.f32 %v1476_v19, %v377_v9  ;;  %v387_v9 = vor.u32 1.1754944e-38, %v386_v37  ;;  %vm397_vm14 = vmor %vm395_vm12, %vm396_vm9  ;;  %v402_v41 = vor.u32 1.1754944e-38, %v401_v18 }
  0xe8   : > { %444 = vmatmul.f32.vlgmr.msra.gmra.mxu3 %v374_v27  ;;  %v393_v10 = vmul.f32 %v1478_v31, %v392_v33  ;;  %793 = vmatpush.msra.mxu2 %v1943_v14 }
  0xe9   : > { %v379_v26 = vadd.f32 %v1476_v19, %v378_v12  ;;  %816 = vmatpush.msra.mxu3 %v1947_v15 }
  0xea   : > { %v394_v40 = vadd.f32 %v1478_v31, %v393_v10  ;;  %794 = vmatpush.msra.mxu2 %v1949_v16 }
  0xeb   : > { %v383_v30 = vsel %vm382_vm11, %v1476_v19, %v379_v26  ;;  %817 = vmatpush.msra.mxu3 %v1951_v17 }
  0xec   : > { %v388_v36 = vsel %vm385_vm13, %v387_v9, %v383_v30  ;;  %v398_v23 = vsel %vm397_vm14, %v1478_v31, %v394_v40  ;;  %795 = vmatpush.msra.mxu2 %v1961_v20 }
  0xed   : > { %v389_v38 = vmul.f32 %v388_v36, %v2218_v34  ;;  %v403_v27 = vsel %vm400_vm15, %v402_v41, %v398_v23  ;;  %818 = vmatpush.msra.mxu3 %v1963_v21 }
  0xee   : > { %v404_v19 = vmul.f32 %v403_v27, %v2223_v39  ;;  %796 = vmatpush.msra.mxu2 %v1973_v24 }
  0xef   : > { %424 = vmatmul.f32.gmra.mxu2 %v389_v38  ;;  %819 = vmatpush.msra.mxu3 %v1975_v25 }
  0xf0   : > { %447 = vmatmul.f32.gmra.mxu3 %v404_v19  ;;  %797 = vmatpush.msra.mxu2 %v1985_v28 }
  0xf1   : > { %820 = vmatpush.msra.mxu3 %v1987_v29 }
  0xf2   : > { %798 = vmatpush.msra.mxu2 %v2095_v43 }
  0xf3   : > { %821 = vmatpush.msra.mxu3 %v2097_v44 }
  0xf4   : > { %799 = vmatpush.msra.mxu2 %v2101_v45 }
  0xf5   : > { %822 = vmatpush.msra.mxu3 %v2103_v46 }
  0xf6   : > { %800 = vmatpush.msra.mxu2 %v2107_v47 }
  0xf7   : > { %823 = vmatpush.msra.mxu3 %v2109_v48 }
  0xf8   : > { %801 = vmatpush.msra.mxu2 %v2113_v49 }
  0xf9   : > { %824 = vmatpush.msra.mxu3 %v2115_v50 }
  0xfa   : > { %802 = vmatpush.msra.mxu2 %v2119_v51 }
  0xfb   : > { %825 = vmatpush.msra.mxu3 %v2121_v52 }
  0xfc   : > { %803 = vmatpush.msra.mxu2 %v2125_v53 }
  0xfd   : > { %826 = vmatpush.msra.mxu3 %v2127_v54 }
  0xfe   : > { %804 = vmatpush.msra.mxu2 %v2131_v55 }
  0xff   : > { %827 = vmatpush.msra.mxu3 %v2133_v56 }
 0x100   : > { %805 = vmatpush.msra.mxu2 %v2137_v57 }
 0x101   : > { %828 = vmatpush.msra.mxu3 %v2139_v58 }
 0x102   : > { %806 = vmatpush.msra.mxu2 %v2143_v59 }
 0x103   : > { %829 = vmatpush.msra.mxu3 %v2145_v60 }
 0x104   : > { %807 = vmatpush.msra.mxu2 %v2149_v61 }
 0x105   : > { %830 = vmatpush.msra.mxu3 %v2151_v62 }
 0x106   : > { %808 = vmatpush.msra.mxu2 %v2153_v63 }
 0x107   : > { %831 = vmatpush.msra.mxu3 %v2157_v42 }
 0x16a   : > { %v422_v35 = vpop.f32.mrf.mxu2 }
 0x16b   : > { %v445_v31 = vpop.f32.mrf.mxu3 }
 0x16c   : > { %v446_v37 = vadd.f32 %v445_v31, %v422_v35 }
 0x16e   : > { %v451_v33 = vmul.f32 0.0078125, %v446_v37 }
 0x170   : > { %v453_v12 = vmax.f32 %v451_v33, 1e-05 }
 0x172   : > { %455 = vadd.xlane.f32.xlu0 %v453_v12  ;;  %v425_v13 = vpop.f32.mrf.mxu2 }
 0x173   : > { %v448_v18 = vpop.f32.mrf.mxu3 }
 0x174   : > { %v449_v10 = vadd.f32 %v448_v18, %v425_v13 }
 0x176   : > { %v452_v22 = vmul.f32 0.0078125, %v449_v10 }
 0x178   : > { %v454_v26 = vmax.f32 %v452_v22, 1e-05 }
 0x17a   : > { %457 = vadd.xlane.f32.xlu0 %v454_v26 }
 0x1e5   : > { %v456_v9 = vpop.xlane.xlu0 %455 }
 0x1e6   : > { %1479 = vrcp.f32 %v456_v9  ;;  %v470_v23 = vand.u32 2147483648, %v456_v9  ;;  %v468_v27 = vand.u32 2147483647, %v456_v9  ;;  %vm464_vm1 = vweird.f32 %v456_v9 }
 0x1e8   : > { %v471_v31 = vor.u32 1.1754944e-38, %v470_v23  ;;  %vm469_vm3 = vcmp.eq.f32.partialorder %v468_v27, 8.507059e+37  ;;  %v2521_v27 = vld [vmem:[#allocation25_spill] sm:$0xff] }
 0x1ec   : > { %v1480_v40 = vpop.eup %1479 }
 0x1ed   : > { %v460_v30 = vmul.f32 %v1480_v40, %v456_v9  ;;  %v458_v41 = vpop.xlane.xlu0 %457  ;;  %vm465_vm0 = vweird.f32 %v1480_v40 }
 0x1ee   : > { %1481 = vrcp.f32 %v458_v41  ;;  %vm466_vm2 = vmor %vm464_vm1, %vm465_vm0  ;;  %v484_v22 = vand.u32 2147483648, %v458_v41  ;;  %vm478_vm5 = vweird.f32 %v458_v41 }
 0x1ef   : > { %v461_v36 = vsub.f32 1.0, %v460_v30  ;;  %v482_v30 = vand.u32 2147483647, %v458_v41 }
 0x1f1   : > { %v462_v38 = vmul.f32 %v1480_v40, %v461_v36  ;;  %vm483_vm7 = vcmp.eq.f32.partialorder %v482_v30, 8.507059e+37  ;;  %v2530_v30 = vld [vmem:[#allocation34_spill] sm:$0xff] }
 0x1f3   : > { %v463_v19 = vadd.f32 %v1480_v40, %v462_v38  ;;  %v2520_v38 = vld [vmem:[#allocation24_spill] sm:$0xff] }
 0x1f4   : > { %v1482_v35 = vpop.eup %1481 }
 0x1f5   : > { %v474_v37 = vmul.f32 %v1482_v35, %v458_v41  ;;  %v467_v33 = vsel %vm466_vm2, %v1480_v40, %v463_v19  ;;  %vm479_vm4 = vweird.f32 %v1482_v35  ;;  %v485_v40 = vor.u32 1.1754944e-38, %v484_v22  ;;  %v2519_v41 = vld [vmem:[#allocation23_spill] sm:$0xff]  ;;  %v2522_v19 = vld [vmem:[#allocation26_spill] sm:$0xff]  ;;  %v2529_v22 = vld [vmem:[#allocation33_spill] sm:$0xff] }
 0x1f6   : > { %v472_v13 = vsel %vm469_vm3, %v471_v31, %v467_v33  ;;  %vm480_vm6 = vmor %vm478_vm5, %vm479_vm4  ;;  %v2524_v31 = vld [vmem:[#allocation28_spill] sm:$0xff]  ;;  %v2526_v33 = vld [vmem:[#allocation30_spill] sm:$0xff] }
 0x1f7   : > { %v475_v18 = vsub.f32 1.0, %v474_v37  ;;  %v2257_v10 = vmul.f32 %v472_v13, %v453_v12  ;;  %v2525_v37 = vld [vmem:[#allocation29_spill] sm:$0xff]  ;;  %v2527_v13 = vld [vmem:[#allocation31_spill] sm:$0xff] }
 0x1f9   : > { %v476_v42 = vmul.f32 %v1482_v35, %v475_v18  ;;  %505 = vmatmul.f32.vlgmr.msrb.gmra.mxu0 %v2257_v10  ;;  %528 = vmatmul.f32.vlgmr.msrb.gmra.mxu1 %v2257_v10  ;;  %v2528_v18 = vld [vmem:[#allocation32_spill] sm:$0xff] }
 0x1fa   : > { %877 = vmatpush.msrb.mxu0 %v1905_v0  ;;  %900 = vmatpush.msrb.mxu1 %v1907_v1  ;;  %v2508_v0 = vld [vmem:[#allocation12_spill] sm:$0xff]  ;;  %v2509_v1 = vld [vmem:[#allocation13_spill] sm:$0xff] }
 0x1fb   : > { %v477_v9 = vadd.f32 %v1482_v35, %v476_v42  ;;  %v2516_v42 = vld [vmem:[#allocation20_spill] sm:$0xff] }
 0x1fc   : > { %878 = vmatpush.msrb.mxu0 %v1909_v2  ;;  %901 = vmatpush.msrb.mxu1 %v1913_v3  ;;  %v2510_v2 = vld [vmem:[#allocation14_spill] sm:$0xff]  ;;  %v2511_v3 = vld [vmem:[#allocation15_spill] sm:$0xff] }
 0x1fd   : > { %v481_v12 = vsel %vm480_vm6, %v1482_v35, %v477_v9  ;;  %v2523_v35 = vld [vmem:[#allocation27_spill] sm:$0xff] }
 0x1fe   : > { %v486_v36 = vsel %vm483_vm7, %v485_v40, %v481_v12  ;;  %879 = vmatpush.msrb.mxu0 %v1915_v4  ;;  %902 = vmatpush.msrb.mxu1 %v1917_v5  ;;  %v2512_v4 = vld [vmem:[#allocation16_spill] sm:$0xff]  ;;  %v2513_v5 = vld [vmem:[#allocation17_spill] sm:$0xff] }
 0x1ff   : > { %v2267_v23 = vmul.f32 %v486_v36, %v454_v26  ;;  %v2517_v26 = vld [vmem:[#allocation21_spill] sm:$0xff] }
 0x200   : > { %880 = vmatpush.msrb.mxu0 %v1921_v6  ;;  %903 = vmatpush.msrb.mxu1 %v1923_v7  ;;  %v2514_v6 = vld [vmem:[#allocation18_spill] sm:$0xff]  ;;  %v2515_v7 = vld [vmem:[#allocation19_spill] sm:$0xff] }
 0x201   : > { %508 = vmatmul.f32.gmra.mxu0 %v2267_v23  ;;  %531 = vmatmul.f32.gmra.mxu1 %v2267_v23 }
 0x202   : > { %881 = vmatpush.msrb.mxu0 %v1927_v8  ;;  %904 = vmatpush.msrb.mxu1 %v2508_v0  ;;  %v2518_v8 = vld [vmem:[#allocation22_spill] sm:$0xff] }
 0x204   : > { %882 = vmatpush.msrb.mxu0 %v2509_v1  ;;  %905 = vmatpush.msrb.mxu1 %v2510_v2 }
 0x206   : > { %883 = vmatpush.msrb.mxu0 %v2511_v3  ;;  %906 = vmatpush.msrb.mxu1 %v2512_v4 }
 0x208   : > { %884 = vmatpush.msrb.mxu0 %v2513_v5  ;;  %907 = vmatpush.msrb.mxu1 %v2514_v6 }
 0x20a   : > { %885 = vmatpush.msrb.mxu0 %v2515_v7  ;;  %908 = vmatpush.msrb.mxu1 %v2516_v42 }
 0x20c   : > { %886 = vmatpush.msrb.mxu0 %v2517_v26  ;;  %909 = vmatpush.msrb.mxu1 %v2518_v8 }
 0x20e   : > { %887 = vmatpush.msrb.mxu0 %v2519_v41  ;;  %910 = vmatpush.msrb.mxu1 %v2520_v38 }
 0x210   : > { %888 = vmatpush.msrb.mxu0 %v2521_v27  ;;  %911 = vmatpush.msrb.mxu1 %v2522_v19 }
 0x212   : > { %889 = vmatpush.msrb.mxu0 %v2523_v35  ;;  %912 = vmatpush.msrb.mxu1 %v2524_v31 }
 0x214   : > { %890 = vmatpush.msrb.mxu0 %v2525_v37  ;;  %913 = vmatpush.msrb.mxu1 %v2526_v33 }
 0x216   : > { %891 = vmatpush.msrb.mxu0 %v2527_v13  ;;  %914 = vmatpush.msrb.mxu1 %v2528_v18 }
 0x218   : > { %892 = vmatpush.msrb.mxu0 %v2529_v22  ;;  %915 = vmatpush.msrb.mxu1 %v2530_v30 }
 0x276   : > { %v506_v9 = vpop.f32.mrf.mxu0  ;;  %v529_v40 = vpop.f32.mrf.mxu1 }
 0x277   : > { %v535_v12 = vmax.f32 %v506_v9, 1e-05  ;;  %v536_v36 = vmax.f32 %v529_v40, 1e-05 }
 0x279   : > { %1483 = vrcp.f32 %v535_v12  ;;  %v550_v8 = vand.u32 2147483648, %v535_v12  ;;  %v548_v38 = vand.u32 2147483647, %v535_v12  ;;  %v565_v27 = vand.u32 2147483648, %v536_v36 }
 0x27a   : > { %1485 = vrcp.f32 %v536_v36  ;;  %v563_v35 = vand.u32 2147483647, %v536_v36  ;;  %vm544_vm10 = vweird.f32 %v535_v12  ;;  %vm559_vm12 = vweird.f32 %v536_v36 }
 0x27b   : > { %v551_v33 = vor.u32 1.1754944e-38, %v550_v8  ;;  %vm549_vm13 = vcmp.eq.f32.partialorder %v548_v38, 8.507059e+37  ;;  %v566_v9 = vor.u32 1.1754944e-38, %v565_v27 }
 0x27c   : > { %vm564_vm15 = vcmp.eq.f32.partialorder %v563_v35, 8.507059e+37 }
 0x27e   : > { %v509_v0 = vpop.f32.mrf.mxu0  ;;  %v532_v1 = vpop.f32.mrf.mxu1 }
 0x27f   : > { %v1484_v2 = vpop.eup %1483  ;;  %v537_v3 = vmax.f32 %v509_v0, 1e-05  ;;  %v2297_v4 = vmax.f32 %v532_v1, 1e-05 }
 0x280   : > { %v1486_v5 = vpop.eup %1485  ;;  %v540_v6 = vmul.f32 %v1484_v2, %v535_v12  ;;  %vm545_vm8 = vweird.f32 %v1484_v2 }
 0x281   : > { %v555_v7 = vmul.f32 %v1486_v5, %v536_v36  ;;  %1487 = vrcp.f32 %v537_v3  ;;  %vm560_vm9 = vweird.f32 %v1486_v5  ;;  %vm546_vm11 = vmor %vm544_vm10, %vm545_vm8  ;;  %vm574_vm2 = vweird.f32 %v537_v3 }
 0x282   : > { %v541_v42 = vsub.f32 1.0, %v540_v6  ;;  %1489 = vrcp.f32 %v2297_v4  ;;  %vm561_vm14 = vmor %vm559_vm12, %vm560_vm9  ;;  %vm589_vm4 = vweird.f32 %v2297_v4 }
 0x283   : > { %v556_v26 = vsub.f32 1.0, %v555_v7 }
 0x284   : > { %v542_v41 = vmul.f32 %v1484_v2, %v541_v42 }
 0x285   : > { %v557_v19 = vmul.f32 %v1486_v5, %v556_v26  ;;  %v580_v26 = vand.u32 2147483648, %v537_v3 }
 0x286   : > { %v543_v31 = vadd.f32 %v1484_v2, %v542_v41  ;;  %v595_v41 = vand.u32 2147483648, %v2297_v4 }
 0x287   : > { %v1488_v37 = vpop.eup %1487  ;;  %v558_v13 = vadd.f32 %v1486_v5, %v557_v19  ;;  %v581_v19 = vor.u32 1.1754944e-38, %v580_v26  ;;  %v1539_v26 = vld [vmem:[#allocation5 + $0xb0] sm:$0xff] }
 0x288   : > { %v1490_v18 = vpop.eup %1489  ;;  %v570_v22 = vmul.f32 %v1488_v37, %v537_v3  ;;  %v547_v30 = vsel %vm546_vm11, %v1484_v2, %v543_v31  ;;  %vm575_vm0 = vweird.f32 %v1488_v37  ;;  %v578_v2 = vand.u32 2147483647, %v537_v3 }
 0x289   : > { %v585_v40 = vmul.f32 %v1490_v18, %v2297_v4  ;;  %v552_v0 = vsel %vm549_vm13, %v551_v33, %v547_v30  ;;  %v562_v1 = vsel %vm561_vm14, %v1486_v5, %v558_v13  ;;  %vm590_vm1 = vweird.f32 %v1490_v18  ;;  %vm576_vm3 = vmor %vm574_vm2, %vm575_vm0  ;;  %v1533_v30 = vld [vmem:[#allocation5 + $0xe0] sm:$0xff] }
 0x28a   : > { %v553_v6 = vmul.f32 %v552_v0, %v2194_v32  ;;  %v567_v7 = vsel %vm564_vm15, %v566_v9, %v562_v1  ;;  %v571_v12 = vsub.f32 1.0, %v570_v22  ;;  %v593_v5 = vand.u32 2147483647, %v2297_v4  ;;  %vm591_vm6 = vmor %vm589_vm4, %vm590_vm1  ;;  %v1532_v4 = vld [vmem:[#allocation5 + $0xf8] sm:$0xff]  ;;  %v1534_v9 = vld [vmem:[#allocation5 + $0xe8] sm:$0xff] }
 0x28b   : > { %v568_v42 = vmul.f32 %v567_v7, %v2200_v11  ;;  %v586_v8 = vsub.f32 1.0, %v585_v40  ;;  %vm579_vm5 = vcmp.eq.f32.partialorder %v578_v2, 8.507059e+37  ;;  %v596_v33 = vor.u32 1.1754944e-38, %v595_v41  ;;  %v1535_v1 = vld [vmem:[#allocation5 + $0xd0] sm:$0xff]  ;;  %v1542_v2 = vld [vmem:[#allocation5 + $0xa8] sm:$0xff] }
 0x28c   : > { %615 = vmatmul.f32.vlgmr.msrb.gmra.mxu2 %v553_v6  ;;  %v572_v36 = vmul.f32 %v1488_v37, %v571_v12  ;;  %vm594_vm7 = vcmp.eq.f32.partialorder %v593_v5, 8.507059e+37  ;;  %v1536_v6 = vld [vmem:[#allocation5 + $0xd8] sm:$0xff]  ;;  %v1537_v12 = vld [vmem:[#allocation5 + $0xc0] sm:$0xff]  ;;  %v1543_v41 = vld [vmem:[#allocation5 + $0x90] sm:$0xff] }
 0x28d   : > { %638 = vmatmul.f32.vlgmr.msrb.gmra.mxu3 %v568_v42  ;;  %v587_v38 = vmul.f32 %v1490_v18, %v586_v8  ;;  %987 = vmatpush.msrb.mxu2 %v1943_v14  ;;  %v1538_v42 = vld [vmem:[#allocation5 + $0xc8] sm:$0xff]  ;;  %v1540_v8 = vld [vmem:[#allocation5 + $0xb8] sm:$0xff]  ;;  %v1545_v5 = vld [vmem:[#allocation5 + $0x80] sm:$0xff] }
 0x28e   : > { %v573_v27 = vadd.f32 %v1488_v37, %v572_v36  ;;  %1010 = vmatpush.msrb.mxu3 %v1947_v15  ;;  %v1541_v36 = vld [vmem:[#allocation5 + $0xa0] sm:$0xff] }
 0x28f   : > { %v588_v35 = vadd.f32 %v1490_v18, %v587_v38  ;;  %988 = vmatpush.msrb.mxu2 %v1949_v16  ;;  %v2531_v16 = vld [vmem:[#allocation35_spill] sm:$0xff] }
 0x290   : > { %v577_v31 = vsel %vm576_vm3, %v1488_v37, %v573_v27  ;;  %1011 = vmatpush.msrb.mxu3 %v1951_v17  ;;  %v1544_v38 = vld [vmem:[#allocation5 + $0x98] sm:$0xff]  ;;  %v1546_v27 = vld [vmem:[#allocation5 + $0x88] sm:$0xff] }
 0x291   : > { %v582_v13 = vsel %vm579_vm5, %v581_v19, %v577_v31  ;;  %v592_v22 = vsel %vm591_vm6, %v1490_v18, %v588_v35  ;;  %989 = vmatpush.msrb.mxu2 %v1961_v20  ;;  %v1547_v19 = vld [vmem:[#allocation5 + $0x70] sm:$0xff]  ;;  %v1548_v35 = vld [vmem:[#allocation5 + $0x78] sm:$0xff]  ;;  %v1549_v31 = vld [vmem:[#allocation5 + $0x60] sm:$0xff] }
 0x292   : > { %v583_v14 = vmul.f32 %v582_v13, %v2218_v34  ;;  %v597_v15 = vsel %vm594_vm7, %v596_v33, %v592_v22  ;;  %1012 = vmatpush.msrb.mxu3 %v1963_v21  ;;  %v1550_v33 = vld [vmem:[#allocation5 + $0x68] sm:$0xff]  ;;  %v1551_v13 = vld [vmem:[#allocation5 + $0x50] sm:$0xff]  ;;  %v1552_v22 = vld [vmem:[#allocation5 + $0x58] sm:$0xff] }
 0x293   : > { %v598_v3 = vmul.f32 %v597_v15, %v2223_v39  ;;  %990 = vmatpush.msrb.mxu2 %v1973_v24  ;;  %v1554_v15 = vld [vmem:[#allocation5 + $0x48] sm:$0xff] }
 0x294   : > { %618 = vmatmul.f32.gmra.mxu2 %v583_v14  ;;  %1013 = vmatpush.msrb.mxu3 %v1975_v25  ;;  %v1553_v14 = vld [vmem:[#allocation5 + $0x40] sm:$0xff] }
 0x295   : > { %641 = vmatmul.f32.gmra.mxu3 %v598_v3  ;;  %991 = vmatpush.msrb.mxu2 %v1985_v28  ;;  %v1555_v3 = vld [vmem:[#allocation5 + $0x30] sm:$0xff] }
 0x296   : > { %1014 = vmatpush.msrb.mxu3 %v1987_v29 }
 0x297   : > { %992 = vmatpush.msrb.mxu2 %v2095_v43 }
 0x298   : > { %1015 = vmatpush.msrb.mxu3 %v2097_v44 }
 0x299   : > { %993 = vmatpush.msrb.mxu2 %v2101_v45 }
 0x29a   : > { %1016 = vmatpush.msrb.mxu3 %v2103_v46 }
 0x29b   : > { %994 = vmatpush.msrb.mxu2 %v2107_v47 }
 0x29c   : > { %1017 = vmatpush.msrb.mxu3 %v2109_v48 }
 0x29d   : > { %995 = vmatpush.msrb.mxu2 %v2113_v49 }
 0x29e   : > { %1018 = vmatpush.msrb.mxu3 %v2115_v50 }
 0x29f   : > { %996 = vmatpush.msrb.mxu2 %v2119_v51 }
 0x2a0   : > { %1019 = vmatpush.msrb.mxu3 %v2121_v52 }
 0x2a1   : > { %997 = vmatpush.msrb.mxu2 %v2125_v53 }
 0x2a2   : > { %1020 = vmatpush.msrb.mxu3 %v2127_v54 }
 0x2a3   : > { %998 = vmatpush.msrb.mxu2 %v2131_v55 }
 0x2a4   : > { %1021 = vmatpush.msrb.mxu3 %v2133_v56 }
 0x2a5   : > { %999 = vmatpush.msrb.mxu2 %v2137_v57 }
 0x2a6   : > { %1022 = vmatpush.msrb.mxu3 %v2139_v58 }
 0x2a7   : > { %1000 = vmatpush.msrb.mxu2 %v2143_v59 }
 0x2a8   : > { %1023 = vmatpush.msrb.mxu3 %v2145_v60 }
 0x2a9   : > { %1001 = vmatpush.msrb.mxu2 %v2149_v61 }
 0x2aa   : > { %1024 = vmatpush.msrb.mxu3 %v2151_v62 }
 0x2ab   : > { %1002 = vmatpush.msrb.mxu2 %v2153_v63 }
 0x2ac   : > { %1025 = vmatpush.msrb.mxu3 %v2531_v16  ;;  %v1556_v16 = vld [vmem:[#allocation5 + $0x38] sm:$0xff] }
 0x30f   : > { %v616_v17 = vpop.f32.mrf.mxu2 }
 0x310   : > { %v639_v20 = vpop.f32.mrf.mxu3 }
 0x311   : > { %v640_v21 = vadd.f32 %v639_v20, %v616_v17  ;;  %v1557_v17 = vld [vmem:[#allocation5 + $0x20] sm:$0xff]  ;;  %v1558_v20 = vld [vmem:[#allocation5 + $0x28] sm:$0xff] }
 0x313   : > { %v645_v24 = vmul.f32 %v640_v21, %v2257_v10  ;;  %v1559_v21 = vld [vmem:[#allocation5 + $0x10] sm:$0xff] }
 0x315   : > { %v647_v25 = vmax.f32 %v645_v24, 1e-05  ;;  %v1560_v24 = vld [vmem:[#allocation5 + $0x18] sm:$0xff] }
 0x317   : > { %649 = vadd.xlane.f32.xlu1 %v647_v25  ;;  %v619_v28 = vpop.f32.mrf.mxu2 }
 0x318   : > { %v642_v29 = vpop.f32.mrf.mxu3 }
 0x319   : > { %v643_v43 = vadd.f32 %v642_v29, %v619_v28  ;;  %v1562_v28 = vld [vmem:[#allocation5 + $0x8] sm:$0xff] }
 0x31b   : > { %v646_v44 = vmul.f32 %v643_v43, %v2267_v23  ;;  %v1531_v23 = vld [vmem:[#allocation5 + $0xf0] sm:$0xff] }
 0x31d   : > { %v648_v45 = vmax.f32 %v646_v44, 1e-05 }
 0x31f   : > { %651 = vadd.xlane.f32.xlu1 %v648_v45 }
 0x38a   : > { %v650_v46 = vpop.xlane.xlu1 %649 }
 0x38b   : > { %1491 = vrcp.f32 %v650_v46  ;;  %v664_v51 = vand.u32 2147483648, %v650_v46  ;;  %v662_v53 = vand.u32 2147483647, %v650_v46  ;;  %vm658_vm9 = vweird.f32 %v650_v46 }
 0x38d   : > { %v665_v56 = vor.u32 1.1754944e-38, %v664_v51  ;;  %vm663_vm11 = vcmp.eq.f32.partialorder %v662_v53, 8.507059e+37 }
 0x391   : > { %v1492_v47 = vpop.eup %1491 }
 0x392   : > { %v654_v48 = vmul.f32 %v1492_v47, %v650_v46  ;;  %v652_v49 = vpop.xlane.xlu1 %651  ;;  %vm659_vm8 = vweird.f32 %v1492_v47 }
 0x393   : > { %1493 = vrcp.f32 %v652_v49  ;;  %vm660_vm10 = vmor %vm658_vm9, %vm659_vm8  ;;  %v678_v62 = vand.u32 2147483648, %v652_v49  ;;  %v676_v10 = vand.u32 2147483647, %v652_v49  ;;  %vm672_vm13 = vweird.f32 %v652_v49 }
 0x394   : > { %v655_v50 = vsub.f32 1.0, %v654_v48 }
 0x395   : > { %v679_v18 = vor.u32 1.1754944e-38, %v678_v62  ;;  %vm677_vm15 = vcmp.eq.f32.partialorder %v676_v10, 8.507059e+37 }
 0x396   : > { %v656_v52 = vmul.f32 %v1492_v47, %v655_v50 }
 0x398   : > { %v657_v54 = vadd.f32 %v1492_v47, %v656_v52 }
 0x399   : > { %v1494_v55 = vpop.eup %1493 }
 0x39a   : > { %v668_v57 = vmul.f32 %v1494_v55, %v652_v49  ;;  %v661_v58 = vsel %vm660_vm10, %v1492_v47, %v657_v54  ;;  %vm673_vm12 = vweird.f32 %v1494_v55 }
 0x39b   : > { %v666_v59 = vsel %vm663_vm11, %v665_v56, %v661_v58  ;;  %vm674_vm14 = vmor %vm672_vm13, %vm673_vm12 }
 0x39c   : > { %v669_v60 = vsub.f32 1.0, %v668_v57  ;;  %v2342_v61 = vmul.f32 %v666_v59, %v647_v25  ;;  %v1561_v25 = vld [vmem:[#allocation5] sm:$0xff] }
 0x39e   : > { %v670_v63 = vmul.f32 %v1494_v55, %v669_v60  ;;  %699 = vmatmul.f32.vlgmr.msra.gmra.mxu0 %v2342_v61  ;;  %722 = vmatmul.f32.vlgmr.msra.gmra.mxu1 %v2342_v61 }
 0x39f   : > { %1071 = vmatpush.msra.mxu0 %v1531_v23  ;;  %1094 = vmatpush.msra.mxu1 %v1532_v4 }
 0x3a0   : > { %v671_v37 = vadd.f32 %v1494_v55, %v670_v63 }
 0x3a1   : > { %1072 = vmatpush.msra.mxu0 %v1533_v30  ;;  %1095 = vmatpush.msra.mxu1 %v1534_v9 }
 0x3a2   : > { %v675_v40 = vsel %vm674_vm14, %v1494_v55, %v671_v37 }
 0x3a3   : > { %v680_v0 = vsel %vm677_vm15, %v679_v18, %v675_v40  ;;  %1073 = vmatpush.msra.mxu0 %v1535_v1  ;;  %1096 = vmatpush.msra.mxu1 %v1536_v6 }
 0x3a4   : > { %v2346_v7 = vmul.f32 %v680_v0, %v648_v45 }
 0x3a5   : > { %1074 = vmatpush.msra.mxu0 %v1537_v12  ;;  %1097 = vmatpush.msra.mxu1 %v1538_v42 }
 0x3a6   : > { %702 = vmatmul.f32.gmra.mxu0 %v2346_v7  ;;  %725 = vmatmul.f32.gmra.mxu1 %v2346_v7 }
 0x3a7   : > { %1075 = vmatpush.msra.mxu0 %v1539_v26  ;;  %1098 = vmatpush.msra.mxu1 %v1540_v8 }
 0x3a9   : > { %1076 = vmatpush.msra.mxu0 %v1541_v36  ;;  %1099 = vmatpush.msra.mxu1 %v1542_v2 }
 0x3ab   : > { %1077 = vmatpush.msra.mxu0 %v1543_v41  ;;  %1100 = vmatpush.msra.mxu1 %v1544_v38 }
 0x3ad   : > { %1078 = vmatpush.msra.mxu0 %v1545_v5  ;;  %1101 = vmatpush.msra.mxu1 %v1546_v27 }
 0x3af   : > { %1079 = vmatpush.msra.mxu0 %v1547_v19  ;;  %1102 = vmatpush.msra.mxu1 %v1548_v35 }
 0x3b1   : > { %1080 = vmatpush.msra.mxu0 %v1549_v31  ;;  %1103 = vmatpush.msra.mxu1 %v1550_v33  ;;  %v1565_v33 = vld [vmem:[#allocation7 + $0x70] sm:$0xff] }
 0x3b3   : > { %1081 = vmatpush.msra.mxu0 %v1551_v13  ;;  %1104 = vmatpush.msra.mxu1 %v1552_v22 }
 0x3b5   : > { %1082 = vmatpush.msra.mxu0 %v1553_v14  ;;  %1105 = vmatpush.msra.mxu1 %v1554_v15  ;;  %v1566_v14 = vld [vmem:[#allocation7 + $0xf0] sm:$0xff] }
 0x3b7   : > { %1083 = vmatpush.msra.mxu0 %v1555_v3  ;;  %1106 = vmatpush.msra.mxu1 %v1556_v16  ;;  %v1567_v16 = vld [vmem:[#allocation7 + $0x68] sm:$0xff] }
 0x3b9   : > { %1084 = vmatpush.msra.mxu0 %v1557_v17  ;;  %1107 = vmatpush.msra.mxu1 %v1558_v20 }
 0x3bb   : > { %1085 = vmatpush.msra.mxu0 %v1559_v21  ;;  %1108 = vmatpush.msra.mxu1 %v1560_v24  ;;  %v1568_v21 = vld [vmem:[#allocation7 + $0xe8] sm:$0xff] }
 0x3bd   : > { %1086 = vmatpush.msra.mxu0 %v1561_v25  ;;  %1109 = vmatpush.msra.mxu1 %v1562_v28  ;;  %v1569_v25 = vld [vmem:[#allocation7 + $0x60] sm:$0xff] }
 0x3be   : > { %v1570_v28 = vld [vmem:[#allocation7 + $0xe0] sm:$0xff] }
 0x41b   : > { %v700_v29 = vpop.f32.mrf.mxu0  ;;  %v723_v43 = vpop.f32.mrf.mxu1 }
 0x41c   : > { %v729_v44 = vmax.f32 %v700_v29, 1e-05  ;;  %v730_v45 = vmax.f32 %v723_v43, 1e-05  ;;  %v1571_v29 = vld [vmem:[#allocation7 + $0x58] sm:$0xff] }
 0x41d   : > { %v1572_v43 = vld [vmem:[#allocation7 + $0xd8] sm:$0xff] }
 0x41e   : > { %1495 = vrcp.f32 %v729_v44  ;;  %v744_v55 = vand.u32 2147483648, %v729_v44  ;;  %v759_v58 = vand.u32 2147483648, %v730_v45  ;;  %v742_v59 = vand.u32 2147483647, %v729_v44 }
 0x41f   : > { %1497 = vrcp.f32 %v730_v45  ;;  %v757_v62 = vand.u32 2147483647, %v730_v45  ;;  %vm738_vm2 = vweird.f32 %v729_v44  ;;  %vm753_vm3 = vweird.f32 %v730_v45 }
 0x420   : > { %v745_v23 = vor.u32 1.1754944e-38, %v744_v55  ;;  %vm743_vm5 = vcmp.eq.f32.partialorder %v742_v59, 8.507059e+37  ;;  %v760_v9 = vor.u32 1.1754944e-38, %v759_v58  ;;  %v1586_v55 = vld [vmem:[#allocation7 + $0xa0] sm:$0xff]  ;;  %v1589_v58 = vld [vmem:[#allocation7 + $0x10] sm:$0xff] }
 0x421   : > { %vm758_vm7 = vcmp.eq.f32.partialorder %v757_v62, 8.507059e+37  ;;  %v1590_v59 = vld [vmem:[#allocation7 + $0x90] sm:$0xff]  ;;  %v1592_v62 = vld [vmem:[#allocation7 + $0x88] sm:$0xff] }
 0x423   : > { %v703_v46 = vpop.f32.mrf.mxu0  ;;  %v726_v47 = vpop.f32.mrf.mxu1 }
 0x424   : > { %v1496_v48 = vpop.eup %1495  ;;  %v2350_v49 = vmax.f32 %v703_v46, 1e-05  ;;  %v2352_v50 = vmax.f32 %v726_v47, 1e-05  ;;  %v1576_v46 = vld [vmem:[#allocation7 + $0xc8] sm:$0xff]  ;;  %v1577_v47 = vld [vmem:[#allocation7 + $0x40] sm:$0xff] }
 0x425   : > { %v1498_v51 = vpop.eup %1497  ;;  %v734_v52 = vmul.f32 %v1496_v48, %v729_v44  ;;  %vm739_vm0 = vweird.f32 %v1496_v48  ;;  %v1573_v44 = vld [vmem:[#allocation7 + $0x50] sm:$0xff] }
 0x426   : > { %v749_v53 = vmul.f32 %v1498_v51, %v730_v45  ;;  %1499 = vrcp.f32 %v2350_v49  ;;  %vm754_vm1 = vweird.f32 %v1498_v51  ;;  %vm740_vm4 = vmor %vm738_vm2, %vm739_vm0  ;;  %v774_v8 = vand.u32 2147483648, %v2350_v49  ;;  %v1574_v45 = vld [vmem:[#allocation7 + $0xd0] sm:$0xff] }
 0x427   : > { %v735_v54 = vsub.f32 1.0, %v734_v52  ;;  %1501 = vrcp.f32 %v2352_v50  ;;  %vm755_vm6 = vmor %vm753_vm3, %vm754_vm1  ;;  %v772_v41 = vand.u32 2147483647, %v2350_v49  ;;  %v789_v38 = vand.u32 2147483648, %v2352_v50  ;;  %v1583_v52 = vld [vmem:[#allocation7 + $0x28] sm:$0xff] }
 0x428   : > { %v750_v56 = vsub.f32 1.0, %v749_v53  ;;  %v787_v27 = vand.u32 2147483647, %v2352_v50  ;;  %vm768_vm10 = vweird.f32 %v2350_v49  ;;  %v775_v35 = vor.u32 1.1754944e-38, %v774_v8  ;;  %v1584_v53 = vld [vmem:[#allocation7 + $0xa8] sm:$0xff] }
 0x429   : > { %v736_v57 = vmul.f32 %v1496_v48, %v735_v54  ;;  %vm783_vm12 = vweird.f32 %v2352_v50  ;;  %vm773_vm13 = vcmp.eq.f32.partialorder %v772_v41, 8.507059e+37  ;;  %v790_v22 = vor.u32 1.1754944e-38, %v789_v38  ;;  %v1585_v54 = vld [vmem:[#allocation7 + $0x20] sm:$0xff] }
 0x42a   : > { %v751_v60 = vmul.f32 %v1498_v51, %v750_v56  ;;  %vm788_vm15 = vcmp.eq.f32.partialorder %v787_v27, 8.507059e+37  ;;  %v1587_v56 = vld [vmem:[#allocation7 + $0x18] sm:$0xff] }
 0x42b   : > { %v737_v63 = vadd.f32 %v1496_v48, %v736_v57  ;;  %v1588_v57 = vld [vmem:[#allocation7 + $0x98] sm:$0xff] }
 0x42c   : > { %v1500_v10 = vpop.eup %1499  ;;  %v752_v4 = vadd.f32 %v1498_v51, %v751_v60  ;;  %v1591_v60 = vld [vmem:[#allocation7 + $0x8] sm:$0xff] }
 0x42d   : > { %v1502_v37 = vpop.eup %1501  ;;  %v764_v18 = vmul.f32 %v1500_v10, %v2350_v49  ;;  %v741_v30 = vsel %vm740_vm4, %v1496_v48, %v737_v63  ;;  %vm769_vm8 = vweird.f32 %v1500_v10  ;;  %v1579_v48 = vld [vmem:[#allocation7 + $0x38] sm:$0xff]  ;;  %v1593_v63 = vld [vmem:[#allocation7] sm:$0xff] }
 0x42e   : > { %v779_v40 = vmul.f32 %v1502_v37, %v2352_v50  ;;  %v746_v0 = vsel %vm743_vm5, %v745_v23, %v741_v30  ;;  %v756_v1 = vsel %vm755_vm6, %v1498_v51, %v752_v4  ;;  %vm784_vm9 = vweird.f32 %v1502_v37  ;;  %vm770_vm11 = vmor %vm768_vm10, %vm769_vm8  ;;  %v1580_v49 = vld [vmem:[#allocation7 + $0xb8] sm:$0xff]  ;;  %v1581_v50 = vld [vmem:[#allocation7 + $0x30] sm:$0xff] }
 0x42f   : > { %v747_v6 = vmul.f32 %v746_v0, %v2194_v32  ;;  %v761_v12 = vsel %vm758_vm7, %v760_v9, %v756_v1  ;;  %v765_v42 = vsub.f32 1.0, %v764_v18  ;;  %v1563_v32 = vld [vmem:[#allocation7 + $0x78] sm:$0xff]  ;;  %vm785_vm14 = vmor %vm783_vm12, %vm784_vm9  ;;  %v1582_v51 = vld [vmem:[#allocation7 + $0xb0] sm:$0xff] }
 0x430   : > { %v762_v26 = vmul.f32 %v761_v12, %v2200_v11  ;;  %v780_v36 = vsub.f32 1.0, %v779_v40  ;;  %v1564_v11 = vld [vmem:[#allocation7 + $0xf8] sm:$0xff] }
 0x431   : > { %809 = vmatmul.f32.vlgmr.msra.gmra.mxu2 %v747_v6  ;;  %v766_v2 = vmul.f32 %v1500_v10, %v765_v42 }
 0x432   : > { %832 = vmatmul.f32.vlgmr.msra.gmra.mxu3 %v762_v26  ;;  %v781_v5 = vmul.f32 %v1502_v37, %v780_v36  ;;  %1181 = vmatpush.msra.mxu2 %v1563_v32 }
 0x433   : > { %v767_v19 = vadd.f32 %v1500_v10, %v766_v2  ;;  %1204 = vmatpush.msra.mxu3 %v1564_v11 }
 0x434   : > { %v782_v31 = vadd.f32 %v1502_v37, %v781_v5  ;;  %1182 = vmatpush.msra.mxu2 %v1565_v33 }
 0x435   : > { %v771_v13 = vsel %vm770_vm11, %v1500_v10, %v767_v19  ;;  %1205 = vmatpush.msra.mxu3 %v1566_v14  ;;  %v1594_v10 = vld [vmem:[#allocation7 + $0x80] sm:$0xff] }
 0x436   : > { %v776_v15 = vsel %vm773_vm13, %v775_v35, %v771_v13  ;;  %v786_v3 = vsel %vm785_vm14, %v1502_v37, %v782_v31  ;;  %1183 = vmatpush.msra.mxu2 %v1567_v16 }
 0x437   : > { %v777_v17 = vmul.f32 %v776_v15, %v2218_v34  ;;  %v791_v20 = vsel %vm788_vm15, %v790_v22, %v786_v3  ;;  %1206 = vmatpush.msra.mxu3 %v1568_v21  ;;  %v1575_v34 = vld [vmem:[#allocation7 + $0x48] sm:$0xff] }
 0x438   : > { %v792_v24 = vmul.f32 %v791_v20, %v2223_v39  ;;  %1184 = vmatpush.msra.mxu2 %v1569_v25  ;;  %v1578_v39 = vld [vmem:[#allocation7 + $0xc0] sm:$0xff] }
 0x439   : > { %812 = vmatmul.f32.gmra.mxu2 %v777_v17  ;;  %1207 = vmatpush.msra.mxu3 %v1570_v28 }
 0x43a   : > { %835 = vmatmul.f32.gmra.mxu3 %v792_v24  ;;  %1185 = vmatpush.msra.mxu2 %v1571_v29 }
 0x43b   : > { %1208 = vmatpush.msra.mxu3 %v1572_v43 }
 0x43c   : > { %1186 = vmatpush.msra.mxu2 %v1573_v44 }
 0x43d   : > { %1209 = vmatpush.msra.mxu3 %v1574_v45 }
 0x43e   : > { %1187 = vmatpush.msra.mxu2 %v1575_v34 }
 0x43f   : > { %1210 = vmatpush.msra.mxu3 %v1576_v46 }
 0x440   : > { %1188 = vmatpush.msra.mxu2 %v1577_v47 }
 0x441   : > { %1211 = vmatpush.msra.mxu3 %v1578_v39 }
 0x442   : > { %1189 = vmatpush.msra.mxu2 %v1579_v48 }
 0x443   : > { %1212 = vmatpush.msra.mxu3 %v1580_v49 }
 0x444   : > { %1190 = vmatpush.msra.mxu2 %v1581_v50 }
 0x445   : > { %1213 = vmatpush.msra.mxu3 %v1582_v51 }
 0x446   : > { %1191 = vmatpush.msra.mxu2 %v1583_v52 }
 0x447   : > { %1214 = vmatpush.msra.mxu3 %v1584_v53 }
 0x448   : > { %1192 = vmatpush.msra.mxu2 %v1585_v54 }
 0x449   : > { %1215 = vmatpush.msra.mxu3 %v1586_v55 }
 0x44a   : > { %1193 = vmatpush.msra.mxu2 %v1587_v56 }
 0x44b   : > { %1216 = vmatpush.msra.mxu3 %v1588_v57 }
 0x44c   : > { %1194 = vmatpush.msra.mxu2 %v1589_v58 }
 0x44d   : > { %1217 = vmatpush.msra.mxu3 %v1590_v59 }
 0x44e   : > { %1195 = vmatpush.msra.mxu2 %v1591_v60 }
 0x44f   : > { %1218 = vmatpush.msra.mxu3 %v1592_v62 }
 0x450   : > { %1196 = vmatpush.msra.mxu2 %v1593_v63 }
 0x451   : > { %1219 = vmatpush.msra.mxu3 %v1594_v10 }
 0x4b4   : > { %v810_v23 = vpop.f32.mrf.mxu2 }
 0x4b5   : > { %v833_v4 = vpop.f32.mrf.mxu3 }
 0x4b6   : > { %v834_v37 = vadd.f32 %v833_v4, %v810_v23  ;;  %v2384_v4 = vld [vmem:[%s1895_s7] sm:$0xff] }
 0x4b8   : > { %v839_v18 = vmul.f32 %v834_v37, %v2342_v61 }
 0x4ba   : > { %v841_v30 = vmax.f32 %v839_v18, 1e-05 }
 0x4bc   : > { %843 = vadd.xlane.f32.xlu2 %v841_v30  ;;  %v813_v9 = vpop.f32.mrf.mxu2 }
 0x4bd   : > { %v836_v40 = vpop.f32.mrf.mxu3 }
 0x4be   : > { %v837_v0 = vadd.f32 %v836_v40, %v813_v9  ;;  %v2388_v9 = vld [vmem:[%s1895_s7 + $0x8] sm:$0xff] }
 0x4c0   : > { %v840_v1 = vmul.f32 %v837_v0, %v2346_v7 }
 0x4c2   : > { %v842_v6 = vmax.f32 %v840_v1, 1e-05 }
 0x4c4   : > { %845 = vadd.xlane.f32.xlu2 %v842_v6 }
 0x52f   : > { %v844_v12 = vpop.xlane.xlu2 %843 }
 0x530   : > { %1503 = vrcp.f32 %v844_v12  ;;  %v858_v2 = vand.u32 2147483648, %v844_v12  ;;  %v856_v61 = vand.u32 2147483647, %v844_v12  ;;  %vm852_vm1 = vweird.f32 %v844_v12 }
 0x532   : > { %v859_v27 = vor.u32 1.1754944e-38, %v858_v2  ;;  %vm857_vm3 = vcmp.eq.f32.partialorder %v856_v61, 8.507059e+37 }
 0x536   : > { %v1504_v42 = vpop.eup %1503 }
 0x537   : > { %v848_v26 = vmul.f32 %v1504_v42, %v844_v12  ;;  %v846_v8 = vpop.xlane.xlu2 %845  ;;  %vm853_vm0 = vweird.f32 %v1504_v42 }
 0x538   : > { %1505 = vrcp.f32 %v846_v8  ;;  %vm854_vm2 = vmor %vm852_vm1, %vm853_vm0  ;;  %v872_v31 = vand.u32 2147483648, %v846_v8  ;;  %v870_v13 = vand.u32 2147483647, %v846_v8  ;;  %vm866_vm5 = vweird.f32 %v846_v8 }
 0x539   : > { %v849_v36 = vsub.f32 1.0, %v848_v26 }
 0x53a   : > { %v873_v14 = vor.u32 1.1754944e-38, %v872_v31  ;;  %vm871_vm7 = vcmp.eq.f32.partialorder %v870_v13, 8.507059e+37 }
 0x53b   : > { %v850_v41 = vmul.f32 %v1504_v42, %v849_v36 }
 0x53d   : > { %v851_v38 = vadd.f32 %v1504_v42, %v850_v41 }
 0x53e   : > { %v1506_v5 = vpop.eup %1505 }
 0x53f   : > { %v862_v7 = vmul.f32 %v1506_v5, %v846_v8  ;;  %v855_v32 = vsel %vm854_vm2, %v1504_v42, %v851_v38  ;;  %vm867_vm4 = vweird.f32 %v1506_v5 }
 0x540   : > { %v860_v19 = vsel %vm857_vm3, %v859_v27, %v855_v32  ;;  %vm868_vm6 = vmor %vm866_vm5, %vm867_vm4 }
 0x541   : > { %v863_v11 = vsub.f32 1.0, %v862_v7  ;;  %v2371_v35 = vmul.f32 %v860_v19, %v841_v30  ;;  %v2395_v7 = vld [vmem:[%s1895_s7 + $0x10] sm:$0xff] }
 0x543   : > { %v864_v33 = vmul.f32 %v1506_v5, %v863_v11  ;;  %893 = vmatmul.f32.vlgmr.msrb.gmra.mxu0 %v2371_v35  ;;  %916 = vmatmul.f32.vlgmr.msrb.gmra.mxu1 %v2371_v35  ;;  %v2399_v11 = vld [vmem:[%s1895_s7 + $0x18] sm:$0xff] }
 0x545   : > { %v865_v22 = vadd.f32 %v1506_v5, %v864_v33 }
 0x547   : > { %v869_v15 = vsel %vm868_vm6, %v1506_v5, %v865_v22 }
 0x548   : > { %v874_v3 = vsel %vm871_vm7, %v873_v14, %v869_v15 }
 0x549   : > { %v2375_v16 = vmul.f32 %v874_v3, %v842_v6 }
 0x54b   : > { %896 = vmatmul.f32.gmra.mxu0 %v2375_v16  ;;  %919 = vmatmul.f32.gmra.mxu1 %v2375_v16 }
 0x5c0   : > { %v894_v17 = vpop.f32.mrf.mxu0  ;;  %v917_v20 = vpop.f32.mrf.mxu1 }
 0x5c1   : > { %v923_v21 = vmax.f32 %v894_v17, 1e-05  ;;  %v924_v24 = vmax.f32 %v917_v20, 1e-05 }
 0x5c3   : > { %1507 = vrcp.f32 %v923_v21  ;;  %v938_v39 = vand.u32 2147483648, %v923_v21  ;;  %v953_v50 = vand.u32 2147483648, %v924_v24  ;;  %v936_v51 = vand.u32 2147483647, %v923_v21 }
 0x5c4   : > { %1509 = vrcp.f32 %v924_v24  ;;  %v951_v53 = vand.u32 2147483647, %v924_v24  ;;  %vm932_vm10 = vweird.f32 %v923_v21  ;;  %vm947_vm11 = vweird.f32 %v924_v24 }
 0x5c5   : > { %v939_v56 = vor.u32 1.1754944e-38, %v938_v39  ;;  %vm937_vm13 = vcmp.eq.f32.partialorder %v936_v51, 8.507059e+37  ;;  %v954_v62 = vor.u32 1.1754944e-38, %v953_v50 }
 0x5c6   : > { %vm952_vm15 = vcmp.eq.f32.partialorder %v951_v53, 8.507059e+37 }
 0x5c8   : > { %v897_v25 = vpop.f32.mrf.mxu0  ;;  %v920_v28 = vpop.f32.mrf.mxu1 }
 0x5c9   : > { %v1508_v29 = vpop.eup %1507  ;;  %v925_v43 = vmax.f32 %v897_v25, 1e-05  ;;  %v2379_v44 = vmax.f32 %v920_v28, 1e-05 }
 0x5ca   : > { %v1510_v45 = vpop.eup %1509  ;;  %v928_v34 = vmul.f32 %v1508_v29, %v923_v21  ;;  %vm933_vm8 = vweird.f32 %v1508_v29 }
 0x5cb   : > { %v943_v46 = vmul.f32 %v1510_v45, %v924_v24  ;;  %1511 = vrcp.f32 %v925_v43  ;;  %vm948_vm9 = vweird.f32 %v1510_v45  ;;  %vm934_vm12 = vmor %vm932_vm10, %vm933_vm8  ;;  %v968_v0 = vand.u32 2147483648, %v925_v43 }
 0x5cc   : > { %v929_v47 = vsub.f32 1.0, %v928_v34  ;;  %1513 = vrcp.f32 %v2379_v44  ;;  %vm949_vm14 = vmor %vm947_vm11, %vm948_vm9  ;;  %v966_v12 = vand.u32 2147483647, %v925_v43  ;;  %v983_v42 = vand.u32 2147483648, %v2379_v44 }
 0x5cd   : > { %v944_v48 = vsub.f32 1.0, %v943_v46  ;;  %v981_v8 = vand.u32 2147483647, %v2379_v44  ;;  %vm962_vm2 = vweird.f32 %v925_v43  ;;  %v969_v2 = vor.u32 1.1754944e-38, %v968_v0 }
 0x5ce   : > { %v930_v49 = vmul.f32 %v1508_v29, %v929_v47  ;;  %vm977_vm4 = vweird.f32 %v2379_v44  ;;  %vm967_vm5 = vcmp.eq.f32.partialorder %v966_v12, 8.507059e+37  ;;  %v984_v38 = vor.u32 1.1754944e-38, %v983_v42 }
 0x5cf   : > { %v945_v52 = vmul.f32 %v1510_v45, %v944_v48  ;;  %vm982_vm7 = vcmp.eq.f32.partialorder %v981_v8, 8.507059e+37 }
 0x5d0   : > { %v931_v54 = vadd.f32 %v1508_v29, %v930_v49 }
 0x5d1   : > { %v1512_v55 = vpop.eup %1511  ;;  %v946_v57 = vadd.f32 %v1510_v45, %v945_v52 }
 0x5d2   : > { %v1514_v58 = vpop.eup %1513  ;;  %v958_v59 = vmul.f32 %v1512_v55, %v925_v43  ;;  %v935_v60 = vsel %vm934_vm12, %v1508_v29, %v931_v54  ;;  %vm963_vm0 = vweird.f32 %v1512_v55 }
 0x5d3   : > { %v973_v63 = vmul.f32 %v1514_v58, %v2379_v44  ;;  %v940_v10 = vsel %vm937_vm13, %v939_v56, %v935_v60  ;;  %v950_v23 = vsel %vm949_vm14, %v1510_v45, %v946_v57  ;;  %vm978_vm1 = vweird.f32 %v1514_v58  ;;  %vm964_vm3 = vmor %vm962_vm2, %vm963_vm0 }
 0x5d4   : > { %v941_v37 = vmul.f32 %v2384_v4, %v940_v10  ;;  %v955_v18 = vsel %vm952_vm15, %v954_v62, %v950_v23  ;;  %v959_v30 = vsub.f32 1.0, %v958_v59  ;;  %vm979_vm6 = vmor %vm977_vm4, %vm978_vm1 }
 0x5d5   : > { %v956_v40 = vmul.f32 %v2388_v9, %v955_v18  ;;  %v974_v1 = vsub.f32 1.0, %v973_v63 }
 0x5d6   : > { %1003 = vmatmul.f32.vlgmr.msrb.gmra.mxu2 %v941_v37  ;;  %v960_v6 = vmul.f32 %v1512_v55, %v959_v30 }
 0x5d7   : > { %1026 = vmatmul.f32.vlgmr.msrb.gmra.mxu3 %v956_v40  ;;  %v975_v26 = vmul.f32 %v1514_v58, %v974_v1 }
 0x5d8   : > { %v961_v36 = vadd.f32 %v1512_v55, %v960_v6 }
 0x5d9   : > { %v976_v41 = vadd.f32 %v1514_v58, %v975_v26 }
 0x5da   : > { %v965_v61 = vsel %vm964_vm3, %v1512_v55, %v961_v36 }
 0x5db   : > { %v970_v5 = vsel %vm967_vm5, %v969_v2, %v965_v61  ;;  %v980_v27 = vsel %vm979_vm6, %v1514_v58, %v976_v41 }
 0x5dc   : > { %v971_v32 = vmul.f32 %v2395_v7, %v970_v5  ;;  %v985_v19 = vsel %vm982_vm7, %v984_v38, %v980_v27 }
 0x5dd   : > { %v986_v31 = vmul.f32 %v2399_v11, %v985_v19 }
 0x5de   : > { %1006 = vmatmul.f32.gmra.mxu2 %v971_v32 }
 0x5df   : > { %1029 = vmatmul.f32.gmra.mxu3 %v986_v31 }
 0x659   : > { %v1004_v33 = vpop.f32.mrf.mxu2 }
 0x65a   : > { %v1027_v13 = vpop.f32.mrf.mxu3 }
 0x65b   : > { %v1028_v22 = vadd.f32 %v1027_v13, %v1004_v33 }
 0x65d   : > { %v1033_v14 = vmul.f32 %v1028_v22, %v2371_v35 }
 0x65f   : > { %v1035_v15 = vmax.f32 %v1033_v14, 1e-05 }
 0x661   : > { %1037 = vadd.xlane.f32.xlu0 %v1035_v15  ;;  %v1007_v3 = vpop.f32.mrf.mxu2 }
 0x662   : > { %v1030_v17 = vpop.f32.mrf.mxu3 }
 0x663   : > { %v1031_v20 = vadd.f32 %v1030_v17, %v1007_v3 }
 0x665   : > { %v1034_v21 = vmul.f32 %v1031_v20, %v2375_v16 }
 0x667   : > { %v1036_v24 = vmax.f32 %v1034_v21, 1e-05 }
 0x669   : > { %1039 = vadd.xlane.f32.xlu1 %v1036_v24 }
 0x6d4   : > { %v1038_v25 = vpop.xlane.xlu0 %1037 }
 0x6d5   : > { %1515 = vrcp.f32 %v1038_v25  ;;  %v1052_v45 = vand.u32 2147483648, %v1038_v25  ;;  %v1050_v35 = vand.u32 2147483647, %v1038_v25  ;;  %vm1046_vm9 = vweird.f32 %v1038_v25 }
 0x6d7   : > { %v1053_v39 = vor.u32 1.1754944e-38, %v1052_v45  ;;  %vm1051_vm11 = vcmp.eq.f32.partialorder %v1050_v35, 8.507059e+37 }
 0x6db   : > { %v1516_v28 = vpop.eup %1515 }
 0x6dc   : > { %v1042_v29 = vmul.f32 %v1516_v28, %v1038_v25  ;;  %v1040_v43 = vpop.xlane.xlu1 %1039  ;;  %vm1047_vm8 = vweird.f32 %v1516_v28 }
 0x6dd   : > { %1517 = vrcp.f32 %v1040_v43  ;;  %vm1048_vm10 = vmor %vm1046_vm9, %vm1047_vm8  ;;  %v1066_v52 = vand.u32 2147483648, %v1040_v43  ;;  %v1064_v54 = vand.u32 2147483647, %v1040_v43  ;;  %vm1060_vm13 = vweird.f32 %v1040_v43 }
 0x6de   : > { %v1043_v44 = vsub.f32 1.0, %v1042_v29 }
 0x6df   : > { %v1067_v56 = vor.u32 1.1754944e-38, %v1066_v52  ;;  %vm1065_vm15 = vcmp.eq.f32.partialorder %v1064_v54, 8.507059e+37 }
 0x6e0   : > { %v1044_v34 = vmul.f32 %v1516_v28, %v1043_v44 }
 0x6e2   : > { %v1045_v46 = vadd.f32 %v1516_v28, %v1044_v34 }
 0x6e3   : > { %v1518_v47 = vpop.eup %1517 }
 0x6e4   : > { %v1056_v16 = vmul.f32 %v1518_v47, %v1040_v43  ;;  %v1049_v48 = vsel %vm1048_vm10, %v1516_v28, %v1045_v46  ;;  %vm1061_vm12 = vweird.f32 %v1518_v47 }
 0x6e5   : > { %v1054_v49 = vsel %vm1051_vm11, %v1053_v39, %v1049_v48  ;;  %vm1062_vm14 = vmor %vm1060_vm13, %vm1061_vm12 }
 0x6e6   : > { %v1057_v50 = vsub.f32 1.0, %v1056_v16  ;;  %v2404_v51 = vmul.f32 %v1054_v49, %v1035_v15 }
 0x6e8   : > { %v1058_v53 = vmul.f32 %v1518_v47, %v1057_v50  ;;  %1087 = vmatmul.f32.vlgmr.msra.gmra.mxu0 %v2404_v51  ;;  %1110 = vmatmul.f32.vlgmr.msra.gmra.mxu1 %v2404_v51 }
 0x6ea   : > { %v1059_v55 = vadd.f32 %v1518_v47, %v1058_v53 }
 0x6ec   : > { %v1063_v57 = vsel %vm1062_vm14, %v1518_v47, %v1059_v55 }
 0x6ed   : > { %v1068_v58 = vsel %vm1065_vm15, %v1067_v56, %v1063_v57 }
 0x6ee   : > { %v2408_v59 = vmul.f32 %v1068_v58, %v1036_v24 }
 0x6f0   : > { %1090 = vmatmul.f32.gmra.mxu0 %v2408_v59  ;;  %1113 = vmatmul.f32.gmra.mxu1 %v2408_v59 }
 0x765   : > { %v1088_v60 = vpop.f32.mrf.mxu0  ;;  %v1111_v62 = vpop.f32.mrf.mxu1 }
 0x766   : > { %v1117_v63 = vmax.f32 %v1088_v60, 1e-05  ;;  %v1118_v10 = vmax.f32 %v1111_v62, 1e-05 }
 0x768   : > { %1519 = vrcp.f32 %v1117_v63  ;;  %v1132_v42 = vand.u32 2147483648, %v1117_v63  ;;  %v1147_v36 = vand.u32 2147483648, %v1118_v10  ;;  %v1130_v2 = vand.u32 2147483647, %v1117_v63 }
 0x769   : > { %1521 = vrcp.f32 %v1118_v10  ;;  %v1145_v61 = vand.u32 2147483647, %v1118_v10  ;;  %vm1126_vm2 = vweird.f32 %v1117_v63  ;;  %vm1141_vm3 = vweird.f32 %v1118_v10 }
 0x76a   : > { %v1133_v27 = vor.u32 1.1754944e-38, %v1132_v42  ;;  %vm1131_vm5 = vcmp.eq.f32.partialorder %v1130_v2, 8.507059e+37  ;;  %v1148_v13 = vor.u32 1.1754944e-38, %v1147_v36 }
 0x76b   : > { %vm1146_vm7 = vcmp.eq.f32.partialorder %v1145_v61, 8.507059e+37 }
 0x76d   : > { %v1091_v23 = vpop.f32.mrf.mxu0  ;;  %v1114_v37 = vpop.f32.mrf.mxu1 }
 0x76e   : > { %v1520_v18 = vpop.eup %1519  ;;  %v1119_v30 = vmax.f32 %v1091_v23, 1e-05  ;;  %v1120_v40 = vmax.f32 %v1114_v37, 1e-05 }
 0x76f   : > { %v1522_v0 = vpop.eup %1521  ;;  %v1122_v1 = vmul.f32 %v1520_v18, %v1117_v63  ;;  %vm1127_vm0 = vweird.f32 %v1520_v18 }
 0x770   : > { %v1137_v6 = vmul.f32 %v1522_v0, %v1118_v10  ;;  %1523 = vrcp.f32 %v1119_v30  ;;  %vm1142_vm1 = vweird.f32 %v1522_v0  ;;  %vm1128_vm4 = vmor %vm1126_vm2, %vm1127_vm0  ;;  %v1162_v25 = vand.u32 2147483648, %v1119_v30 }
 0x771   : > { %v1123_v12 = vsub.f32 1.0, %v1122_v1  ;;  %1525 = vrcp.f32 %v1120_v40  ;;  %vm1143_vm6 = vmor %vm1141_vm3, %vm1142_vm1  ;;  %v1160_v29 = vand.u32 2147483647, %v1119_v30  ;;  %v1177_v43 = vand.u32 2147483648, %v1120_v40 }
 0x772   : > { %v1138_v26 = vsub.f32 1.0, %v1137_v6  ;;  %v1175_v45 = vand.u32 2147483647, %v1120_v40  ;;  %vm1156_vm10 = vweird.f32 %v1119_v30  ;;  %v1163_v35 = vor.u32 1.1754944e-38, %v1162_v25 }
 0x773   : > { %v1124_v8 = vmul.f32 %v1520_v18, %v1123_v12  ;;  %vm1171_vm12 = vweird.f32 %v1120_v40  ;;  %vm1161_vm13 = vcmp.eq.f32.partialorder %v1160_v29, 8.507059e+37 }
 0x774   : > { %v1139_v41 = vmul.f32 %v1522_v0, %v1138_v26  ;;  %vm1176_vm15 = vcmp.eq.f32.partialorder %v1175_v45, 8.507059e+37 }
 0x775   : > { %v1125_v38 = vadd.f32 %v1520_v18, %v1124_v8 }
 0x776   : > { %v1524_v5 = vpop.eup %1523  ;;  %v1140_v32 = vadd.f32 %v1522_v0, %v1139_v41 }
 0x777   : > { %v1526_v19 = vpop.eup %1525  ;;  %v1152_v31 = vmul.f32 %v1524_v5, %v1119_v30  ;;  %v1129_v33 = vsel %vm1128_vm4, %v1520_v18, %v1125_v38  ;;  %vm1157_vm8 = vweird.f32 %v1524_v5 }
 0x778   : > { %v1167_v22 = vmul.f32 %v1526_v19, %v1120_v40  ;;  %v1134_v14 = vsel %vm1131_vm5, %v1133_v27, %v1129_v33  ;;  %v1144_v15 = vsel %vm1143_vm6, %v1522_v0, %v1140_v32  ;;  %vm1172_vm9 = vweird.f32 %v1526_v19  ;;  %vm1158_vm11 = vmor %vm1156_vm10, %vm1157_vm8 }
 0x779   : > { %v1153_v3 = vsub.f32 1.0, %v1152_v31  ;;  %v1135_v17 = vmul.f32 %v2384_v4, %v1134_v14  ;;  %v1149_v20 = vsel %vm1146_vm7, %v1148_v13, %v1144_v15  ;;  %vm1173_vm14 = vmor %vm1171_vm12, %vm1172_vm9 }
 0x77a   : > { %v1168_v21 = vsub.f32 1.0, %v1167_v22  ;;  %v1150_v24 = vmul.f32 %v2388_v9, %v1149_v20  ;;  %v1178_v9 = vor.u32 1.1754944e-38, %v1177_v43 }
 0x77b   : > { %1197 = vmatmul.f32.vlgmr.msra.gmra.mxu2 %v1135_v17  ;;  %v1154_v28 = vmul.f32 %v1524_v5, %v1153_v3 }
 0x77c   : > { %1220 = vmatmul.f32.vlgmr.msra.gmra.mxu3 %v1150_v24  ;;  %v1169_v44 = vmul.f32 %v1526_v19, %v1168_v21 }
 0x77d   : > { %v1155_v34 = vadd.f32 %v1524_v5, %v1154_v28 }
 0x77e   : > { %v1170_v46 = vadd.f32 %v1526_v19, %v1169_v44 }
 0x77f   : > { %v1159_v4 = vsel %vm1158_vm11, %v1524_v5, %v1155_v34 }
 0x780   : > { %v1164_v47 = vsel %vm1161_vm13, %v1163_v35, %v1159_v4  ;;  %v1174_v39 = vsel %vm1173_vm14, %v1526_v19, %v1170_v46 }
 0x781   : > { %v1165_v16 = vmul.f32 %v2395_v7, %v1164_v47  ;;  %v1179_v48 = vsel %vm1176_vm15, %v1178_v9, %v1174_v39 }
 0x782   : > { %v1180_v49 = vmul.f32 %v2399_v11, %v1179_v48 }
 0x783   : > { %1200 = vmatmul.f32.gmra.mxu2 %v1165_v16 }
 0x784   : > { %1223 = vmatmul.f32.gmra.mxu3 %v1180_v49 }
 0x7fe   : > { %v1198_v50 = vpop.f32.mrf.mxu2 }
 0x7ff   : > { %v1221_v52 = vpop.f32.mrf.mxu3 }
 0x800   : > { %v1222_v53 = vadd.f32 %v1221_v52, %v1198_v50 }
 0x802   : > { %v1227_v54 = vmul.f32 %v1222_v53, %v2404_v51 }
 0x804   : > { %v1229_v55 = vmax.f32 %v1227_v54, 1e-05 }
 0x806   : > { %1231 = vadd.xlane.f32.xlu2 %v1229_v55  ;;  %v1201_v56 = vpop.f32.mrf.mxu2 }
 0x807   : > { %v1224_v57 = vpop.f32.mrf.mxu3 }
 0x808   : > { %v1225_v58 = vadd.f32 %v1224_v57, %v1201_v56 }
 0x80a   : > { %v1228_v60 = vmul.f32 %v1225_v58, %v2408_v59 }
 0x80c   : > { %v1230_v62 = vmax.f32 %v1228_v60, 1e-05 }
 0x80e   : > { %1233 = vadd.xlane.f32.xlu0 %v1230_v62 }
 0x879   : > { %v1232_v7 = vpop.xlane.xlu2 %1231 }
 0x87a   : > { %1527 = vrcp.f32 %v1232_v7  ;;  %v1246_v37 = vand.u32 2147483648, %v1232_v7  ;;  %v1244_v18 = vand.u32 2147483647, %v1232_v7  ;;  %vm1240_vm1 = vweird.f32 %v1232_v7 }
 0x87c   : > { %v1247_v59 = vor.u32 1.1754944e-38, %v1246_v37  ;;  %vm1245_vm3 = vcmp.eq.f32.partialorder %v1244_v18, 8.507059e+37 }
 0x880   : > { %v1528_v11 = vpop.eup %1527 }
 0x881   : > { %v1236_v63 = vmul.f32 %v1528_v11, %v1232_v7  ;;  %v1234_v10 = vpop.xlane.xlu0 %1233  ;;  %vm1241_vm0 = vweird.f32 %v1528_v11 }
 0x882   : > { %1529 = vrcp.f32 %v1234_v10  ;;  %vm1242_vm2 = vmor %vm1240_vm1, %vm1241_vm0  ;;  %v1260_v26 = vand.u32 2147483648, %v1234_v10  ;;  %v1258_v36 = vand.u32 2147483647, %v1234_v10  ;;  %vm1254_vm5 = vweird.f32 %v1234_v10 }
 0x883   : > { %v1237_v23 = vsub.f32 1.0, %v1236_v63 }
 0x884   : > { %v1261_v41 = vor.u32 1.1754944e-38, %v1260_v26  ;;  %vm1259_vm7 = vcmp.eq.f32.partialorder %v1258_v36, 8.507059e+37 }
 0x885   : > { %v1238_v51 = vmul.f32 %v1528_v11, %v1237_v23 }
 0x887   : > { %v1239_v30 = vadd.f32 %v1528_v11, %v1238_v51 }
 0x888   : > { %v1530_v40 = vpop.eup %1529 }
 0x889   : > { %v1243_v0 = vsel %vm1242_vm2, %v1528_v11, %v1239_v30  ;;  %v1250_v1 = vmul.f32 %v1530_v40, %v1234_v10  ;;  %vm1255_vm4 = vweird.f32 %v1530_v40 }
 0x88a   : > { %v1248_v6 = vsel %vm1245_vm3, %v1247_v59, %v1243_v0  ;;  %vm1256_vm6 = vmor %vm1254_vm5, %vm1255_vm4 }
 0x88b   : > { %v1263_v12 = vmul.f32 %v1248_v6, %v1229_v55  ;;  %v1251_v42 = vsub.f32 1.0, %v1250_v1 }
 0x88d   : > { %1265 = vst [vmem:[%s224_s4] sm:$0xff] %v1263_v12  ;;  %v1252_v8 = vmul.f32 %v1530_v40, %v1251_v42 }
 0x88f   : > { %v1253_v2 = vadd.f32 %v1530_v40, %v1252_v8 }
 0x891   : > { %v1257_v61 = vsel %vm1256_vm6, %v1530_v40, %v1253_v2 }
 0x892   : > { %v1262_v38 = vsel %vm1259_vm7, %v1261_v41, %v1257_v61 }
 0x893   : > { %v1264_v5 = vmul.f32 %v1262_v38, %v1230_v62 }
 0x895   : > { %1266 = vst [vmem:[%s224_s4 + $0x8] sm:$0xff] %v1264_v5 }
 0x896   : > { %1716 = shalt.err (!%p1713_p10)
}
 0x897   : > { %s1768_s20 = smov 128   ;;  %s1769_s27 = smov 8  }
 0x898   : > { %1407 = dma.vmem_to_hbm [thread:$0]  (%p1861_p3), %s1281_s5, 256, %s1283_s6, %s1268_s16, %s1768_s20, %s1768_s20, %s1769_s27  }
 0x899 PF: > { %p1429_p11 = scmp.ge.s32.totalorder %s1759_s15, 2  ;;  %s1297_s7 = sand.u32 1, %s1747_s12  }
 0x89a   : > { %s1298_s18 = scalar_lea.sflag [#allocation4], %s1297_s7 }
 0x89b   : > { %p1421_p12 = pnand %p1429_p11, %p1825_p6 }
 0x89d   : > { %p1422_p13 = pneg %p1421_p12 }
 0x89f   : > { %1742 = dma.done.wait (%p1422_p13), %s1298_s18, 256  }
 0x8a0   : > { %1744 = vsyncadd (%p1422_p13), %s1298_s18, 4294967040  ;;  %p17_p0 = scmp.ge.s32.totalorder %s1848_s8, 5   ;;  %s2532_s12 = smov %s1751_s13 }
 0x8a1   : > { %s2533_s13 = smov %s1755_s14  ;;  %s2534_s14 = smov %s1857_s11 }
 0x8a2   : > { %s2535_s15 = smov %s1848_s8  ;;  %19 = sbr.rel (!%p17_p0) target bundleno = 6 (0x6), region = 85 }
 0x8a7   :  { %1304 = vsyncpa [#allocation3], 1 }
 0x8a8   :  { %1306 = vsyncpa [#allocation3 + $0x1], 1 }
 0x8a9   :  { %1307 = vsyncpa [#allocation6], 1 }
 0x8aa   :  { %1308 = vsyncpa [#allocation4], 1 }
 0x8ab   :  { %1310 = vsyncpa [#allocation4 + $0x1], 1 }

</bundles_post_ra>
